<compile_context>
chip_gen: v7x
topology: tpu7x:2x2x1
jax: 0.10.0
libtpu: 0.0.40
codegen_flags: <defaults>
</compile_context>

<pallas_src>
import functools

import jax
import jax.numpy as jnp
from jax import lax
from jax.experimental import pallas as pl
from jax.experimental.pallas import tpu as pltpu

GP = 128          # lane-padded width of each GRU gate block / hidden state
TP = 128          # lane-padded width of the tag (output) dimension
NEG = -1e30       # logit mask for padded tag lanes (softmax -> 0)


def _bigru_tagger_kernel(
    tokens_ref,                 # (S, 1)       int32
    emb_ref,                    # (V, H)       f32
    wih_ref, bih_ref,           # (H, 6*GP), (1, 6*GP)  fwd|bwd packed, gates [r|z|n] each GP wide
    whh_f_ref, bhh_f_ref,       # (GP, 3*GP), (1, 3*GP)
    whh_b_ref, bhh_b_ref,       # (GP, 3*GP), (1, 3*GP)
    wlin_ref, blin_ref,         # (2*GP, TP), (1, TP)
    h0_ref,                     # (2, GP)
    probs_ref,                  # out (S, TP)
    hn_ref,                     # out (2, GP)
    gi_sc,                      # scratch (S, 6*GP)   precomputed input projections
    out_sc,                     # scratch (S, 2*GP)   [out_f | out_b]
):
    S = tokens_ref.shape[0]
    V, H = emb_ref.shape
    G3 = 3 * GP

    # ---- embedding lookup via one-hot matmul (MXU, avoids dynamic gather) ----
    # TODO(synk): for realistic vocab sizes keep the table in HBM
    # (memory_space=pl.ANY) and DMA-gather the S needed rows instead.
    tok = tokens_ref[...]                                        # (S, 1) int32
    one_hot = (lax.broadcasted_iota(jnp.int32, (S, V), 1) == tok).astype(jnp.float32)
    x = jnp.dot(one_hot, emb_ref[...], preferred_element_type=jnp.float32)   # (S, H)

    # ---- input projections for all timesteps, both directions, one matmul ----
    gi_sc[...] = (jnp.dot(x, wih_ref[...], preferred_element_type=jnp.float32)
                  + bih_ref[...])                                # (S, 6*GP)

    whh_f = whh_f_ref[...]
    bhh_f = bhh_f_ref[...]
    whh_b = whh_b_ref[...]
    bhh_b = bhh_b_ref[...]

    def gru_gates(gi, gh, h_prev):
        # 128-lane-aligned gate blocks (PyTorch gate order r, z, n).
        r = jax.nn.sigmoid(gi[:, 0:GP] + gh[:, 0:GP])
        z = jax.nn.sigmoid(gi[:, GP:2 * GP] + gh[:, GP:2 * GP])
        n = jnp.tanh(gi[:, 2 * GP:G3] + r * gh[:, 2 * GP:G3])
        return (1.0 - z) * n + z * h_prev

    # ---- fused forward + backward recurrence (two independent chains) ----
    def body(t, carry):
        h_f, h_b = carry
        tb = S - 1 - t
        gi_f = gi_sc[pl.ds(t, 1), pl.ds(0, G3)]                  # (1, 3*GP)
        gi_b = gi_sc[pl.ds(tb, 1), pl.ds(G3, G3)]                # (1, 3*GP)
        gh_f = jnp.dot(h_f, whh_f, preferred_element_type=jnp.float32) + bhh_f
        gh_b = jnp.dot(h_b, whh_b, preferred_element_type=jnp.float32) + bhh_b
        h_f_new = gru_gates(gi_f, gh_f, h_f)
        h_b_new = gru_gates(gi_b, gh_b, h_b)
        out_sc[pl.ds(t, 1), pl.ds(0, GP)] = h_f_new
        out_sc[pl.ds(tb, 1), pl.ds(GP, GP)] = h_b_new
        return h_f_new, h_b_new

    h_f, h_b = lax.fori_loop(
        0, S, body,
        (h0_ref[pl.ds(0, 1), :], h0_ref[pl.ds(1, 1), :]),
        unroll=True)

    hn_ref[pl.ds(0, 1), :] = h_f
    hn_ref[pl.ds(1, 1), :] = h_b

    # ---- linear head (single fused matmul on [out_f | out_b]) + softmax ----
    logits = (jnp.dot(out_sc[...], wlin_ref[...], preferred_element_type=jnp.float32)
              + blin_ref[...])                                   # (S, TP)
    m = jnp.max(logits, axis=-1, keepdims=True)
    e = jnp.exp(logits - m)
    # exact reciprocal: keeps the 1e-5 tolerance vs. the reference.
    probs_ref[...] = e * pl.reciprocal(jnp.sum(e, axis=-1, keepdims=True), approx=False)


# ---------------------- one-time parameter re-layout ----------------------
def pack_params(params):
    """Hoist all transposes / padding / casts out of the forward path."""
    f32 = jnp.float32
    H = params["embedding"].shape[1]
    T = params["b_lin"].shape[0]
    assert H <= GP and T <= TP

    def pack_gate_cols(w_t):
        # (rows, 3H) with gate columns [r|z|n] -> (rows, 3*GP), each gate padded to GP lanes.
        return jnp.concatenate(
            [jnp.pad(w_t[:, g * H:(g + 1) * H], ((0, 0), (0, GP - H))) for g in range(3)],
            axis=1)

    def pack_ih(w):     # (3H, H) -> (H, 3*GP)
        return pack_gate_cols(jnp.asarray(w, f32).T)

    def pack_hh(w):     # (3H, H) -> (GP, 3*GP)  (rows zero-padded H -> GP)
        return jnp.pad(pack_gate_cols(jnp.asarray(w, f32).T), ((0, GP - H), (0, 0)))

    def pack_b(b):      # (3H,) -> (1, 3*GP)
        return pack_gate_cols(jnp.asarray(b, f32).reshape(1, 3 * H))

    w_lin = jnp.asarray(params["w_lin"], f32)
    wlin = jnp.zeros((2 * GP, TP), f32)
    wlin = wlin.at[0:H, 0:T].set(w_lin[:, :H].T)          # forward half
    wlin = wlin.at[GP:GP + H, 0:T].set(w_lin[:, H:].T)    # backward half
    blin = jnp.full((1, TP), NEG, f32).at[0, 0:T].set(jnp.asarray(params["b_lin"], f32))

    return {
        "emb": jnp.asarray(params["embedding"], f32),
        "wih": jnp.concatenate([pack_ih(params["w_ih_f"]), pack_ih(params["w_ih_b"])], axis=1),
        "bih": jnp.concatenate([pack_b(params["b_ih_f"]), pack_b(params["b_ih_b"])], axis=1),
        "whh_f": pack_hh(params["w_hh_f"]), "bhh_f": pack_b(params["b_hh_f"]),
        "whh_b": pack_hh(params["w_hh_b"]), "bhh_b": pack_b(params["b_hh_b"]),
        "wlin": wlin, "blin": blin,
    }


@functools.partial(jax.jit, static_argnames=("num_tags",))
def bigru_pos_tagger_forward(tokens, packed, hidden, *, num_tags):
    """tokens: (S,) int32, hidden: (2,1,H) f32 -> (probs (1,S,T), hidden (2,1,H))."""
    S = tokens.shape[0]
    H = packed["emb"].shape[1]
    f32 = jnp.float32

    h0 = jnp.pad(hidden.astype(f32).reshape(2, H), ((0, 0), (0, GP - H)))

    kernel_inputs = (
        tokens.astype(jnp.int32).reshape(S, 1),
        packed["emb"], packed["wih"], packed["bih"],
        packed["whh_f"], packed["bhh_f"],
        packed["whh_b"], packed["bhh_b"],
        packed["wlin"], packed["blin"],
        h0,
    )

    vmem = pl.BlockSpec(memory_space=pltpu.MemorySpace.VMEM)
    probs_p, hn_p = pl.pallas_call(
        _bigru_tagger_kernel,
        out_shape=(
            jax.ShapeDtypeStruct((S, TP), f32),
            jax.ShapeDtypeStruct((2, GP), f32),
        ),
        in_specs=[vmem] * len(kernel_inputs),
        out_specs=(vmem, vmem),
        scratch_shapes=[
            pltpu.VMEM((S, 6 * GP), f32),   # gi (both directions)
            pltpu.VMEM((S, 2 * GP), f32),   # [out_f | out_b]
        ],
    )(*kernel_inputs)

    return probs_p[None, :, :num_tags], hn_p[:, None, :H]


# ----------------------------- pure-JAX reference -----------------------------
def _reference_forward(tokens, params, hidden):
    H = params["embedding"].shape[1]
    x = params["embedding"][tokens]  # (S, H)

    def run_dir(xs, h0, wih, whh, bih, bhh):
        def step(h, x_t):
            gi = wih @ x_t + bih
            gh = whh @ h + bhh
            r = jax.nn.sigmoid(gi[:H] + gh[:H])
            z = jax.nn.sigmoid(gi[H:2 * H] + gh[H:2 * H])
            n = jnp.tanh(gi[2 * H:] + r * gh[2 * H:])
            h_new = (1.0 - z) * n + z * h
            return h_new, h_new
        h_fin, outs = lax.scan(step, h0, xs)
        return outs, h_fin

    out_f, h_f = run_dir(x, hidden[0, 0], params["w_ih_f"], params["w_hh_f"],
                         params["b_ih_f"], params["b_hh_f"])
    out_b_rev, h_b = run_dir(x[::-1], hidden[1, 0], params["w_ih_b"], params["w_hh_b"],
                             params["b_ih_b"], params["b_hh_b"])
    out_b = out_b_rev[::-1]
    cat = jnp.concatenate([out_f, out_b], axis=-1)
    logits = cat @ params["w_lin"].T + params["b_lin"]
    probs = jax.nn.softmax(logits, axis=-1)
    return probs[None], jnp.stack([h_f, h_b])[:, None, :]


def _init_params(key, vocab_size, hidden_size, tag_size):
    ks = jax.random.split(key, 12)
    H = hidden_size
    s = 1.0 / jnp.sqrt(H)
    u = lambda k, shape: jax.random.uniform(k, shape, jnp.float32, -s, s)
    return {
        "embedding": jax.random.normal(ks[0], (vocab_size, H), jnp.float32),
        "w_ih_f": u(ks[1], (3 * H, H)), "w_hh_f": u(ks[2], (3 * H, H)),
        "b_ih_f": u(ks[3], (3 * H,)), "b_hh_f": u(ks[4], (3 * H,)),
        "w_ih_b": u(ks[5], (3 * H, H)), "w_hh_b": u(ks[6], (3 * H, H)),
        "b_ih_b": u(ks[7], (3 * H,)), "b_hh_b": u(ks[8], (3 * H,)),
        "w_lin": u(ks[9], (tag_size, 2 * H)), "b_lin": u(ks[10], (tag_size,)),
    }


if __name__ == "__main__":
    VOCAB, HIDDEN, TAGS, SEQ = 16, 32, 8, 8
    key = jax.random.PRNGKey(0)
    kp, kt = jax.random.split(key)
    params = _init_params(kp, VOCAB, HIDDEN, TAGS)
    tokens = jax.random.randint(kt, (SEQ,), 0, VOCAB, dtype=jnp.int32)
    hidden0 = jnp.zeros((2, 1, HIDDEN), jnp.float32)  # == initHidden()

    packed = pack_params(params)  # one-time kernel-layout packing

    probs, h_n = bigru_pos_tagger_forward(tokens, packed, hidden0, num_tags=TAGS)
    jax.block_until_ready((probs, h_n))

    ref_probs, ref_hn = _reference_forward(tokens, params, hidden0)
    assert probs.shape == (1, SEQ, TAGS) and h_n.shape == (2, 1, HIDDEN)
    assert jnp.allclose(probs, ref_probs, atol=1e-5, rtol=1e-5)
    assert jnp.allclose(h_n, ref_hn, atol=1e-5, rtol=1e-5)
    print("KERNEL_OK")
</pallas_src>

<mosaic_0001>
module attributes {stable_mosaic.version = 11 : i64} {
  func.func @_bigru_tagger_kernel(%arg0: memref<8x1xi32, #tpu.memory_space<vmem>>, %arg1: memref<16x32xf32, #tpu.memory_space<vmem>>, %arg2: memref<32x768xf32, #tpu.memory_space<vmem>>, %arg3: memref<1x768xf32, #tpu.memory_space<vmem>>, %arg4: memref<128x384xf32, #tpu.memory_space<vmem>>, %arg5: memref<1x384xf32, #tpu.memory_space<vmem>>, %arg6: memref<128x384xf32, #tpu.memory_space<vmem>>, %arg7: memref<1x384xf32, #tpu.memory_space<vmem>>, %arg8: memref<256x128xf32, #tpu.memory_space<vmem>>, %arg9: memref<1x128xf32, #tpu.memory_space<vmem>>, %arg10: memref<2x128xf32, #tpu.memory_space<vmem>>, %arg11: memref<8x128xf32, #tpu.memory_space<vmem>>, %arg12: memref<2x128xf32, #tpu.memory_space<vmem>>, %arg13: memref<8x768xf32, #tpu.memory_space<vmem>>, %arg14: memref<8x256xf32, #tpu.memory_space<vmem>>) attributes {dimension_semantics = [], scalar_prefetch = 0 : i64, scratch_operands = 2 : i64, tpu.core_type = #tpu.core_type<tc>} {
    %c0 = arith.constant 0 : index
    %c0_0 = arith.constant 0 : index
    %0 = vector.load %arg0[%c0, %c0_0] : memref<8x1xi32, #tpu.memory_space<vmem>>, vector<8x1xi32>
    %1 = tpu.iota {dimensions = array<i32: 1>} : vector<8x16xi32>
    %2 = vector.broadcast %0 : vector<8x1xi32> to vector<8x16xi32>
    %3 = arith.cmpi eq, %1, %2 : vector<8x16xi32>
    %4 = arith.extui %3 : vector<8x16xi1> to vector<8x16xi32>
    %5 = arith.sitofp %4 : vector<8x16xi32> to vector<8x16xf32>
    %c0_1 = arith.constant 0 : index
    %c0_2 = arith.constant 0 : index
    %6 = vector.load %arg1[%c0_1, %c0_2] : memref<16x32xf32, #tpu.memory_space<vmem>>, vector<16x32xf32>
    %cst = arith.constant dense<0.000000e+00> : vector<8x32xf32>
    %7 = tpu.matmul %5, %6, %cst {dimension_numbers = #tpu.dot_dimension_numbers<[1], [0], [0], [1], [0, 0, 1, 1], [], []>} : vector<8x16xf32>, vector<16x32xf32>, vector<8x32xf32> -> vector<8x32xf32>
    %c0_3 = arith.constant 0 : index
    %c0_4 = arith.constant 0 : index
    %8 = vector.load %arg2[%c0_3, %c0_4] : memref<32x768xf32, #tpu.memory_space<vmem>>, vector<32x768xf32>
    %cst_5 = arith.constant dense<0.000000e+00> : vector<8x768xf32>
    %9 = tpu.matmul %7, %8, %cst_5 {dimension_numbers = #tpu.dot_dimension_numbers<[1], [0], [0], [1], [0, 0, 1, 1], [], []>} : vector<8x32xf32>, vector<32x768xf32>, vector<8x768xf32> -> vector<8x768xf32>
    %c0_6 = arith.constant 0 : index
    %c0_7 = arith.constant 0 : index
    %10 = vector.load %arg3[%c0_6, %c0_7] : memref<1x768xf32, #tpu.memory_space<vmem>>, vector<1x768xf32>
    %11 = vector.broadcast %10 : vector<1x768xf32> to vector<8x768xf32>
    %12 = arith.addf %9, %11 : vector<8x768xf32>
    %c0_8 = arith.constant 0 : index
    %c0_9 = arith.constant 0 : index
    %13 = vector.load %arg13[%c0_8, %c0_9] : memref<8x768xf32, #tpu.memory_space<vmem>>, vector<8x768xf32>
    tpu.vector_store %arg13[%c0_8, %c0_9], %12 {strides = array<i32>} : memref<8x768xf32, #tpu.memory_space<vmem>>, vector<8x768xf32>,
    %c0_10 = arith.constant 0 : index
    %c0_11 = arith.constant 0 : index
    %14 = vector.load %arg4[%c0_10, %c0_11] : memref<128x384xf32, #tpu.memory_space<vmem>>, vector<128x384xf32>
    %c0_12 = arith.constant 0 : index
    %c0_13 = arith.constant 0 : index
    %15 = vector.load %arg5[%c0_12, %c0_13] : memref<1x384xf32, #tpu.memory_space<vmem>>, vector<1x384xf32>
    %c0_14 = arith.constant 0 : index
    %c0_15 = arith.constant 0 : index
    %16 = vector.load %arg6[%c0_14, %c0_15] : memref<128x384xf32, #tpu.memory_space<vmem>>, vector<128x384xf32>
    %c0_16 = arith.constant 0 : index
    %c0_17 = arith.constant 0 : index
    %17 = vector.load %arg7[%c0_16, %c0_17] : memref<1x384xf32, #tpu.memory_space<vmem>>, vector<1x384xf32>
    %c0_18 = arith.constant 0 : index
    %c0_19 = arith.constant 0 : index
    %18 = vector.load %arg10[%c0_18, %c0_19] : memref<2x128xf32, #tpu.memory_space<vmem>>, vector<1x128xf32>
    %c1 = arith.constant 1 : index
    %c0_20 = arith.constant 0 : index
    %19 = vector.load %arg10[%c1, %c0_20] : memref<2x128xf32, #tpu.memory_space<vmem>>, vector<1x128xf32>
    %c0_i32 = arith.constant 0 : i32
    %c7_i32 = arith.constant 7 : i32
    %20 = arith.subi %c7_i32, %c0_i32 : i32
    %21 = arith.index_cast %c0_i32 : i32 to index
    %c0_21 = arith.constant 0 : index
    %22 = vector.load %arg13[%21, %c0_21] : memref<8x768xf32, #tpu.memory_space<vmem>>, vector<1x384xf32>
    %23 = arith.index_cast %20 : i32 to index
    %c384 = arith.constant 384 : index
    %24 = vector.load %arg13[%23, %c384] : memref<8x768xf32, #tpu.memory_space<vmem>>, vector<1x384xf32>
    %cst_22 = arith.constant dense<0.000000e+00> : vector<1x384xf32>
    %25 = tpu.matmul %18, %14, %cst_22 {dimension_numbers = #tpu.dot_dimension_numbers<[1], [0], [0], [1], [0, 0, 1, 1], [], []>} : vector<1x128xf32>, vector<128x384xf32>, vector<1x384xf32> -> vector<1x384xf32>
    %26 = arith.addf %25, %15 : vector<1x384xf32>
    %cst_23 = arith.constant dense<0.000000e+00> : vector<1x384xf32>
    %27 = tpu.matmul %19, %16, %cst_23 {dimension_numbers = #tpu.dot_dimension_numbers<[1], [0], [0], [1], [0, 0, 1, 1], [], []>} : vector<1x128xf32>, vector<128x384xf32>, vector<1x384xf32> -> vector<1x384xf32>
    %28 = arith.addf %27, %17 : vector<1x384xf32>
    %29 = vector.extract_strided_slice %22 {offsets = [0, 0], sizes = [1, 128], strides = [1, 1]} : vector<1x384xf32> to vector<1x128xf32>
    %30 = vector.extract_strided_slice %26 {offsets = [0, 0], sizes = [1, 128], strides = [1, 1]} : vector<1x384xf32> to vector<1x128xf32>
    %31 = arith.addf %29, %30 : vector<1x128xf32>
    %32 = arith.negf %31 : vector<1x128xf32>
    %33 = math.exp %32 : vector<1x128xf32>
    %cst_24 = arith.constant 1.000000e+00 : f32
    %34 = vector.broadcast %cst_24 : f32 to vector<1x128xf32>
    %35 = arith.addf %34, %33 : vector<1x128xf32>
    %36 = arith.divf %34, %35 : vector<1x128xf32>
    %37 = vector.extract_strided_slice %22 {offsets = [0, 128], sizes = [1, 128], strides = [1, 1]} : vector<1x384xf32> to vector<1x128xf32>
    %38 = vector.extract_strided_slice %26 {offsets = [0, 128], sizes = [1, 128], strides = [1, 1]} : vector<1x384xf32> to vector<1x128xf32>
    %39 = arith.addf %37, %38 : vector<1x128xf32>
    %40 = arith.negf %39 : vector<1x128xf32>
    %41 = math.exp %40 : vector<1x128xf32>
    %cst_25 = arith.constant 1.000000e+00 : f32
    %42 = vector.broadcast %cst_25 : f32 to vector<1x128xf32>
    %43 = arith.addf %42, %41 : vector<1x128xf32>
    %44 = arith.divf %42, %43 : vector<1x128xf32>
    %45 = vector.extract_strided_slice %22 {offsets = [0, 256], sizes = [1, 128], strides = [1, 1]} : vector<1x384xf32> to vector<1x128xf32>
    %46 = vector.extract_strided_slice %26 {offsets = [0, 256], sizes = [1, 128], strides = [1, 1]} : vector<1x384xf32> to vector<1x128xf32>
    %47 = arith.mulf %36, %46 : vector<1x128xf32>
    %48 = arith.addf %45, %47 : vector<1x128xf32>
    %49 = math.tanh %48 : vector<1x128xf32>
    %cst_26 = arith.constant 1.000000e+00 : f32
    %50 = vector.broadcast %cst_26 : f32 to vector<1x128xf32>
    %51 = arith.subf %50, %44 : vector<1x128xf32>
    %52 = arith.mulf %51, %49 : vector<1x128xf32>
    %53 = arith.mulf %44, %18 : vector<1x128xf32>
    %54 = arith.addf %52, %53 : vector<1x128xf32>
    %55 = vector.extract_strided_slice %24 {offsets = [0, 0], sizes = [1, 128], strides = [1, 1]} : vector<1x384xf32> to vector<1x128xf32>
    %56 = vector.extract_strided_slice %28 {offsets = [0, 0], sizes = [1, 128], strides = [1, 1]} : vector<1x384xf32> to vector<1x128xf32>
    %57 = arith.addf %55, %56 : vector<1x128xf32>
    %58 = arith.negf %57 : vector<1x128xf32>
    %59 = math.exp %58 : vector<1x128xf32>
    %cst_27 = arith.constant 1.000000e+00 : f32
    %60 = vector.broadcast %cst_27 : f32 to vector<1x128xf32>
    %61 = arith.addf %60, %59 : vector<1x128xf32>
    %62 = arith.divf %60, %61 : vector<1x128xf32>
    %63 = vector.extract_strided_slice %24 {offsets = [0, 128], sizes = [1, 128], strides = [1, 1]} : vector<1x384xf32> to vector<1x128xf32>
    %64 = vector.extract_strided_slice %28 {offsets = [0, 128], sizes = [1, 128], strides = [1, 1]} : vector<1x384xf32> to vector<1x128xf32>
    %65 = arith.addf %63, %64 : vector<1x128xf32>
    %66 = arith.negf %65 : vector<1x128xf32>
    %67 = math.exp %66 : vector<1x128xf32>
    %cst_28 = arith.constant 1.000000e+00 : f32
    %68 = vector.broadcast %cst_28 : f32 to vector<1x128xf32>
    %69 = arith.addf %68, %67 : vector<1x128xf32>
    %70 = arith.divf %68, %69 : vector<1x128xf32>
    %71 = vector.extract_strided_slice %24 {offsets = [0, 256], sizes = [1, 128], strides = [1, 1]} : vector<1x384xf32> to vector<1x128xf32>
    %72 = vector.extract_strided_slice %28 {offsets = [0, 256], sizes = [1, 128], strides = [1, 1]} : vector<1x384xf32> to vector<1x128xf32>
    %73 = arith.mulf %62, %72 : vector<1x128xf32>
    %74 = arith.addf %71, %73 : vector<1x128xf32>
    %75 = math.tanh %74 : vector<1x128xf32>
    %cst_29 = arith.constant 1.000000e+00 : f32
    %76 = vector.broadcast %cst_29 : f32 to vector<1x128xf32>
    %77 = arith.subf %76, %70 : vector<1x128xf32>
    %78 = arith.mulf %77, %75 : vector<1x128xf32>
    %79 = arith.mulf %70, %19 : vector<1x128xf32>
    %80 = arith.addf %78, %79 : vector<1x128xf32>
    %81 = arith.index_cast %c0_i32 : i32 to index
    %c0_30 = arith.constant 0 : index
    %82 = vector.load %arg14[%81, %c0_30] : memref<8x256xf32, #tpu.memory_space<vmem>>, vector<1x128xf32>
    tpu.vector_store %arg14[%81, %c0_30], %54 {strides = array<i32>} : memref<8x256xf32, #tpu.memory_space<vmem>>, vector<1x128xf32>,
    %83 = arith.index_cast %20 : i32 to index
    %c128 = arith.constant 128 : index
    %84 = vector.load %arg14[%83, %c128] : memref<8x256xf32, #tpu.memory_space<vmem>>, vector<1x128xf32>
    tpu.vector_store %arg14[%83, %c128], %80 {strides = array<i32>} : memref<8x256xf32, #tpu.memory_space<vmem>>, vector<1x128xf32>,
    %c1_i32 = arith.constant 1 : i32
    %c7_i32_31 = arith.constant 7 : i32
    %85 = arith.subi %c7_i32_31, %c1_i32 : i32
    %86 = arith.index_cast %c1_i32 : i32 to index
    %c0_32 = arith.constant 0 : index
    %87 = vector.load %arg13[%86, %c0_32] : memref<8x768xf32, #tpu.memory_space<vmem>>, vector<1x384xf32>
    %88 = arith.index_cast %85 : i32 to index
    %c384_33 = arith.constant 384 : index
    %89 = vector.load %arg13[%88, %c384_33] : memref<8x768xf32, #tpu.memory_space<vmem>>, vector<1x384xf32>
    %cst_34 = arith.constant dense<0.000000e+00> : vector<1x384xf32>
    %90 = tpu.matmul %54, %14, %cst_34 {dimension_numbers = #tpu.dot_dimension_numbers<[1], [0], [0], [1], [0, 0, 1, 1], [], []>} : vector<1x128xf32>, vector<128x384xf32>, vector<1x384xf32> -> vector<1x384xf32>
    %91 = arith.addf %90, %15 : vector<1x384xf32>
    %cst_35 = arith.constant dense<0.000000e+00> : vector<1x384xf32>
    %92 = tpu.matmul %80, %16, %cst_35 {dimension_numbers = #tpu.dot_dimension_numbers<[1], [0], [0], [1], [0, 0, 1, 1], [], []>} : vector<1x128xf32>, vector<128x384xf32>, vector<1x384xf32> -> vector<1x384xf32>
    %93 = arith.addf %92, %17 : vector<1x384xf32>
    %94 = vector.extract_strided_slice %87 {offsets = [0, 0], sizes = [1, 128], strides = [1, 1]} : vector<1x384xf32> to vector<1x128xf32>
    %95 = vector.extract_strided_slice %91 {offsets = [0, 0], sizes = [1, 128], strides = [1, 1]} : vector<1x384xf32> to vector<1x128xf32>
    %96 = arith.addf %94, %95 : vector<1x128xf32>
    %97 = arith.negf %96 : vector<1x128xf32>
    %98 = math.exp %97 : vector<1x128xf32>
    %cst_36 = arith.constant 1.000000e+00 : f32
    %99 = vector.broadcast %cst_36 : f32 to vector<1x128xf32>
    %100 = arith.addf %99, %98 : vector<1x128xf32>
    %101 = arith.divf %99, %100 : vector<1x128xf32>
    %102 = vector.extract_strided_slice %87 {offsets = [0, 128], sizes = [1, 128], strides = [1, 1]} : vector<1x384xf32> to vector<1x128xf32>
    %103 = vector.extract_strided_slice %91 {offsets = [0, 128], sizes = [1, 128], strides = [1, 1]} : vector<1x384xf32> to vector<1x128xf32>
    %104 = arith.addf %102, %103 : vector<1x128xf32>
    %105 = arith.negf %104 : vector<1x128xf32>
    %106 = math.exp %105 : vector<1x128xf32>
    %cst_37 = arith.constant 1.000000e+00 : f32
    %107 = vector.broadcast %cst_37 : f32 to vector<1x128xf32>
    %108 = arith.addf %107, %106 : vector<1x128xf32>
    %109 = arith.divf %107, %108 : vector<1x128xf32>
    %110 = vector.extract_strided_slice %87 {offsets = [0, 256], sizes = [1, 128], strides = [1, 1]} : vector<1x384xf32> to vector<1x128xf32>
    %111 = vector.extract_strided_slice %91 {offsets = [0, 256], sizes = [1, 128], strides = [1, 1]} : vector<1x384xf32> to vector<1x128xf32>
    %112 = arith.mulf %101, %111 : vector<1x128xf32>
    %113 = arith.addf %110, %112 : vector<1x128xf32>
    %114 = math.tanh %113 : vector<1x128xf32>
    %cst_38 = arith.constant 1.000000e+00 : f32
    %115 = vector.broadcast %cst_38 : f32 to vector<1x128xf32>
    %116 = arith.subf %115, %109 : vector<1x128xf32>
    %117 = arith.mulf %116, %114 : vector<1x128xf32>
    %118 = arith.mulf %109, %54 : vector<1x128xf32>
    %119 = arith.addf %117, %118 : vector<1x128xf32>
    %120 = vector.extract_strided_slice %89 {offsets = [0, 0], sizes = [1, 128], strides = [1, 1]} : vector<1x384xf32> to vector<1x128xf32>
    %121 = vector.extract_strided_slice %93 {offsets = [0, 0], sizes = [1, 128], strides = [1, 1]} : vector<1x384xf32> to vector<1x128xf32>
    %122 = arith.addf %120, %121 : vector<1x128xf32>
    %123 = arith.negf %122 : vector<1x128xf32>
    %124 = math.exp %123 : vector<1x128xf32>
    %cst_39 = arith.constant 1.000000e+00 : f32
    %125 = vector.broadcast %cst_39 : f32 to vector<1x128xf32>
    %126 = arith.addf %125, %124 : vector<1x128xf32>
    %127 = arith.divf %125, %126 : vector<1x128xf32>
    %128 = vector.extract_strided_slice %89 {offsets = [0, 128], sizes = [1, 128], strides = [1, 1]} : vector<1x384xf32> to vector<1x128xf32>
    %129 = vector.extract_strided_slice %93 {offsets = [0, 128], sizes = [1, 128], strides = [1, 1]} : vector<1x384xf32> to vector<1x128xf32>
    %130 = arith.addf %128, %129 : vector<1x128xf32>
    %131 = arith.negf %130 : vector<1x128xf32>
    %132 = math.exp %131 : vector<1x128xf32>
    %cst_40 = arith.constant 1.000000e+00 : f32
    %133 = vector.broadcast %cst_40 : f32 to vector<1x128xf32>
    %134 = arith.addf %133, %132 : vector<1x128xf32>
    %135 = arith.divf %133, %134 : vector<1x128xf32>
    %136 = vector.extract_strided_slice %89 {offsets = [0, 256], sizes = [1, 128], strides = [1, 1]} : vector<1x384xf32> to vector<1x128xf32>
    %137 = vector.extract_strided_slice %93 {offsets = [0, 256], sizes = [1, 128], strides = [1, 1]} : vector<1x384xf32> to vector<1x128xf32>
    %138 = arith.mulf %127, %137 : vector<1x128xf32>
    %139 = arith.addf %136, %138 : vector<1x128xf32>
    %140 = math.tanh %139 : vector<1x128xf32>
    %cst_41 = arith.constant 1.000000e+00 : f32
    %141 = vector.broadcast %cst_41 : f32 to vector<1x128xf32>
    %142 = arith.subf %141, %135 : vector<1x128xf32>
    %143 = arith.mulf %142, %140 : vector<1x128xf32>
    %144 = arith.mulf %135, %80 : vector<1x128xf32>
    %145 = arith.addf %143, %144 : vector<1x128xf32>
    %146 = arith.index_cast %c1_i32 : i32 to index
    %c0_42 = arith.constant 0 : index
    %147 = vector.load %arg14[%146, %c0_42] : memref<8x256xf32, #tpu.memory_space<vmem>>, vector<1x128xf32>
    tpu.vector_store %arg14[%146, %c0_42], %119 {strides = array<i32>} : memref<8x256xf32, #tpu.memory_space<vmem>>, vector<1x128xf32>,
    %148 = arith.index_cast %85 : i32 to index
    %c128_43 = arith.constant 128 : index
    %149 = vector.load %arg14[%148, %c128_43] : memref<8x256xf32, #tpu.memory_space<vmem>>, vector<1x128xf32>
    tpu.vector_store %arg14[%148, %c128_43], %145 {strides = array<i32>} : memref<8x256xf32, #tpu.memory_space<vmem>>, vector<1x128xf32>,
    %c2_i32 = arith.constant 2 : i32
    %c7_i32_44 = arith.constant 7 : i32
    %150 = arith.subi %c7_i32_44, %c2_i32 : i32
    %151 = arith.index_cast %c2_i32 : i32 to index
    %c0_45 = arith.constant 0 : index
    %152 = vector.load %arg13[%151, %c0_45] : memref<8x768xf32, #tpu.memory_space<vmem>>, vector<1x384xf32>
    %153 = arith.index_cast %150 : i32 to index
    %c384_46 = arith.constant 384 : index
    %154 = vector.load %arg13[%153, %c384_46] : memref<8x768xf32, #tpu.memory_space<vmem>>, vector<1x384xf32>
    %cst_47 = arith.constant dense<0.000000e+00> : vector<1x384xf32>
    %155 = tpu.matmul %119, %14, %cst_47 {dimension_numbers = #tpu.dot_dimension_numbers<[1], [0], [0], [1], [0, 0, 1, 1], [], []>} : vector<1x128xf32>, vector<128x384xf32>, vector<1x384xf32> -> vector<1x384xf32>
    %156 = arith.addf %155, %15 : vector<1x384xf32>
    %cst_48 = arith.constant dense<0.000000e+00> : vector<1x384xf32>
    %157 = tpu.matmul %145, %16, %cst_48 {dimension_numbers = #tpu.dot_dimension_numbers<[1], [0], [0], [1], [0, 0, 1, 1], [], []>} : vector<1x128xf32>, vector<128x384xf32>, vector<1x384xf32> -> vector<1x384xf32>
    %158 = arith.addf %157, %17 : vector<1x384xf32>
    %159 = vector.extract_strided_slice %152 {offsets = [0, 0], sizes = [1, 128], strides = [1, 1]} : vector<1x384xf32> to vector<1x128xf32>
    %160 = vector.extract_strided_slice %156 {offsets = [0, 0], sizes = [1, 128], strides = [1, 1]} : vector<1x384xf32> to vector<1x128xf32>
    %161 = arith.addf %159, %160 : vector<1x128xf32>
    %162 = arith.negf %161 : vector<1x128xf32>
    %163 = math.exp %162 : vector<1x128xf32>
    %cst_49 = arith.constant 1.000000e+00 : f32
    %164 = vector.broadcast %cst_49 : f32 to vector<1x128xf32>
    %165 = arith.addf %164, %163 : vector<1x128xf32>
    %166 = arith.divf %164, %165 : vector<1x128xf32>
    %167 = vector.extract_strided_slice %152 {offsets = [0, 128], sizes = [1, 128], strides = [1, 1]} : vector<1x384xf32> to vector<1x128xf32>
    %168 = vector.extract_strided_slice %156 {offsets = [0, 128], sizes = [1, 128], strides = [1, 1]} : vector<1x384xf32> to vector<1x128xf32>
    %169 = arith.addf %167, %168 : vector<1x128xf32>
    %170 = arith.negf %169 : vector<1x128xf32>
    %171 = math.exp %170 : vector<1x128xf32>
    %cst_50 = arith.constant 1.000000e+00 : f32
    %172 = vector.broadcast %cst_50 : f32 to vector<1x128xf32>
    %173 = arith.addf %172, %171 : vector<1x128xf32>
    %174 = arith.divf %172, %173 : vector<1x128xf32>
    %175 = vector.extract_strided_slice %152 {offsets = [0, 256], sizes = [1, 128], strides = [1, 1]} : vector<1x384xf32> to vector<1x128xf32>
    %176 = vector.extract_strided_slice %156 {offsets = [0, 256], sizes = [1, 128], strides = [1, 1]} : vector<1x384xf32> to vector<1x128xf32>
    %177 = arith.mulf %166, %176 : vector<1x128xf32>
    %178 = arith.addf %175, %177 : vector<1x128xf32>
    %179 = math.tanh %178 : vector<1x128xf32>
    %cst_51 = arith.constant 1.000000e+00 : f32
    %180 = vector.broadcast %cst_51 : f32 to vector<1x128xf32>
    %181 = arith.subf %180, %174 : vector<1x128xf32>
    %182 = arith.mulf %181, %179 : vector<1x128xf32>
    %183 = arith.mulf %174, %119 : vector<1x128xf32>
    %184 = arith.addf %182, %183 : vector<1x128xf32>
    %185 = vector.extract_strided_slice %154 {offsets = [0, 0], sizes = [1, 128], strides = [1, 1]} : vector<1x384xf32> to vector<1x128xf32>
    %186 = vector.extract_strided_slice %158 {offsets = [0, 0], sizes = [1, 128], strides = [1, 1]} : vector<1x384xf32> to vector<1x128xf32>
    %187 = arith.addf %185, %186 : vector<1x128xf32>
    %188 = arith.negf %187 : vector<1x128xf32>
    %189 = math.exp %188 : vector<1x128xf32>
    %cst_52 = arith.constant 1.000000e+00 : f32
    %190 = vector.broadcast %cst_52 : f32 to vector<1x128xf32>
    %191 = arith.addf %190, %189 : vector<1x128xf32>
    %192 = arith.divf %190, %191 : vector<1x128xf32>
    %193 = vector.extract_strided_slice %154 {offsets = [0, 128], sizes = [1, 128], strides = [1, 1]} : vector<1x384xf32> to vector<1x128xf32>
    %194 = vector.extract_strided_slice %158 {offsets = [0, 128], sizes = [1, 128], strides = [1, 1]} : vector<1x384xf32> to vector<1x128xf32>
    %195 = arith.addf %193, %194 : vector<1x128xf32>
    %196 = arith.negf %195 : vector<1x128xf32>
    %197 = math.exp %196 : vector<1x128xf32>
    %cst_53 = arith.constant 1.000000e+00 : f32
    %198 = vector.broadcast %cst_53 : f32 to vector<1x128xf32>
    %199 = arith.addf %198, %197 : vector<1x128xf32>
    %200 = arith.divf %198, %199 : vector<1x128xf32>
    %201 = vector.extract_strided_slice %154 {offsets = [0, 256], sizes = [1, 128], strides = [1, 1]} : vector<1x384xf32> to vector<1x128xf32>
    %202 = vector.extract_strided_slice %158 {offsets = [0, 256], sizes = [1, 128], strides = [1, 1]} : vector<1x384xf32> to vector<1x128xf32>
    %203 = arith.mulf %192, %202 : vector<1x128xf32>
    %204 = arith.addf %201, %203 : vector<1x128xf32>
    %205 = math.tanh %204 : vector<1x128xf32>
    %cst_54 = arith.constant 1.000000e+00 : f32
    %206 = vector.broadcast %cst_54 : f32 to vector<1x128xf32>
    %207 = arith.subf %206, %200 : vector<1x128xf32>
    %208 = arith.mulf %207, %205 : vector<1x128xf32>
    %209 = arith.mulf %200, %145 : vector<1x128xf32>
    %210 = arith.addf %208, %209 : vector<1x128xf32>
    %211 = arith.index_cast %c2_i32 : i32 to index
    %c0_55 = arith.constant 0 : index
    %212 = vector.load %arg14[%211, %c0_55] : memref<8x256xf32, #tpu.memory_space<vmem>>, vector<1x128xf32>
    tpu.vector_store %arg14[%211, %c0_55], %184 {strides = array<i32>} : memref<8x256xf32, #tpu.memory_space<vmem>>, vector<1x128xf32>,
    %213 = arith.index_cast %150 : i32 to index
    %c128_56 = arith.constant 128 : index
    %214 = vector.load %arg14[%213, %c128_56] : memref<8x256xf32, #tpu.memory_space<vmem>>, vector<1x128xf32>
    tpu.vector_store %arg14[%213, %c128_56], %210 {strides = array<i32>} : memref<8x256xf32, #tpu.memory_space<vmem>>, vector<1x128xf32>,
    %c3_i32 = arith.constant 3 : i32
    %c7_i32_57 = arith.constant 7 : i32
    %215 = arith.subi %c7_i32_57, %c3_i32 : i32
    %216 = arith.index_cast %c3_i32 : i32 to index
    %c0_58 = arith.constant 0 : index
    %217 = vector.load %arg13[%216, %c0_58] : memref<8x768xf32, #tpu.memory_space<vmem>>, vector<1x384xf32>
    %218 = arith.index_cast %215 : i32 to index
    %c384_59 = arith.constant 384 : index
    %219 = vector.load %arg13[%218, %c384_59] : memref<8x768xf32, #tpu.memory_space<vmem>>, vector<1x384xf32>
    %cst_60 = arith.constant dense<0.000000e+00> : vector<1x384xf32>
    %220 = tpu.matmul %184, %14, %cst_60 {dimension_numbers = #tpu.dot_dimension_numbers<[1], [0], [0], [1], [0, 0, 1, 1], [], []>} : vector<1x128xf32>, vector<128x384xf32>, vector<1x384xf32> -> vector<1x384xf32>
    %221 = arith.addf %220, %15 : vector<1x384xf32>
    %cst_61 = arith.constant dense<0.000000e+00> : vector<1x384xf32>
    %222 = tpu.matmul %210, %16, %cst_61 {dimension_numbers = #tpu.dot_dimension_numbers<[1], [0], [0], [1], [0, 0, 1, 1], [], []>} : vector<1x128xf32>, vector<128x384xf32>, vector<1x384xf32> -> vector<1x384xf32>
    %223 = arith.addf %222, %17 : vector<1x384xf32>
    %224 = vector.extract_strided_slice %217 {offsets = [0, 0], sizes = [1, 128], strides = [1, 1]} : vector<1x384xf32> to vector<1x128xf32>
    %225 = vector.extract_strided_slice %221 {offsets = [0, 0], sizes = [1, 128], strides = [1, 1]} : vector<1x384xf32> to vector<1x128xf32>
    %226 = arith.addf %224, %225 : vector<1x128xf32>
    %227 = arith.negf %226 : vector<1x128xf32>
    %228 = math.exp %227 : vector<1x128xf32>
    %cst_62 = arith.constant 1.000000e+00 : f32
    %229 = vector.broadcast %cst_62 : f32 to vector<1x128xf32>
    %230 = arith.addf %229, %228 : vector<1x128xf32>
    %231 = arith.divf %229, %230 : vector<1x128xf32>
    %232 = vector.extract_strided_slice %217 {offsets = [0, 128], sizes = [1, 128], strides = [1, 1]} : vector<1x384xf32> to vector<1x128xf32>
    %233 = vector.extract_strided_slice %221 {offsets = [0, 128], sizes = [1, 128], strides = [1, 1]} : vector<1x384xf32> to vector<1x128xf32>
    %234 = arith.addf %232, %233 : vector<1x128xf32>
    %235 = arith.negf %234 : vector<1x128xf32>
    %236 = math.exp %235 : vector<1x128xf32>
    %cst_63 = arith.constant 1.000000e+00 : f32
    %237 = vector.broadcast %cst_63 : f32 to vector<1x128xf32>
    %238 = arith.addf %237, %236 : vector<1x128xf32>
    %239 = arith.divf %237, %238 : vector<1x128xf32>
    %240 = vector.extract_strided_slice %217 {offsets = [0, 256], sizes = [1, 128], strides = [1, 1]} : vector<1x384xf32> to vector<1x128xf32>
    %241 = vector.extract_strided_slice %221 {offsets = [0, 256], sizes = [1, 128], strides = [1, 1]} : vector<1x384xf32> to vector<1x128xf32>
    %242 = arith.mulf %231, %241 : vector<1x128xf32>
    %243 = arith.addf %240, %242 : vector<1x128xf32>
    %244 = math.tanh %243 : vector<1x128xf32>
    %cst_64 = arith.constant 1.000000e+00 : f32
    %245 = vector.broadcast %cst_64 : f32 to vector<1x128xf32>
    %246 = arith.subf %245, %239 : vector<1x128xf32>
    %247 = arith.mulf %246, %244 : vector<1x128xf32>
    %248 = arith.mulf %239, %184 : vector<1x128xf32>
    %249 = arith.addf %247, %248 : vector<1x128xf32>
    %250 = vector.extract_strided_slice %219 {offsets = [0, 0], sizes = [1, 128], strides = [1, 1]} : vector<1x384xf32> to vector<1x128xf32>
    %251 = vector.extract_strided_slice %223 {offsets = [0, 0], sizes = [1, 128], strides = [1, 1]} : vector<1x384xf32> to vector<1x128xf32>
    %252 = arith.addf %250, %251 : vector<1x128xf32>
    %253 = arith.negf %252 : vector<1x128xf32>
    %254 = math.exp %253 : vector<1x128xf32>
    %cst_65 = arith.constant 1.000000e+00 : f32
    %255 = vector.broadcast %cst_65 : f32 to vector<1x128xf32>
    %256 = arith.addf %255, %254 : vector<1x128xf32>
    %257 = arith.divf %255, %256 : vector<1x128xf32>
    %258 = vector.extract_strided_slice %219 {offsets = [0, 128], sizes = [1, 128], strides = [1, 1]} : vector<1x384xf32> to vector<1x128xf32>
    %259 = vector.extract_strided_slice %223 {offsets = [0, 128], sizes = [1, 128], strides = [1, 1]} : vector<1x384xf32> to vector<1x128xf32>
    %260 = arith.addf %258, %259 : vector<1x128xf32>
    %261 = arith.negf %260 : vector<1x128xf32>
    %262 = math.exp %261 : vector<1x128xf32>
    %cst_66 = arith.constant 1.000000e+00 : f32
    %263 = vector.broadcast %cst_66 : f32 to vector<1x128xf32>
    %264 = arith.addf %263, %262 : vector<1x128xf32>
    %265 = arith.divf %263, %264 : vector<1x128xf32>
    %266 = vector.extract_strided_slice %219 {offsets = [0, 256], sizes = [1, 128], strides = [1, 1]} : vector<1x384xf32> to vector<1x128xf32>
    %267 = vector.extract_strided_slice %223 {offsets = [0, 256], sizes = [1, 128], strides = [1, 1]} : vector<1x384xf32> to vector<1x128xf32>
    %268 = arith.mulf %257, %267 : vector<1x128xf32>
    %269 = arith.addf %266, %268 : vector<1x128xf32>
    %270 = math.tanh %269 : vector<1x128xf32>
    %cst_67 = arith.constant 1.000000e+00 : f32
    %271 = vector.broadcast %cst_67 : f32 to vector<1x128xf32>
    %272 = arith.subf %271, %265 : vector<1x128xf32>
    %273 = arith.mulf %272, %270 : vector<1x128xf32>
    %274 = arith.mulf %265, %210 : vector<1x128xf32>
    %275 = arith.addf %273, %274 : vector<1x128xf32>
    %276 = arith.index_cast %c3_i32 : i32 to index
    %c0_68 = arith.constant 0 : index
    %277 = vector.load %arg14[%276, %c0_68] : memref<8x256xf32, #tpu.memory_space<vmem>>, vector<1x128xf32>
    tpu.vector_store %arg14[%276, %c0_68], %249 {strides = array<i32>} : memref<8x256xf32, #tpu.memory_space<vmem>>, vector<1x128xf32>,
    %278 = arith.index_cast %215 : i32 to index
    %c128_69 = arith.constant 128 : index
    %279 = vector.load %arg14[%278, %c128_69] : memref<8x256xf32, #tpu.memory_space<vmem>>, vector<1x128xf32>
    tpu.vector_store %arg14[%278, %c128_69], %275 {strides = array<i32>} : memref<8x256xf32, #tpu.memory_space<vmem>>, vector<1x128xf32>,
    %c4_i32 = arith.constant 4 : i32
    %c7_i32_70 = arith.constant 7 : i32
    %280 = arith.subi %c7_i32_70, %c4_i32 : i32
    %281 = arith.index_cast %c4_i32 : i32 to index
    %c0_71 = arith.constant 0 : index
    %282 = vector.load %arg13[%281, %c0_71] : memref<8x768xf32, #tpu.memory_space<vmem>>, vector<1x384xf32>
    %283 = arith.index_cast %280 : i32 to index
    %c384_72 = arith.constant 384 : index
    %284 = vector.load %arg13[%283, %c384_72] : memref<8x768xf32, #tpu.memory_space<vmem>>, vector<1x384xf32>
    %cst_73 = arith.constant dense<0.000000e+00> : vector<1x384xf32>
    %285 = tpu.matmul %249, %14, %cst_73 {dimension_numbers = #tpu.dot_dimension_numbers<[1], [0], [0], [1], [0, 0, 1, 1], [], []>} : vector<1x128xf32>, vector<128x384xf32>, vector<1x384xf32> -> vector<1x384xf32>
    %286 = arith.addf %285, %15 : vector<1x384xf32>
    %cst_74 = arith.constant dense<0.000000e+00> : vector<1x384xf32>
    %287 = tpu.matmul %275, %16, %cst_74 {dimension_numbers = #tpu.dot_dimension_numbers<[1], [0], [0], [1], [0, 0, 1, 1], [], []>} : vector<1x128xf32>, vector<128x384xf32>, vector<1x384xf32> -> vector<1x384xf32>
    %288 = arith.addf %287, %17 : vector<1x384xf32>
    %289 = vector.extract_strided_slice %282 {offsets = [0, 0], sizes = [1, 128], strides = [1, 1]} : vector<1x384xf32> to vector<1x128xf32>
    %290 = vector.extract_strided_slice %286 {offsets = [0, 0], sizes = [1, 128], strides = [1, 1]} : vector<1x384xf32> to vector<1x128xf32>
    %291 = arith.addf %289, %290 : vector<1x128xf32>
    %292 = arith.negf %291 : vector<1x128xf32>
    %293 = math.exp %292 : vector<1x128xf32>
    %cst_75 = arith.constant 1.000000e+00 : f32
    %294 = vector.broadcast %cst_75 : f32 to vector<1x128xf32>
    %295 = arith.addf %294, %293 : vector<1x128xf32>
    %296 = arith.divf %294, %295 : vector<1x128xf32>
    %297 = vector.extract_strided_slice %282 {offsets = [0, 128], sizes = [1, 128], strides = [1, 1]} : vector<1x384xf32> to vector<1x128xf32>
    %298 = vector.extract_strided_slice %286 {offsets = [0, 128], sizes = [1, 128], strides = [1, 1]} : vector<1x384xf32> to vector<1x128xf32>
    %299 = arith.addf %297, %298 : vector<1x128xf32>
    %300 = arith.negf %299 : vector<1x128xf32>
    %301 = math.exp %300 : vector<1x128xf32>
    %cst_76 = arith.constant 1.000000e+00 : f32
    %302 = vector.broadcast %cst_76 : f32 to vector<1x128xf32>
    %303 = arith.addf %302, %301 : vector<1x128xf32>
    %304 = arith.divf %302, %303 : vector<1x128xf32>
    %305 = vector.extract_strided_slice %282 {offsets = [0, 256], sizes = [1, 128], strides = [1, 1]} : vector<1x384xf32> to vector<1x128xf32>
    %306 = vector.extract_strided_slice %286 {offsets = [0, 256], sizes = [1, 128], strides = [1, 1]} : vector<1x384xf32> to vector<1x128xf32>
    %307 = arith.mulf %296, %306 : vector<1x128xf32>
    %308 = arith.addf %305, %307 : vector<1x128xf32>
    %309 = math.tanh %308 : vector<1x128xf32>
    %cst_77 = arith.constant 1.000000e+00 : f32
    %310 = vector.broadcast %cst_77 : f32 to vector<1x128xf32>
    %311 = arith.subf %310, %304 : vector<1x128xf32>
    %312 = arith.mulf %311, %309 : vector<1x128xf32>
    %313 = arith.mulf %304, %249 : vector<1x128xf32>
    %314 = arith.addf %312, %313 : vector<1x128xf32>
    %315 = vector.extract_strided_slice %284 {offsets = [0, 0], sizes = [1, 128], strides = [1, 1]} : vector<1x384xf32> to vector<1x128xf32>
    %316 = vector.extract_strided_slice %288 {offsets = [0, 0], sizes = [1, 128], strides = [1, 1]} : vector<1x384xf32> to vector<1x128xf32>
    %317 = arith.addf %315, %316 : vector<1x128xf32>
    %318 = arith.negf %317 : vector<1x128xf32>
    %319 = math.exp %318 : vector<1x128xf32>
    %cst_78 = arith.constant 1.000000e+00 : f32
    %320 = vector.broadcast %cst_78 : f32 to vector<1x128xf32>
    %321 = arith.addf %320, %319 : vector<1x128xf32>
    %322 = arith.divf %320, %321 : vector<1x128xf32>
    %323 = vector.extract_strided_slice %284 {offsets = [0, 128], sizes = [1, 128], strides = [1, 1]} : vector<1x384xf32> to vector<1x128xf32>
    %324 = vector.extract_strided_slice %288 {offsets = [0, 128], sizes = [1, 128], strides = [1, 1]} : vector<1x384xf32> to vector<1x128xf32>
    %325 = arith.addf %323, %324 : vector<1x128xf32>
    %326 = arith.negf %325 : vector<1x128xf32>
    %327 = math.exp %326 : vector<1x128xf32>
    %cst_79 = arith.constant 1.000000e+00 : f32
    %328 = vector.broadcast %cst_79 : f32 to vector<1x128xf32>
    %329 = arith.addf %328, %327 : vector<1x128xf32>
    %330 = arith.divf %328, %329 : vector<1x128xf32>
    %331 = vector.extract_strided_slice %284 {offsets = [0, 256], sizes = [1, 128], strides = [1, 1]} : vector<1x384xf32> to vector<1x128xf32>
    %332 = vector.extract_strided_slice %288 {offsets = [0, 256], sizes = [1, 128], strides = [1, 1]} : vector<1x384xf32> to vector<1x128xf32>
    %333 = arith.mulf %322, %332 : vector<1x128xf32>
    %334 = arith.addf %331, %333 : vector<1x128xf32>
    %335 = math.tanh %334 : vector<1x128xf32>
    %cst_80 = arith.constant 1.000000e+00 : f32
    %336 = vector.broadcast %cst_80 : f32 to vector<1x128xf32>
    %337 = arith.subf %336, %330 : vector<1x128xf32>
    %338 = arith.mulf %337, %335 : vector<1x128xf32>
    %339 = arith.mulf %330, %275 : vector<1x128xf32>
    %340 = arith.addf %338, %339 : vector<1x128xf32>
    %341 = arith.index_cast %c4_i32 : i32 to index
    %c0_81 = arith.constant 0 : index
    %342 = vector.load %arg14[%341, %c0_81] : memref<8x256xf32, #tpu.memory_space<vmem>>, vector<1x128xf32>
    tpu.vector_store %arg14[%341, %c0_81], %314 {strides = array<i32>} : memref<8x256xf32, #tpu.memory_space<vmem>>, vector<1x128xf32>,
    %343 = arith.index_cast %280 : i32 to index
    %c128_82 = arith.constant 128 : index
    %344 = vector.load %arg14[%343, %c128_82] : memref<8x256xf32, #tpu.memory_space<vmem>>, vector<1x128xf32>
    tpu.vector_store %arg14[%343, %c128_82], %340 {strides = array<i32>} : memref<8x256xf32, #tpu.memory_space<vmem>>, vector<1x128xf32>,
    %c5_i32 = arith.constant 5 : i32
    %c7_i32_83 = arith.constant 7 : i32
    %345 = arith.subi %c7_i32_83, %c5_i32 : i32
    %346 = arith.index_cast %c5_i32 : i32 to index
    %c0_84 = arith.constant 0 : index
    %347 = vector.load %arg13[%346, %c0_84] : memref<8x768xf32, #tpu.memory_space<vmem>>, vector<1x384xf32>
    %348 = arith.index_cast %345 : i32 to index
    %c384_85 = arith.constant 384 : index
    %349 = vector.load %arg13[%348, %c384_85] : memref<8x768xf32, #tpu.memory_space<vmem>>, vector<1x384xf32>
    %cst_86 = arith.constant dense<0.000000e+00> : vector<1x384xf32>
    %350 = tpu.matmul %314, %14, %cst_86 {dimension_numbers = #tpu.dot_dimension_numbers<[1], [0], [0], [1], [0, 0, 1, 1], [], []>} : vector<1x128xf32>, vector<128x384xf32>, vector<1x384xf32> -> vector<1x384xf32>
    %351 = arith.addf %350, %15 : vector<1x384xf32>
    %cst_87 = arith.constant dense<0.000000e+00> : vector<1x384xf32>
    %352 = tpu.matmul %340, %16, %cst_87 {dimension_numbers = #tpu.dot_dimension_numbers<[1], [0], [0], [1], [0, 0, 1, 1], [], []>} : vector<1x128xf32>, vector<128x384xf32>, vector<1x384xf32> -> vector<1x384xf32>
    %353 = arith.addf %352, %17 : vector<1x384xf32>
    %354 = vector.extract_strided_slice %347 {offsets = [0, 0], sizes = [1, 128], strides = [1, 1]} : vector<1x384xf32> to vector<1x128xf32>
    %355 = vector.extract_strided_slice %351 {offsets = [0, 0], sizes = [1, 128], strides = [1, 1]} : vector<1x384xf32> to vector<1x128xf32>
    %356 = arith.addf %354, %355 : vector<1x128xf32>
    %357 = arith.negf %356 : vector<1x128xf32>
    %358 = math.exp %357 : vector<1x128xf32>
    %cst_88 = arith.constant 1.000000e+00 : f32
    %359 = vector.broadcast %cst_88 : f32 to vector<1x128xf32>
    %360 = arith.addf %359, %358 : vector<1x128xf32>
    %361 = arith.divf %359, %360 : vector<1x128xf32>
    %362 = vector.extract_strided_slice %347 {offsets = [0, 128], sizes = [1, 128], strides = [1, 1]} : vector<1x384xf32> to vector<1x128xf32>
    %363 = vector.extract_strided_slice %351 {offsets = [0, 128], sizes = [1, 128], strides = [1, 1]} : vector<1x384xf32> to vector<1x128xf32>
    %364 = arith.addf %362, %363 : vector<1x128xf32>
    %365 = arith.negf %364 : vector<1x128xf32>
    %366 = math.exp %365 : vector<1x128xf32>
    %cst_89 = arith.constant 1.000000e+00 : f32
    %367 = vector.broadcast %cst_89 : f32 to vector<1x128xf32>
    %368 = arith.addf %367, %366 : vector<1x128xf32>
    %369 = arith.divf %367, %368 : vector<1x128xf32>
    %370 = vector.extract_strided_slice %347 {offsets = [0, 256], sizes = [1, 128], strides = [1, 1]} : vector<1x384xf32> to vector<1x128xf32>
    %371 = vector.extract_strided_slice %351 {offsets = [0, 256], sizes = [1, 128], strides = [1, 1]} : vector<1x384xf32> to vector<1x128xf32>
    %372 = arith.mulf %361, %371 : vector<1x128xf32>
    %373 = arith.addf %370, %372 : vector<1x128xf32>
    %374 = math.tanh %373 : vector<1x128xf32>
    %cst_90 = arith.constant 1.000000e+00 : f32
    %375 = vector.broadcast %cst_90 : f32 to vector<1x128xf32>
    %376 = arith.subf %375, %369 : vector<1x128xf32>
    %377 = arith.mulf %376, %374 : vector<1x128xf32>
    %378 = arith.mulf %369, %314 : vector<1x128xf32>
    %379 = arith.addf %377, %378 : vector<1x128xf32>
    %380 = vector.extract_strided_slice %349 {offsets = [0, 0], sizes = [1, 128], strides = [1, 1]} : vector<1x384xf32> to vector<1x128xf32>
    %381 = vector.extract_strided_slice %353 {offsets = [0, 0], sizes = [1, 128], strides = [1, 1]} : vector<1x384xf32> to vector<1x128xf32>
    %382 = arith.addf %380, %381 : vector<1x128xf32>
    %383 = arith.negf %382 : vector<1x128xf32>
    %384 = math.exp %383 : vector<1x128xf32>
    %cst_91 = arith.constant 1.000000e+00 : f32
    %385 = vector.broadcast %cst_91 : f32 to vector<1x128xf32>
    %386 = arith.addf %385, %384 : vector<1x128xf32>
    %387 = arith.divf %385, %386 : vector<1x128xf32>
    %388 = vector.extract_strided_slice %349 {offsets = [0, 128], sizes = [1, 128], strides = [1, 1]} : vector<1x384xf32> to vector<1x128xf32>
    %389 = vector.extract_strided_slice %353 {offsets = [0, 128], sizes = [1, 128], strides = [1, 1]} : vector<1x384xf32> to vector<1x128xf32>
    %390 = arith.addf %388, %389 : vector<1x128xf32>
    %391 = arith.negf %390 : vector<1x128xf32>
    %392 = math.exp %391 : vector<1x128xf32>
    %cst_92 = arith.constant 1.000000e+00 : f32
    %393 = vector.broadcast %cst_92 : f32 to vector<1x128xf32>
    %394 = arith.addf %393, %392 : vector<1x128xf32>
    %395 = arith.divf %393, %394 : vector<1x128xf32>
    %396 = vector.extract_strided_slice %349 {offsets = [0, 256], sizes = [1, 128], strides = [1, 1]} : vector<1x384xf32> to vector<1x128xf32>
    %397 = vector.extract_strided_slice %353 {offsets = [0, 256], sizes = [1, 128], strides = [1, 1]} : vector<1x384xf32> to vector<1x128xf32>
    %398 = arith.mulf %387, %397 : vector<1x128xf32>
    %399 = arith.addf %396, %398 : vector<1x128xf32>
    %400 = math.tanh %399 : vector<1x128xf32>
    %cst_93 = arith.constant 1.000000e+00 : f32
    %401 = vector.broadcast %cst_93 : f32 to vector<1x128xf32>
    %402 = arith.subf %401, %395 : vector<1x128xf32>
    %403 = arith.mulf %402, %400 : vector<1x128xf32>
    %404 = arith.mulf %395, %340 : vector<1x128xf32>
    %405 = arith.addf %403, %404 : vector<1x128xf32>
    %406 = arith.index_cast %c5_i32 : i32 to index
    %c0_94 = arith.constant 0 : index
    %407 = vector.load %arg14[%406, %c0_94] : memref<8x256xf32, #tpu.memory_space<vmem>>, vector<1x128xf32>
    tpu.vector_store %arg14[%406, %c0_94], %379 {strides = array<i32>} : memref<8x256xf32, #tpu.memory_space<vmem>>, vector<1x128xf32>,
    %408 = arith.index_cast %345 : i32 to index
    %c128_95 = arith.constant 128 : index
    %409 = vector.load %arg14[%408, %c128_95] : memref<8x256xf32, #tpu.memory_space<vmem>>, vector<1x128xf32>
    tpu.vector_store %arg14[%408, %c128_95], %405 {strides = array<i32>} : memref<8x256xf32, #tpu.memory_space<vmem>>, vector<1x128xf32>,
    %c6_i32 = arith.constant 6 : i32
    %c7_i32_96 = arith.constant 7 : i32
    %410 = arith.subi %c7_i32_96, %c6_i32 : i32
    %411 = arith.index_cast %c6_i32 : i32 to index
    %c0_97 = arith.constant 0 : index
    %412 = vector.load %arg13[%411, %c0_97] : memref<8x768xf32, #tpu.memory_space<vmem>>, vector<1x384xf32>
    %413 = arith.index_cast %410 : i32 to index
    %c384_98 = arith.constant 384 : index
    %414 = vector.load %arg13[%413, %c384_98] : memref<8x768xf32, #tpu.memory_space<vmem>>, vector<1x384xf32>
    %cst_99 = arith.constant dense<0.000000e+00> : vector<1x384xf32>
    %415 = tpu.matmul %379, %14, %cst_99 {dimension_numbers = #tpu.dot_dimension_numbers<[1], [0], [0], [1], [0, 0, 1, 1], [], []>} : vector<1x128xf32>, vector<128x384xf32>, vector<1x384xf32> -> vector<1x384xf32>
    %416 = arith.addf %415, %15 : vector<1x384xf32>
    %cst_100 = arith.constant dense<0.000000e+00> : vector<1x384xf32>
    %417 = tpu.matmul %405, %16, %cst_100 {dimension_numbers = #tpu.dot_dimension_numbers<[1], [0], [0], [1], [0, 0, 1, 1], [], []>} : vector<1x128xf32>, vector<128x384xf32>, vector<1x384xf32> -> vector<1x384xf32>
    %418 = arith.addf %417, %17 : vector<1x384xf32>
    %419 = vector.extract_strided_slice %412 {offsets = [0, 0], sizes = [1, 128], strides = [1, 1]} : vector<1x384xf32> to vector<1x128xf32>
    %420 = vector.extract_strided_slice %416 {offsets = [0, 0], sizes = [1, 128], strides = [1, 1]} : vector<1x384xf32> to vector<1x128xf32>
    %421 = arith.addf %419, %420 : vector<1x128xf32>
    %422 = arith.negf %421 : vector<1x128xf32>
    %423 = math.exp %422 : vector<1x128xf32>
    %cst_101 = arith.constant 1.000000e+00 : f32
    %424 = vector.broadcast %cst_101 : f32 to vector<1x128xf32>
    %425 = arith.addf %424, %423 : vector<1x128xf32>
    %426 = arith.divf %424, %425 : vector<1x128xf32>
    %427 = vector.extract_strided_slice %412 {offsets = [0, 128], sizes = [1, 128], strides = [1, 1]} : vector<1x384xf32> to vector<1x128xf32>
    %428 = vector.extract_strided_slice %416 {offsets = [0, 128], sizes = [1, 128], strides = [1, 1]} : vector<1x384xf32> to vector<1x128xf32>
    %429 = arith.addf %427, %428 : vector<1x128xf32>
    %430 = arith.negf %429 : vector<1x128xf32>
    %431 = math.exp %430 : vector<1x128xf32>
    %cst_102 = arith.constant 1.000000e+00 : f32
    %432 = vector.broadcast %cst_102 : f32 to vector<1x128xf32>
    %433 = arith.addf %432, %431 : vector<1x128xf32>
    %434 = arith.divf %432, %433 : vector<1x128xf32>
    %435 = vector.extract_strided_slice %412 {offsets = [0, 256], sizes = [1, 128], strides = [1, 1]} : vector<1x384xf32> to vector<1x128xf32>
    %436 = vector.extract_strided_slice %416 {offsets = [0, 256], sizes = [1, 128], strides = [1, 1]} : vector<1x384xf32> to vector<1x128xf32>
    %437 = arith.mulf %426, %436 : vector<1x128xf32>
    %438 = arith.addf %435, %437 : vector<1x128xf32>
    %439 = math.tanh %438 : vector<1x128xf32>
    %cst_103 = arith.constant 1.000000e+00 : f32
    %440 = vector.broadcast %cst_103 : f32 to vector<1x128xf32>
    %441 = arith.subf %440, %434 : vector<1x128xf32>
    %442 = arith.mulf %441, %439 : vector<1x128xf32>
    %443 = arith.mulf %434, %379 : vector<1x128xf32>
    %444 = arith.addf %442, %443 : vector<1x128xf32>
    %445 = vector.extract_strided_slice %414 {offsets = [0, 0], sizes = [1, 128], strides = [1, 1]} : vector<1x384xf32> to vector<1x128xf32>
    %446 = vector.extract_strided_slice %418 {offsets = [0, 0], sizes = [1, 128], strides = [1, 1]} : vector<1x384xf32> to vector<1x128xf32>
    %447 = arith.addf %445, %446 : vector<1x128xf32>
    %448 = arith.negf %447 : vector<1x128xf32>
    %449 = math.exp %448 : vector<1x128xf32>
    %cst_104 = arith.constant 1.000000e+00 : f32
    %450 = vector.broadcast %cst_104 : f32 to vector<1x128xf32>
    %451 = arith.addf %450, %449 : vector<1x128xf32>
    %452 = arith.divf %450, %451 : vector<1x128xf32>
    %453 = vector.extract_strided_slice %414 {offsets = [0, 128], sizes = [1, 128], strides = [1, 1]} : vector<1x384xf32> to vector<1x128xf32>
    %454 = vector.extract_strided_slice %418 {offsets = [0, 128], sizes = [1, 128], strides = [1, 1]} : vector<1x384xf32> to vector<1x128xf32>
    %455 = arith.addf %453, %454 : vector<1x128xf32>
    %456 = arith.negf %455 : vector<1x128xf32>
    %457 = math.exp %456 : vector<1x128xf32>
    %cst_105 = arith.constant 1.000000e+00 : f32
    %458 = vector.broadcast %cst_105 : f32 to vector<1x128xf32>
    %459 = arith.addf %458, %457 : vector<1x128xf32>
    %460 = arith.divf %458, %459 : vector<1x128xf32>
    %461 = vector.extract_strided_slice %414 {offsets = [0, 256], sizes = [1, 128], strides = [1, 1]} : vector<1x384xf32> to vector<1x128xf32>
    %462 = vector.extract_strided_slice %418 {offsets = [0, 256], sizes = [1, 128], strides = [1, 1]} : vector<1x384xf32> to vector<1x128xf32>
    %463 = arith.mulf %452, %462 : vector<1x128xf32>
    %464 = arith.addf %461, %463 : vector<1x128xf32>
    %465 = math.tanh %464 : vector<1x128xf32>
    %cst_106 = arith.constant 1.000000e+00 : f32
    %466 = vector.broadcast %cst_106 : f32 to vector<1x128xf32>
    %467 = arith.subf %466, %460 : vector<1x128xf32>
    %468 = arith.mulf %467, %465 : vector<1x128xf32>
    %469 = arith.mulf %460, %405 : vector<1x128xf32>
    %470 = arith.addf %468, %469 : vector<1x128xf32>
    %471 = arith.index_cast %c6_i32 : i32 to index
    %c0_107 = arith.constant 0 : index
    %472 = vector.load %arg14[%471, %c0_107] : memref<8x256xf32, #tpu.memory_space<vmem>>, vector<1x128xf32>
    tpu.vector_store %arg14[%471, %c0_107], %444 {strides = array<i32>} : memref<8x256xf32, #tpu.memory_space<vmem>>, vector<1x128xf32>,
    %473 = arith.index_cast %410 : i32 to index
    %c128_108 = arith.constant 128 : index
    %474 = vector.load %arg14[%473, %c128_108] : memref<8x256xf32, #tpu.memory_space<vmem>>, vector<1x128xf32>
    tpu.vector_store %arg14[%473, %c128_108], %470 {strides = array<i32>} : memref<8x256xf32, #tpu.memory_space<vmem>>, vector<1x128xf32>,
    %c7_i32_109 = arith.constant 7 : i32
    %c7_i32_110 = arith.constant 7 : i32
    %475 = arith.subi %c7_i32_110, %c7_i32_109 : i32
    %476 = arith.index_cast %c7_i32_109 : i32 to index
    %c0_111 = arith.constant 0 : index
    %477 = vector.load %arg13[%476, %c0_111] : memref<8x768xf32, #tpu.memory_space<vmem>>, vector<1x384xf32>
    %478 = arith.index_cast %475 : i32 to index
    %c384_112 = arith.constant 384 : index
    %479 = vector.load %arg13[%478, %c384_112] : memref<8x768xf32, #tpu.memory_space<vmem>>, vector<1x384xf32>
    %cst_113 = arith.constant dense<0.000000e+00> : vector<1x384xf32>
    %480 = tpu.matmul %444, %14, %cst_113 {dimension_numbers = #tpu.dot_dimension_numbers<[1], [0], [0], [1], [0, 0, 1, 1], [], []>} : vector<1x128xf32>, vector<128x384xf32>, vector<1x384xf32> -> vector<1x384xf32>
    %481 = arith.addf %480, %15 : vector<1x384xf32>
    %cst_114 = arith.constant dense<0.000000e+00> : vector<1x384xf32>
    %482 = tpu.matmul %470, %16, %cst_114 {dimension_numbers = #tpu.dot_dimension_numbers<[1], [0], [0], [1], [0, 0, 1, 1], [], []>} : vector<1x128xf32>, vector<128x384xf32>, vector<1x384xf32> -> vector<1x384xf32>
    %483 = arith.addf %482, %17 : vector<1x384xf32>
    %484 = vector.extract_strided_slice %477 {offsets = [0, 0], sizes = [1, 128], strides = [1, 1]} : vector<1x384xf32> to vector<1x128xf32>
    %485 = vector.extract_strided_slice %481 {offsets = [0, 0], sizes = [1, 128], strides = [1, 1]} : vector<1x384xf32> to vector<1x128xf32>
    %486 = arith.addf %484, %485 : vector<1x128xf32>
    %487 = arith.negf %486 : vector<1x128xf32>
    %488 = math.exp %487 : vector<1x128xf32>
    %cst_115 = arith.constant 1.000000e+00 : f32
    %489 = vector.broadcast %cst_115 : f32 to vector<1x128xf32>
    %490 = arith.addf %489, %488 : vector<1x128xf32>
    %491 = arith.divf %489, %490 : vector<1x128xf32>
    %492 = vector.extract_strided_slice %477 {offsets = [0, 128], sizes = [1, 128], strides = [1, 1]} : vector<1x384xf32> to vector<1x128xf32>
    %493 = vector.extract_strided_slice %481 {offsets = [0, 128], sizes = [1, 128], strides = [1, 1]} : vector<1x384xf32> to vector<1x128xf32>
    %494 = arith.addf %492, %493 : vector<1x128xf32>
    %495 = arith.negf %494 : vector<1x128xf32>
    %496 = math.exp %495 : vector<1x128xf32>
    %cst_116 = arith.constant 1.000000e+00 : f32
    %497 = vector.broadcast %cst_116 : f32 to vector<1x128xf32>
    %498 = arith.addf %497, %496 : vector<1x128xf32>
    %499 = arith.divf %497, %498 : vector<1x128xf32>
    %500 = vector.extract_strided_slice %477 {offsets = [0, 256], sizes = [1, 128], strides = [1, 1]} : vector<1x384xf32> to vector<1x128xf32>
    %501 = vector.extract_strided_slice %481 {offsets = [0, 256], sizes = [1, 128], strides = [1, 1]} : vector<1x384xf32> to vector<1x128xf32>
    %502 = arith.mulf %491, %501 : vector<1x128xf32>
    %503 = arith.addf %500, %502 : vector<1x128xf32>
    %504 = math.tanh %503 : vector<1x128xf32>
    %cst_117 = arith.constant 1.000000e+00 : f32
    %505 = vector.broadcast %cst_117 : f32 to vector<1x128xf32>
    %506 = arith.subf %505, %499 : vector<1x128xf32>
    %507 = arith.mulf %506, %504 : vector<1x128xf32>
    %508 = arith.mulf %499, %444 : vector<1x128xf32>
    %509 = arith.addf %507, %508 : vector<1x128xf32>
    %510 = vector.extract_strided_slice %479 {offsets = [0, 0], sizes = [1, 128], strides = [1, 1]} : vector<1x384xf32> to vector<1x128xf32>
    %511 = vector.extract_strided_slice %483 {offsets = [0, 0], sizes = [1, 128], strides = [1, 1]} : vector<1x384xf32> to vector<1x128xf32>
    %512 = arith.addf %510, %511 : vector<1x128xf32>
    %513 = arith.negf %512 : vector<1x128xf32>
    %514 = math.exp %513 : vector<1x128xf32>
    %cst_118 = arith.constant 1.000000e+00 : f32
    %515 = vector.broadcast %cst_118 : f32 to vector<1x128xf32>
    %516 = arith.addf %515, %514 : vector<1x128xf32>
    %517 = arith.divf %515, %516 : vector<1x128xf32>
    %518 = vector.extract_strided_slice %479 {offsets = [0, 128], sizes = [1, 128], strides = [1, 1]} : vector<1x384xf32> to vector<1x128xf32>
    %519 = vector.extract_strided_slice %483 {offsets = [0, 128], sizes = [1, 128], strides = [1, 1]} : vector<1x384xf32> to vector<1x128xf32>
    %520 = arith.addf %518, %519 : vector<1x128xf32>
    %521 = arith.negf %520 : vector<1x128xf32>
    %522 = math.exp %521 : vector<1x128xf32>
    %cst_119 = arith.constant 1.000000e+00 : f32
    %523 = vector.broadcast %cst_119 : f32 to vector<1x128xf32>
    %524 = arith.addf %523, %522 : vector<1x128xf32>
    %525 = arith.divf %523, %524 : vector<1x128xf32>
    %526 = vector.extract_strided_slice %479 {offsets = [0, 256], sizes = [1, 128], strides = [1, 1]} : vector<1x384xf32> to vector<1x128xf32>
    %527 = vector.extract_strided_slice %483 {offsets = [0, 256], sizes = [1, 128], strides = [1, 1]} : vector<1x384xf32> to vector<1x128xf32>
    %528 = arith.mulf %517, %527 : vector<1x128xf32>
    %529 = arith.addf %526, %528 : vector<1x128xf32>
    %530 = math.tanh %529 : vector<1x128xf32>
    %cst_120 = arith.constant 1.000000e+00 : f32
    %531 = vector.broadcast %cst_120 : f32 to vector<1x128xf32>
    %532 = arith.subf %531, %525 : vector<1x128xf32>
    %533 = arith.mulf %532, %530 : vector<1x128xf32>
    %534 = arith.mulf %525, %470 : vector<1x128xf32>
    %535 = arith.addf %533, %534 : vector<1x128xf32>
    %536 = arith.index_cast %c7_i32_109 : i32 to index
    %c0_121 = arith.constant 0 : index
    %537 = vector.load %arg14[%536, %c0_121] : memref<8x256xf32, #tpu.memory_space<vmem>>, vector<1x128xf32>
    tpu.vector_store %arg14[%536, %c0_121], %509 {strides = array<i32>} : memref<8x256xf32, #tpu.memory_space<vmem>>, vector<1x128xf32>,
    %538 = arith.index_cast %475 : i32 to index
    %c128_122 = arith.constant 128 : index
    %539 = vector.load %arg14[%538, %c128_122] : memref<8x256xf32, #tpu.memory_space<vmem>>, vector<1x128xf32>
    tpu.vector_store %arg14[%538, %c128_122], %535 {strides = array<i32>} : memref<8x256xf32, #tpu.memory_space<vmem>>, vector<1x128xf32>,
    %c8_i32 = arith.constant 8 : i32
    %c0_123 = arith.constant 0 : index
    %c0_124 = arith.constant 0 : index
    %540 = vector.load %arg12[%c0_123, %c0_124] : memref<2x128xf32, #tpu.memory_space<vmem>>, vector<1x128xf32>
    tpu.vector_store %arg12[%c0_123, %c0_124], %509 {strides = array<i32>} : memref<2x128xf32, #tpu.memory_space<vmem>>, vector<1x128xf32>,
    %c1_125 = arith.constant 1 : index
    %c0_126 = arith.constant 0 : index
    %541 = vector.load %arg12[%c1_125, %c0_126] : memref<2x128xf32, #tpu.memory_space<vmem>>, vector<1x128xf32>
    tpu.vector_store %arg12[%c1_125, %c0_126], %535 {strides = array<i32>} : memref<2x128xf32, #tpu.memory_space<vmem>>, vector<1x128xf32>,
    %c0_127 = arith.constant 0 : index
    %c0_128 = arith.constant 0 : index
    %542 = vector.load %arg14[%c0_127, %c0_128] : memref<8x256xf32, #tpu.memory_space<vmem>>, vector<8x256xf32>
    %c0_129 = arith.constant 0 : index
    %c0_130 = arith.constant 0 : index
    %543 = vector.load %arg8[%c0_129, %c0_130] : memref<256x128xf32, #tpu.memory_space<vmem>>, vector<256x128xf32>
    %cst_131 = arith.constant dense<0.000000e+00> : vector<8x128xf32>
    %544 = tpu.matmul %542, %543, %cst_131 {dimension_numbers = #tpu.dot_dimension_numbers<[1], [0], [0], [1], [0, 0, 1, 1], [], []>} : vector<8x256xf32>, vector<256x128xf32>, vector<8x128xf32> -> vector<8x128xf32>
    %c0_132 = arith.constant 0 : index
    %c0_133 = arith.constant 0 : index
    %545 = vector.load %arg9[%c0_132, %c0_133] : memref<1x128xf32, #tpu.memory_space<vmem>>, vector<1x128xf32>
    %546 = vector.broadcast %545 : vector<1x128xf32> to vector<8x128xf32>
    %547 = arith.addf %544, %546 : vector<8x128xf32>
    %cst_134 = arith.constant dense<0xFF800000> : vector<8xf32>
    %548 = vector.multi_reduction <maximumf>, %547, %cst_134 [1] : vector<8x128xf32> to vector<8xf32>
    %549 = vector.shape_cast %548 : vector<8xf32> to vector<8x1xf32>
    %550 = vector.broadcast %549 : vector<8x1xf32> to vector<8x128xf32>
    %551 = arith.subf %547, %550 : vector<8x128xf32>
    %552 = math.exp %551 : vector<8x128xf32>
    %cst_135 = arith.constant dense<0.000000e+00> : vector<8xf32>
    %553 = vector.multi_reduction <add>, %552, %cst_135 [1] : vector<8x128xf32> to vector<8xf32>
    %554 = vector.shape_cast %553 : vector<8xf32> to vector<8x1xf32>
    %555 = tpu.reciprocal %554 : vector<8x1xf32> -> vector<8x1xf32>
    %556 = vector.broadcast %555 : vector<8x1xf32> to vector<8x128xf32>
    %557 = arith.mulf %552, %556 : vector<8x128xf32>
    %c0_136 = arith.constant 0 : index
    %c0_137 = arith.constant 0 : index
    %558 = vector.load %arg11[%c0_136, %c0_137] : memref<8x128xf32, #tpu.memory_space<vmem>>, vector<8x128xf32>
    tpu.vector_store %arg11[%c0_136, %c0_137], %557 {strides = array<i32>} : memref<8x128xf32, #tpu.memory_space<vmem>>, vector<8x128xf32>,
    return
  }
}

</mosaic_0001>

<bundles_post_ra>
// kernel: bigru_pos_tagger_forward.1
= control target key start
LH: loop header
LB: loop body
LE: loop exit
PB: predicated region body
PF: predicated region fallthrough
CT: control target
= control target key end

     0   :  { %18 = vsyncpa [#allocation5], 0  ;;  %s6641_s0 = inlined_call_operand.vmem [shape: s32[8,1], index: 0, kind: input, shape index: {}]   ;;  %s6642_s1 = inlined_call_operand.vmem [shape: f32[16,32], index: 1, kind: input, shape index: {}]   ;;  %s6643_s2 = inlined_call_operand.hbm [shape: f32[32,768], index: 2, kind: input, shape index: {}]   ;;  %s6644_s3 = inlined_call_operand.vmem [shape: f32[1,768], index: 3, kind: input, shape index: {}]   ;;  %s6645_s4 = inlined_call_operand.hbm [shape: f32[128,384], index: 4, kind: input, shape index: {}]   ;;  %s6646_s5 = inlined_call_operand.vmem [shape: f32[1,384], index: 5, kind: input, shape index: {}]   ;;  %s6647_s6 = inlined_call_operand.hbm [shape: f32[128,384], index: 6, kind: input, shape index: {}]   ;;  %s6648_s7 = inlined_call_operand.vmem [shape: f32[1,384], index: 7, kind: input, shape index: {}]   ;;  %s6649_s8 = inlined_call_operand.hbm [shape: f32[256,128], index: 8, kind: input, shape index: {}]   ;;  %s6650_s9 = inlined_call_operand.vmem [shape: f32[1,128], index: 9, kind: input, shape index: {}]   ;;  %s6651_s10 = inlined_call_operand.vmem [shape: f32[2,128], index: 10, kind: input, shape index: {}]   ;;  %s6652_s11 = inlined_call_operand.vmem [shape: f32[8,128], index: 11, kind: output, shape index: {0}]   ;;  %s6653_s12 = inlined_call_operand.hbm [shape: f32[2,128], index: 12, kind: output, shape index: {1}]  }
   0x1   :  { %19 = vsyncpa [#allocation8], 0 }
   0x2   :  { %20 = vsyncpa [#allocation11], 0 }
   0x3   :  { %21 = vsyncpa [#allocation6], 0  ;;  %s5623_s21 = smov [#allocation7]   ;;  %s5505_s25 = scalar_lea.hbm %s6645_s4, 6144 }
   0x4   :  { %s45_s22 = sshll.u32 %s5623_s21, 4  ;;  %p5506_p0 = scmp.ne.s32.totalorder %s6645_s4, %s5505_s25  ;;  %s46_s22 = int_to_ptr.vmem [resolvable:$true] %s45_s22 }
   0x5   :  { %p5509_p1 = scmp.lt.u32.totalorder %s5505_s25, %s6645_s4 }
   0x7   :  { %p5511_p2 = pnand %p5509_p1, %p5506_p0 }
   0x9   :  { %5514 = shalt.err (!%p5511_p2)
}
   0xa   :  { %s5515_s30 = scalar_lea.vmem %s46_s22, 6144  ;;  %p5520_p4 = scmp.lt.s32.totalorder %s46_s22, %s46_s22 }
   0xb   :  { %p5516_p3 = scmp.ne.s32.totalorder %s46_s22, %s5515_s30  ;;  %p5521_p5 = scmp.lt.s32.totalorder %s5515_s30, %s5515_s30 }
   0xd   :  { %p5522_p6 = por %p5521_p5, %p5520_p4 }
   0xf   :  { %p5523_p7 = pnand %p5522_p6, %p5516_p3 }
  0x11   :  { %5526 = shalt.err (!%p5523_p7)
}
  0x12   :  { %s5624_s13 = smov 384   ;;  %s5625_s14 = smov 24  }
  0x13   :  { %51 = dma.hbm_to_vmem [thread:$0]  %s6645_s4, 6144, %s46_s22, [#allocation8], %s5624_s13, %s5624_s13, %s5625_s14  }
  0x14   :  { %s5626_s17 = smov [#allocation4]   ;;  %s5527_s21 = scalar_lea.hbm %s6643_s2, 3072 }
  0x15   :  { %s31_s18 = sshll.u32 %s5626_s17, 4  ;;  %p5528_p8 = scmp.ne.s32.totalorder %s6643_s2, %s5527_s21  ;;  %s32_s18 = int_to_ptr.vmem [resolvable:$true] %s31_s18 }
  0x16   :  { %p5531_p9 = scmp.lt.u32.totalorder %s5527_s21, %s6643_s2 }
  0x18   :  { %p5533_p10 = pnand %p5531_p9, %p5528_p8 }
  0x1a   :  { %5536 = shalt.err (!%p5533_p10)
}
  0x1b   :  { %s5537_s27 = scalar_lea.vmem %s32_s18, 3072  ;;  %p5542_p12 = scmp.lt.s32.totalorder %s32_s18, %s32_s18 }
  0x1c   :  { %p5538_p11 = scmp.ne.s32.totalorder %s32_s18, %s5537_s27  ;;  %p5543_p13 = scmp.lt.s32.totalorder %s5537_s27, %s5537_s27 }
  0x1e   :  { %p5544_p0 = por %p5543_p13, %p5542_p12 }
  0x20   :  { %p5545_p1 = pnand %p5544_p0, %p5538_p11 }
  0x22   :  { %5548 = shalt.err (!%p5545_p1)
}
  0x23   :  { %s5627_s4 = smov 768   ;;  %s5628_s22 = smov 48  }
  0x24   :  { %37 = dma.hbm_to_vmem [thread:$0]  %s6643_s2, 3072, %s32_s18, [#allocation5], %s5627_s4, %s5627_s4, %s5628_s22  }
  0x25   :  { %s5629_s30 = smov [#allocation9]   ;;  %s5630_s16 = smov [#allocation10]  }
  0x26   :  { %s59_s15 = sshll.u32 %s5629_s30, 4  ;;  %s73_s17 = sshll.u32 %s5630_s16, 4  ;;  %s60_s15 = int_to_ptr.vmem [resolvable:$true] %s59_s15  ;;  %s5730_s17 = int_to_ptr.vmem [resolvable:$true] %s73_s17 }
  0x27   :  { %s5549_s21 = scalar_lea.hbm %s6647_s6, 6144 }
  0x28   :  { %p5550_p2 = scmp.ne.s32.totalorder %s6647_s6, %s5549_s21  ;;  %p5553_p3 = scmp.lt.u32.totalorder %s5549_s21, %s6647_s6 }
  0x2a   :  { %p5555_p4 = pnand %p5553_p3, %p5550_p2 }
  0x2c   :  { %5558 = shalt.err (!%p5555_p4)
}
  0x2d   :  { %s5559_s2 = scalar_lea.vmem %s60_s15, 6144  ;;  %p5564_p6 = scmp.lt.s32.totalorder %s60_s15, %s60_s15 }
  0x2e   :  { %p5560_p5 = scmp.ne.s32.totalorder %s60_s15, %s5559_s2  ;;  %p5565_p7 = scmp.lt.s32.totalorder %s5559_s2, %s5559_s2 }
  0x30   :  { %p5566_p8 = por %p5565_p7, %p5564_p6 }
  0x32   :  { %p5567_p9 = pnand %p5566_p8, %p5560_p5 }
  0x34   :  { %5570 = shalt.err (!%p5567_p9)
}
  0x35   :  { %65 = dma.hbm_to_vmem [thread:$0]  %s6647_s6, 6144, %s60_s15, [#allocation8], %s5624_s13, %s5624_s13, %s5625_s14  }
  0x36   :  { %s5571_s28 = scalar_lea.hbm %s6649_s8, 4096 }
  0x37   :  { %p5572_p10 = scmp.ne.s32.totalorder %s6649_s8, %s5571_s28  ;;  %p5575_p11 = scmp.lt.u32.totalorder %s5571_s28, %s6649_s8 }
  0x39   :  { %p5577_p12 = pnand %p5575_p11, %p5572_p10 }
  0x3b   :  { %5580 = shalt.err (!%p5577_p12)
}
  0x3c   :  { %s5581_s20 = scalar_lea.vmem %s5730_s17, 4096  ;;  %p5586_p0 = scmp.lt.s32.totalorder %s5730_s17, %s5730_s17 }
  0x3d   :  { %p5582_p13 = scmp.ne.s32.totalorder %s5730_s17, %s5581_s20  ;;  %p5587_p1 = scmp.lt.s32.totalorder %s5581_s20, %s5581_s20 }
  0x3f   :  { %p5588_p2 = por %p5587_p1, %p5586_p0 }
  0x41   :  { %p5589_p3 = pnand %p5588_p2, %p5582_p13 }
  0x43   :  { %5592 = shalt.err (!%p5589_p3)
}
  0x44   :  { %s5631_s6 = smov 128   ;;  %s5632_s13 = smov 8  }
  0x45   :  { %79 = dma.hbm_to_vmem [thread:$0]  %s6649_s8, 4096, %s5730_s17, [#allocation11], %s5631_s6, %s5631_s6, %s5632_s13  }
  0x46   :  { %5615 = dma.done.wait [#allocation5], 3072  }
  0x47   :  { %5616 = vsyncadd [#allocation5], 4294964224 }
  0x48   :  { %5617 = dma.done.wait [#allocation8], 12288  }
  0x49   :  { %5618 = vsyncadd [#allocation8], 4294955008 }
  0x4a   :  { %5619 = dma.done.wait [#allocation11], 4096  }
  0x4b   :  { %5620 = vsyncadd [#allocation11], 4294963200  ;;  %v5633_v0 = vmov 0   ;;  %v6664_v1 = vmov 0.0|0.0   ;;  %v6654_v2 = vmov 0.0   ;;  %v96_v3 = vld [vmem:[%s6641_s0] sm:$0xff] }
  0x4c   :  { %5340 = vset.pattern.permute.xlu0 %v5633_v0  ;;  %4370 = vmatprep.subr.bf16.mxu1 %v6664_v1  ;;  %v105_v4 = vld [vmem:[%s6642_s1] sm:$0xff]  ;;  %v106_v5 = vld [vmem:[%s6642_s1 + $0x8] sm:$0xff]  ;;  %vm5636_vm0 = vmmov 0   ;;  %v463_v11 = vld [vmem:[#allocation7 + $0x18] sm:$0xff]  ;;  %vm107_vm1 = vcmask 130048   ;;  %vm237_vm3 = vcmask 261120  }
  0x4d   :  { %643 = vmatprep.mubr.f32.mxu0 %v6654_v2  ;;  %100 = vperm.xlu0 %5340, %v96_v3   ;;  %v4371_v6 = vpack.c.bf16 %v106_v5, %v105_v4  ;;  %v461_v7 = vld [vmem:[#allocation7 + $0x8] sm:$0xff]  ;;  %v464_v8 = vld [vmem:[#allocation7 + $0x20] sm:$0xff]  ;;  %v467_v12 = vld [vmem:[#allocation7 + $0x38] sm:$0xff]  ;;  %s5637_s28 = smov [#allocation12]  }
  0x4e   :  { %3807 = vmatprep.mubr.msk.f32.mxu1 %vm5636_vm0, %v6654_v2  ;;  %v460_v9 = vld [vmem:[#allocation7] sm:$0xff]  ;;  %v5777_v10 = vpack.c.bf16 %v464_v8, %v461_v7  ;;  %v470_v13 = vld [vmem:[#allocation7 + $0x50] sm:$0xff]  ;;  %v469_v17 = vld [vmem:[#allocation7 + $0x48] sm:$0xff]  ;;  %s3442_s29 = sshll.u32 %s5637_s28, 4  ;;  %s3443_s29 = int_to_ptr.vmem [resolvable:$true] %s3442_s29 }
  0x4f   :  { %4372 = vmatpush3.bf16.msra.mxu1 %v4371_v6  ;;  %v5779_v14 = vpack.c.bf16 %v463_v11, %v460_v9  ;;  %v5781_v15 = vpack.c.bf16 %v470_v13, %v467_v12  ;;  %v466_v16 = vld [vmem:[#allocation7 + $0x30] sm:$0xff]  ;;  %v473_v18 = vld [vmem:[#allocation7 + $0x68] sm:$0xff]  ;;  %v476_v19 = vld [vmem:[#allocation7 + $0x80] sm:$0xff]  ;;  %v97_v9 = vlaneseq  ;;  %s5593_s30 = scalar_lea.vmem %s3443_s29, 32  ;;  %p5598_p5 = scmp.lt.s32.totalorder %s3443_s29, %s3443_s29 }
  0x50   :  { %4398 = vmatprep.subr.bf16.mxu0 %v5777_v10  ;;  %v5785_v20 = vpack.c.bf16 %v469_v17, %v466_v16  ;;  %v5788_v21 = vpack.c.bf16 %v476_v19, %v473_v18  ;;  %v472_v22 = vld [vmem:[#allocation7 + $0x60] sm:$0xff]  ;;  %v475_v23 = vld [vmem:[#allocation7 + $0x78] sm:$0xff]  ;;  %v482_v25 = vld [vmem:[#allocation7 + $0xb0] sm:$0xff]  ;;  %p5594_p4 = scmp.ne.s32.totalorder %s3443_s29, %s5593_s30  ;;  %p5599_p6 = scmp.lt.s32.totalorder %s5593_s30, %s5593_s30 }
  0x51   :  { %4400 = vmatpush1.bf16.msra.mxu0 %v5779_v14  ;;  %v479_v24 = vld [vmem:[#allocation7 + $0x98] sm:$0xff]  ;;  %v5791_v26 = vpack.c.bf16 %v475_v23, %v472_v22  ;;  %v478_v28 = vld [vmem:[#allocation7 + $0x90] sm:$0xff]  ;;  %v481_v29 = vld [vmem:[#allocation7 + $0xa8] sm:$0xff]  ;;  %v98_v11 = vand.u32 127, %v97_v9 }
  0x52   :  { %4402 = vmatprep.subr.bf16.mxu0 %v5781_v15  ;;  %v5794_v27 = vpack.c.bf16 %v482_v25, %v479_v24  ;;  %v485_v30 = vld [vmem:[#allocation7 + $0xc8] sm:$0xff]  ;;  %v488_v31 = vld [vmem:[#allocation7 + $0xe0] sm:$0xff]  ;;  %v188_v33 = vld [vmem:[#allocation4 + $0x38] sm:$0xff]  ;;  %v5797_v34 = vpack.c.bf16 %v481_v29, %v478_v28  ;;  %p5600_p7 = por %p5599_p6, %p5598_p5 }
  0x53   :  { %v182_v32 = vld [vmem:[#allocation4 + $0x8] sm:$0xff]  ;;  %v5800_v36 = vpack.c.bf16 %v488_v31, %v485_v30  ;;  %v484_v37 = vld [vmem:[#allocation7 + $0xc0] sm:$0xff]  ;;  %v487_v38 = vld [vmem:[#allocation7 + $0xd8] sm:$0xff] }
  0x54   :  { %v4373_v35 = vpack.c.bf16 %v188_v33, %v182_v32  ;;  %v491_v39 = vld [vmem:[#allocation7 + $0xf8] sm:$0xff]  ;;  %v494_v40 = vld [vmem:[#allocation7 + $0x110] sm:$0xff]  ;;  %v5803_v41 = vpack.c.bf16 %v487_v38, %v484_v37  ;;  %v493_v44 = vld [vmem:[#allocation7 + $0x108] sm:$0xff]  ;;  %p5601_p8 = pnand %p5600_p7, %p5594_p4 }
  0x55   :  { %4404 = vmatpush1.bf16.msra.mxu0 %v5785_v20  ;;  %6690 = vst [vmem:[#allocation17_spill] sm:$0xff] %v5800_v36  ;;  %v5806_v42 = vpack.c.bf16 %v494_v40, %v491_v39  ;;  %v490_v43 = vld [vmem:[#allocation7 + $0xf0] sm:$0xff]  ;;  %v497_v45 = vld [vmem:[#allocation7 + $0x128] sm:$0xff]  ;;  %v500_v46 = vld [vmem:[#allocation7 + $0x140] sm:$0xff] }
  0x56   :  { %4406 = vmatprep.subr.bf16.mxu0 %v5788_v21  ;;  %4374 = vmatprep.subr.bf16.mxu1 %v4373_v35  ;;  %6691 = vst [vmem:[#allocation18_spill] sm:$0xff] %v5803_v41  ;;  %v5809_v47 = vpack.c.bf16 %v493_v44, %v490_v43  ;;  %v5812_v48 = vpack.c.bf16 %v500_v46, %v497_v45  ;;  %v496_v49 = vld [vmem:[#allocation7 + $0x120] sm:$0xff]  ;;  %v499_v50 = vld [vmem:[#allocation7 + $0x138] sm:$0xff]  ;;  %v506_v52 = vld [vmem:[#allocation7 + $0x170] sm:$0xff] }
  0x57   :  { %6692 = vst [vmem:[#allocation19_spill] sm:$0xff] %v5806_v42  ;;  %v503_v51 = vld [vmem:[#allocation7 + $0x158] sm:$0xff]  ;;  %v5815_v53 = vpack.c.bf16 %v499_v50, %v496_v49  ;;  %v502_v55 = vld [vmem:[#allocation7 + $0x150] sm:$0xff]  ;;  %v505_v56 = vld [vmem:[#allocation7 + $0x168] sm:$0xff] }
  0x58   :  { %6693 = vst [vmem:[#allocation20_spill] sm:$0xff] %v5809_v47  ;;  %6694 = vst [vmem:[#allocation21_spill] sm:$0xff] %v5812_v48  ;;  %v5818_v54 = vpack.c.bf16 %v506_v52, %v503_v51  ;;  %v510_v57 = vld [vmem:[#allocation9 + $0x8] sm:$0xff]  ;;  %v513_v58 = vld [vmem:[#allocation9 + $0x20] sm:$0xff]  ;;  %v5821_v59 = vpack.c.bf16 %v505_v56, %v502_v55 }
  0x59   :  { %4408 = vmatpush1.bf16.msra.mxu0 %v5791_v26  ;;  %6695 = vst [vmem:[#allocation22_spill] sm:$0xff] %v5815_v53  ;;  %v5824_v60 = vpack.c.bf16 %v513_v58, %v510_v57  ;;  %v509_v61 = vld [vmem:[#allocation9] sm:$0xff]  ;;  %v512_v62 = vld [vmem:[#allocation9 + $0x18] sm:$0xff]  ;;  %v519_v0 = vld [vmem:[#allocation9 + $0x50] sm:$0xff] }
  0x5a   :  { %4410 = vmatprep.subr.bf16.mxu0 %v5794_v27  ;;  %6696 = vst [vmem:[#allocation23_spill] sm:$0xff] %v5818_v54  ;;  %6697 = vst [vmem:[#allocation24_spill] sm:$0xff] %v5821_v59  ;;  %v516_v63 = vld [vmem:[#allocation9 + $0x38] sm:$0xff]  ;;  %v5830_v3 = vld [vmem:[%s6651_s10] sm:$0x1]  ;;  %v5832_v4 = vpack.c.bf16 %v512_v62, %v509_v61 }
  0x5b   :  { %6698 = vst [vmem:[#allocation25_spill] sm:$0xff] %v5824_v60  ;;  %v5835_v5 = vpack.c.bf16 %v519_v0, %v516_v63  ;;  %v515_v6 = vld [vmem:[#allocation9 + $0x30] sm:$0xff]  ;;  %v518_v7 = vld [vmem:[#allocation9 + $0x48] sm:$0xff]  ;;  %v181_v12 = vld [vmem:[#allocation4] sm:$0xff] }
  0x5c   :  { %v5839_v8 = vpack.c.bf16 %v518_v7, %v515_v6  ;;  %v187_v13 = vld [vmem:[#allocation4 + $0x30] sm:$0xff]  ;;  %v194_v16 = vld [vmem:[#allocation4 + $0x68] sm:$0xff]  ;;  %v200_v17 = vld [vmem:[#allocation4 + $0x98] sm:$0xff] }
  0x5d   :  { %4412 = vmatpush1.bf16.msra.mxu0 %v5797_v34  ;;  %v4375_v19 = vpack.c.bf16 %v187_v13, %v181_v12  ;;  %v4377_v22 = vpack.c.bf16 %v200_v17, %v194_v16  ;;  %v193_v23 = vld [vmem:[#allocation4 + $0x60] sm:$0xff]  ;;  %v199_v24 = vld [vmem:[#allocation4 + $0x90] sm:$0xff]  ;;  %v184_v29 = vld [vmem:[#allocation4 + $0x18] sm:$0xff] }
  0x5e   :  { %4414 = vmatprep.subr.bf16.mxu0 %v5800_v36  ;;  %v4379_v28 = vpack.c.bf16 %v199_v24, %v193_v23  ;;  %v190_v30 = vld [vmem:[#allocation4 + $0x48] sm:$0xff]  ;;  %v525_v33 = vld [vmem:[#allocation9 + $0x80] sm:$0xff]  ;;  %v524_v38 = vld [vmem:[#allocation9 + $0x78] sm:$0xff] }
  0x5f   :  { %v4381_v31 = vpack.c.bf16 %v190_v30, %v184_v29  ;;  %v522_v32 = vld [vmem:[#allocation9 + $0x68] sm:$0xff]  ;;  %v521_v37 = vld [vmem:[#allocation9 + $0x60] sm:$0xff]  ;;  %v528_v40 = vld [vmem:[#allocation9 + $0x98] sm:$0xff] }
  0x60   :  { %v5847_v35 = vpack.c.bf16 %v525_v33, %v522_v32  ;;  %v5849_v39 = vpack.c.bf16 %v524_v38, %v521_v37  ;;  %v531_v43 = vld [vmem:[#allocation9 + $0xb0] sm:$0xff]  ;;  %v530_v45 = vld [vmem:[#allocation9 + $0xa8] sm:$0xff]  ;;  %v537_v51 = vld [vmem:[#allocation9 + $0xe0] sm:$0xff] }
  0x61   :  { %4416 = vmatpush1.bf16.msra.mxu0 %v5803_v41  ;;  %v527_v44 = vld [vmem:[#allocation9 + $0x90] sm:$0xff]  ;;  %v5853_v46 = vpack.c.bf16 %v531_v43, %v528_v40  ;;  %v534_v50 = vld [vmem:[#allocation9 + $0xc8] sm:$0xff]  ;;  %v533_v52 = vld [vmem:[#allocation9 + $0xc0] sm:$0xff] }
  0x62   :  { %4418 = vmatprep.subr.bf16.mxu0 %v5806_v42  ;;  %v5855_v49 = vpack.c.bf16 %v530_v45, %v527_v44  ;;  %v536_v55 = vld [vmem:[#allocation9 + $0xd8] sm:$0xff]  ;;  %v5859_v56 = vpack.c.bf16 %v537_v51, %v534_v50  ;;  %v543_v61 = vld [vmem:[#allocation9 + $0x110] sm:$0xff]  ;;  %v542_v63 = vld [vmem:[#allocation9 + $0x108] sm:$0xff] }
  0x63   :  { %v5861_v57 = vpack.c.bf16 %v536_v55, %v533_v52  ;;  %v540_v58 = vld [vmem:[#allocation9 + $0xf8] sm:$0xff]  ;;  %v539_v62 = vld [vmem:[#allocation9 + $0xf0] sm:$0xff]  ;;  %v546_v7 = vld [vmem:[#allocation9 + $0x128] sm:$0xff] }
  0x64   :  { %v5865_v0 = vpack.c.bf16 %v543_v61, %v540_v58  ;;  %v5867_v6 = vpack.c.bf16 %v542_v63, %v539_v62  ;;  %v545_v12 = vld [vmem:[#allocation9 + $0x120] sm:$0xff]  ;;  %v548_v13 = vld [vmem:[#allocation9 + $0x138] sm:$0xff]  ;;  %v554_v23 = vld [vmem:[#allocation9 + $0x168] sm:$0xff] }
  0x65   :  { %4420 = vmatpush1.bf16.msra.mxu0 %v5809_v47  ;;  %v5873_v17 = vpack.c.bf16 %v548_v13, %v545_v12  ;;  %v183_v29 = vld [vmem:[#allocation4 + $0x10] sm:$0xff]  ;;  %v189_v30 = vld [vmem:[#allocation4 + $0x40] sm:$0xff]  ;;  %v202_v32 = vld [vmem:[#allocation4 + $0xa8] sm:$0xff] }
  0x66   :  { %4422 = vmatprep.subr.bf16.mxu0 %v5812_v48  ;;  %v4383_v33 = vpack.c.bf16 %v189_v30, %v183_v29  ;;  %v195_v38 = vld [vmem:[#allocation4 + $0x70] sm:$0xff]  ;;  %v201_v40 = vld [vmem:[#allocation4 + $0xa0] sm:$0xff]  ;;  %v186_v44 = vld [vmem:[#allocation4 + $0x28] sm:$0xff] }
  0x67   :  { %v192_v45 = vld [vmem:[#allocation4 + $0x58] sm:$0xff]  ;;  %v4387_v51 = vpack.c.bf16 %v201_v40, %v195_v38  ;;  %v185_v55 = vld [vmem:[#allocation4 + $0x20] sm:$0xff]  ;;  %v191_v58 = vld [vmem:[#allocation4 + $0x50] sm:$0xff] }
  0x68   :  { %v4389_v52 = vpack.c.bf16 %v192_v45, %v186_v44  ;;  %v198_v61 = vld [vmem:[#allocation4 + $0x88] sm:$0xff]  ;;  %v204_v62 = vld [vmem:[#allocation4 + $0xb8] sm:$0xff]  ;;  %v4391_v63 = vpack.c.bf16 %v191_v58, %v185_v55  ;;  %v203_v12 = vld [vmem:[#allocation4 + $0xb0] sm:$0xff] }
  0x69   :  { %4424 = vmatpush1.bf16.msra.mxu0 %v5815_v53  ;;  %v471_v29 = vld [vmem:[#allocation7 + $0x58] sm:$0xff]  ;;  %v489_v44 = vld [vmem:[#allocation7 + $0xe8] sm:$0xff]  ;;  %v498_v55 = vld [vmem:[#allocation7 + $0x130] sm:$0xff] }
  0x6a   :  { %4426 = vmatprep.subr.bf16.mxu0 %v5818_v54  ;;  %v483_v38 = vld [vmem:[#allocation7 + $0xb8] sm:$0xff]  ;;  %v501_v58 = vld [vmem:[#allocation7 + $0x148] sm:$0xff] }
  0x6d   :  { %4428 = vmatpush1.bf16.msra.mxu0 %v5821_v59 }
  0x6e   :  { %4454 = vmatprep.subr.bf16.mxu0 %v5824_v60 }
  0x70   :  { %644 = vmatmul.mubr.f32.vlgmr.msra.gmra.mrb[0].mxu0 %v5830_v3 }
  0x71   :  { %4456 = vmatpush1.bf16.msra.mxu0 %v5832_v4  ;;  %800 = vmatprep.mubr.f32.mxu0 %v6654_v2 }
  0x72   :  { %4458 = vmatprep.subr.bf16.mxu0 %v5835_v5 }
  0x75   :  { %4460 = vmatpush1.bf16.msra.mxu0 %v5839_v8 }
  0x76   :  { %4462 = vmatprep.subr.bf16.mxu0 %v5847_v35 }
  0x79   :  { %4464 = vmatpush1.bf16.msra.mxu0 %v5849_v39 }
  0x7a   :  { %4466 = vmatprep.subr.bf16.mxu0 %v5853_v46 }
  0x7d   :  { %4468 = vmatpush1.bf16.msra.mxu0 %v5855_v49 }
  0x7e   :  { %4470 = vmatprep.subr.bf16.mxu0 %v5859_v56 }
  0x81   :  { %4472 = vmatpush1.bf16.msra.mxu0 %v5861_v57 }
  0x82   :  { %4474 = vmatprep.subr.bf16.mxu0 %v5865_v0 }
  0x85   :  { %4476 = vmatpush1.bf16.msra.mxu0 %v5867_v6 }
  0xcc   :  { %v101_v18 = vpop.permute.xlu0 %100 }
  0xcd   :  { %vm102_vm2 = vcmp.eq.s32.totalorder %v98_v11, %v101_v18  ;;  %v549_v11 = vld [vmem:[#allocation9 + $0x140] sm:$0xff]  ;;  %v552_v18 = vld [vmem:[#allocation9 + $0x158] sm:$0xff] }
  0xce   :  { %v3455_v25 = vsel %vm102_vm2, 1.0, %v6654_v2  ;;  %v5871_v16 = vpack.c.bf16 %v549_v11, %v546_v7  ;;  %v4393_v7 = vpack.c.bf16 %v204_v62, %v198_v61  ;;  %v197_v11 = vld [vmem:[#allocation4 + $0x80] sm:$0xff]  ;;  %v5938_v61 = vpack.c.bf16 %v501_v58, %v498_v55  ;;  %v544_v58 = vld [vmem:[#allocation9 + $0x118] sm:$0xff] }
  0xcf   :  { %3808 = vmatmul.mubr.msk.f32.vlgmr.msra.gmra.mrb[0].mxu1 %vm107_vm1, %v3455_v25  ;;  %v4395_v13 = vpack.c.bf16 %v203_v12, %v197_v11  ;;  %v504_v62 = vld [vmem:[#allocation7 + $0x160] sm:$0xff]  ;;  %v511_v11 = vld [vmem:[#allocation9 + $0x10] sm:$0xff]  ;;  %v514_v12 = vld [vmem:[#allocation9 + $0x28] sm:$0xff] }
  0xd0   :  { %4376 = vmatpush1.bf16.msra.mxu1 %v4375_v19  ;;  %305 = vmatprep.mubr.f32.mxu1 %v6654_v2  ;;  %v555_v19 = vld [vmem:[#allocation9 + $0x170] sm:$0xff]  ;;  %6702 = vst [vmem:[#allocation29_spill] sm:$0xff] %v5938_v61  ;;  %v541_v55 = vld [vmem:[#allocation9 + $0x100] sm:$0xff] }
  0xd1   :  { %4378 = vmatprep.subr.bf16.mxu1 %v4377_v22  ;;  %4478 = vmatprep.subr.bf16.mxu0 %v5871_v16  ;;  %v551_v22 = vld [vmem:[#allocation9 + $0x150] sm:$0xff]  ;;  %v5877_v24 = vpack.c.bf16 %v555_v19, %v552_v18  ;;  %v465_v19 = vld [vmem:[#allocation7 + $0x28] sm:$0xff] }
  0xd2   :  { %4480 = vmatpush1.bf16.msra.mxu0 %v5873_v17  ;;  %v5879_v25 = vpack.c.bf16 %v554_v23, %v551_v22  ;;  %v462_v18 = vld [vmem:[#allocation7 + $0x10] sm:$0xff]  ;;  %v468_v23 = vld [vmem:[#allocation7 + $0x40] sm:$0xff] }
  0xd3   :  { %4482 = vmatprep.subr.bf16.mxu0 %v5877_v24  ;;  %v5911_v22 = vpack.c.bf16 %v465_v19, %v462_v18  ;;  %v5916_v30 = vpack.c.bf16 %v471_v29, %v468_v23  ;;  %v517_v18 = vld [vmem:[#allocation9 + $0x40] sm:$0xff]  ;;  %v520_v19 = vld [vmem:[#allocation9 + $0x58] sm:$0xff]  ;;  %v523_v29 = vld [vmem:[#allocation9 + $0x70] sm:$0xff] }
  0xd4   :  { %4380 = vmatpush1.bf16.msra.mxu1 %v4379_v28  ;;  %v5886_v28 = vld [vmem:[%s6651_s10 + $0x1] sm:$0x1]  ;;  %v5951_v23 = vpack.c.bf16 %v520_v19, %v517_v18  ;;  %v556_v19 = vld [vmem:[#allocation9 + $0x178] sm:$0xff] }
  0xd5   :  { %4382 = vmatprep.subr.bf16.mxu1 %v4381_v31  ;;  %v196_v31 = vld [vmem:[#allocation4 + $0x78] sm:$0xff]  ;;  %v553_v18 = vld [vmem:[#allocation9 + $0x160] sm:$0xff] }
  0xd6   :  { %4484 = vmatpush1.bf16.msra.mxu0 %v5879_v25  ;;  %v4385_v37 = vpack.c.bf16 %v202_v32, %v196_v31  ;;  %v474_v31 = vld [vmem:[#allocation7 + $0x70] sm:$0xff]  ;;  %v477_v32 = vld [vmem:[#allocation7 + $0x88] sm:$0xff] }
  0xd7   :  { %4510 = vmatprep.subr.bf16.mxu0 %v5777_v10 }
  0xd9   :  { %801 = vmatmul.mubr.f32.vlgmr.msra.gmra.mrb[2].mxu0 %v5886_v28 }
  0xda   :  { %4512 = vmatpush1.bf16.msra.mxu0 %v5779_v14  ;;  %999 = vmatprep.mubr.f32.mxu0 %v6654_v2 }
  0xdb   :  { %4514 = vmatprep.subr.bf16.mxu0 %v5781_v15 }
  0xde   :  { %4516 = vmatpush1.bf16.msra.mxu0 %v5785_v20 }
  0xdf   :  { %4518 = vmatprep.subr.bf16.mxu0 %v5788_v21 }
  0xe2   :  { %4520 = vmatpush1.bf16.msra.mxu0 %v5791_v26 }
  0xe3   :  { %4522 = vmatprep.subr.bf16.mxu0 %v5794_v27 }
  0xe6   :  { %4524 = vmatpush1.bf16.msra.mxu0 %v5797_v34 }
  0xe7   :  { %4526 = vmatprep.subr.bf16.mxu0 %v5800_v36 }
  0xea   :  { %4528 = vmatpush1.bf16.msra.mxu0 %v5803_v41 }
  0xeb   :  { %4530 = vmatprep.subr.bf16.mxu0 %v5806_v42 }
  0xee   :  { %4532 = vmatpush1.bf16.msra.mxu0 %v5809_v47 }
  0xef   :  { %4534 = vmatprep.subr.bf16.mxu0 %v5812_v48 }
  0xf2   :  { %4536 = vmatpush1.bf16.msra.mxu0 %v5815_v53 }
  0xf3   :  { %4538 = vmatprep.subr.bf16.mxu0 %v5818_v54 }
  0xf6   :  { %4540 = vmatpush1.bf16.msra.mxu0 %v5821_v59 }
  0xf7   :  { %4566 = vmatprep.subr.bf16.mxu0 %v5824_v60 }
 0x1a2   :  { %v177_v43 = vpop.f32.mrb[0].mxu1 }
 0x1a3   :  { %v3809_v50 = vpop.f32.mrb[1].mxu1  ;;  %3457 = vmatmul.mubr.msk.f32.vlgmr.msra.gmra.mrb[2].mxu1 %vm237_vm3, %v177_v43 }
 0x1a4   :  { %4384 = vmatpush1.bf16.msra.mxu1 %v4383_v33  ;;  %376 = vmatprep.mubr.f32.mxu1 %v6654_v2  ;;  %v5922_v33 = vpack.c.bf16 %v477_v32, %v474_v31  ;;  %v492_v50 = vld [vmem:[#allocation7 + $0x100] sm:$0xff]  ;;  %v526_v31 = vld [vmem:[#allocation9 + $0x88] sm:$0xff] }
 0x1a5   :  { %4386 = vmatprep.subr.bf16.mxu1 %v4385_v37  ;;  %v480_v37 = vld [vmem:[#allocation7 + $0xa0] sm:$0xff]  ;;  %v5957_v32 = vpack.c.bf16 %v526_v31, %v523_v29  ;;  %v5977_v29 = vpack.c.bf16 %v556_v19, %v553_v18  ;;  %v645_v31 = vpop.f32.mrb[0].mxu0 }
 0x1a6   :  { %v5926_v40 = vpack.c.bf16 %v483_v38, %v480_v37  ;;  %v529_v37 = vld [vmem:[#allocation9 + $0xa0] sm:$0xff]  ;;  %v532_v38 = vld [vmem:[#allocation9 + $0xb8] sm:$0xff] }
 0x1a8   :  { %4388 = vmatpush1.bf16.msra.mxu1 %v4387_v51  ;;  %6699 = vst [vmem:[#allocation26_spill] sm:$0xff] %v5926_v40  ;;  %v495_v51 = vld [vmem:[#allocation7 + $0x118] sm:$0xff] }
 0x1a9   :  { %4390 = vmatprep.subr.bf16.mxu1 %v4389_v52  ;;  %v5934_v52 = vpack.c.bf16 %v495_v51, %v492_v50  ;;  %v538_v50 = vld [vmem:[#allocation9 + $0xe8] sm:$0xff] }
 0x1ab   :  { %3458 = vmatmul.mubr.msk.f32.vlgmr.msra.gmra.mrb[4].mxu1 %vm237_vm3, %v177_v43  ;;  %6701 = vst [vmem:[#allocation28_spill] sm:$0xff] %v5934_v52 }
 0x1ac   :  { %4392 = vmatpush1.bf16.msra.mxu1 %v4391_v63  ;;  %447 = vmatprep.mubr.f32.mxu1 %v6654_v2  ;;  %v507_v63 = vld [vmem:[#allocation7 + $0x178] sm:$0xff] }
 0x1ad   :  { %4394 = vmatprep.subr.bf16.mxu1 %v4393_v7  ;;  %v5942_v7 = vpack.c.bf16 %v507_v63, %v504_v62  ;;  %v5969_v62 = vpack.c.bf16 %v544_v58, %v541_v55  ;;  %v547_v63 = vld [vmem:[#allocation9 + $0x130] sm:$0xff]  ;;  %v205_v58 = vld [vmem:[%s6644_s3] sm:$0x3f] }
 0x1af   :  { %6703 = vst [vmem:[#allocation30_spill] sm:$0xff] %v5942_v7 }
 0x1b0   :  { %4396 = vmatpush1.bf16.msra.mxu1 %v4395_v13  ;;  %v5946_v13 = vpack.c.bf16 %v514_v12, %v511_v11  ;;  %v550_v11 = vld [vmem:[#allocation9 + $0x148] sm:$0xff] }
 0x1b1   :  { %4429 = vmatprep.subr.bf16.mxu1 %v6664_v1  ;;  %v5973_v12 = vpack.c.bf16 %v550_v11, %v547_v63 }
 0x1b3   :  { %3459 = vmatmul.mubr.msk.f32.vlgmr.msra.gmra.mrb[6].mxu1 %vm237_vm3, %v177_v43  ;;  %v486_v43 = vld [vmem:[#allocation7 + $0xd0] sm:$0xff] }
 0x1b4   :  { %4431 = vmatpush3.bf16.msra.mxu1 %v5911_v22  ;;  %3842 = vmatprep.mubr.msk.f32.mxu1 %vm5636_vm0, %v6654_v2  ;;  %v5930_v45 = vpack.c.bf16 %v489_v44, %v486_v43  ;;  %v5961_v43 = vpack.c.bf16 %v532_v38, %v529_v37  ;;  %v535_v44 = vld [vmem:[#allocation9 + $0xd0] sm:$0xff]  ;;  %v647_v37 = vpop.f32.mrb[1].mxu0 }
 0x1b5   :  { %4432 = vmatprep.subr.bf16.mxu1 %v6664_v1  ;;  %v5965_v51 = vpack.c.bf16 %v538_v50, %v535_v44  ;;  %v802_v38 = vpop.f32.mrb[2].mxu0  ;;  %v208_v50 = vshrl.u32 %v97_v9, 7 }
 0x1b6   :  { %6700 = vst [vmem:[#allocation27_spill] sm:$0xff] %v5930_v45  ;;  %v6000_v44 = vpop.f32.mrb[3].mxu0 }
 0x1b7   :  { %v209_v55 = vsub.s32 0, %v208_v50  ;;  %v213_v63 = vsub.s32 1, %v208_v50  ;;  %v6007_v59 = vsub.s32 2, %v208_v50  ;;  %v221_v54 = vsub.s32 3, %v208_v50 }
 0x1b8   :  { %4434 = vmatpush3.bf16.msra.mxu1 %v5916_v30  ;;  %v225_v47 = vsub.s32 4, %v208_v50 }
 0x1b9   :  { %4435 = vmatprep.subr.bf16.mxu1 %v6664_v1  ;;  %v210_v11 = vrot.slane %v205_v58, %v209_v55  ;;  %v214_v18 = vrot.slane %v205_v58, %v213_v63  ;;  %v222_v9 = vrot.slane %v205_v58, %v221_v54 }
 0x1bc   :  { %4437 = vmatpush3.bf16.msra.mxu1 %v5922_v33 }
 0x1bd   :  { %4438 = vmatprep.subr.bf16.mxu1 %v6664_v1 }
 0x1c0   :  { %4440 = vmatpush3.bf16.msra.mxu1 %v5926_v40 }
 0x1c1   :  { %4441 = vmatprep.subr.bf16.mxu1 %v6664_v1 }
 0x1c4   :  { %4443 = vmatpush3.bf16.msra.mxu1 %v5930_v45 }
 0x1c5   :  { %4444 = vmatprep.subr.bf16.mxu1 %v6664_v1 }
 0x1c8   :  { %4446 = vmatpush3.bf16.msra.mxu1 %v5934_v52 }
 0x1c9   :  { %4447 = vmatprep.subr.bf16.mxu1 %v6664_v1 }
 0x1cc   :  { %4449 = vmatpush3.bf16.msra.mxu1 %v5938_v61 }
 0x1cd   :  { %4450 = vmatprep.subr.bf16.mxu1 %v6664_v1 }
 0x1d0   :  { %4452 = vmatpush3.bf16.msra.mxu1 %v5942_v7 }
 0x1d1   :  { %4485 = vmatprep.subr.bf16.mxu1 %v6664_v1 }
 0x1d3   :  { %3843 = vmatmul.mubr.f32.vlgmr.msra.gmra.mrb[8].mxu1 %v5830_v3 }
 0x1d4   :  { %4487 = vmatpush3.bf16.msra.mxu1 %v5946_v13  ;;  %3877 = vmatprep.mubr.msk.f32.mxu1 %vm5636_vm0, %v6654_v2 }
 0x1d5   :  { %4488 = vmatprep.subr.bf16.mxu1 %v6664_v1 }
 0x1d8   :  { %4490 = vmatpush3.bf16.msra.mxu1 %v5951_v23 }
 0x1d9   :  { %4491 = vmatprep.subr.bf16.mxu1 %v6664_v1 }
 0x1dc   :  { %4493 = vmatpush3.bf16.msra.mxu1 %v5957_v32 }
 0x1dd   :  { %4494 = vmatprep.subr.bf16.mxu1 %v6664_v1 }
 0x1e0   :  { %4496 = vmatpush3.bf16.msra.mxu1 %v5961_v43 }
 0x1e1   :  { %4497 = vmatprep.subr.bf16.mxu1 %v6664_v1 }
 0x1e4   :  { %4499 = vmatpush3.bf16.msra.mxu1 %v5965_v51 }
 0x1e5   :  { %4500 = vmatprep.subr.bf16.mxu1 %v6664_v1 }
 0x1e8   :  { %4502 = vmatpush3.bf16.msra.mxu1 %v5969_v62 }
 0x1e9   :  { %4503 = vmatprep.subr.bf16.mxu1 %v6664_v1 }
 0x1ec   :  { %4505 = vmatpush3.bf16.msra.mxu1 %v5973_v12 }
 0x1ed   :  { %4506 = vmatprep.subr.bf16.mxu1 %v6664_v1 }
 0x1f0   :  { %4508 = vmatpush3.bf16.msra.mxu1 %v5977_v29 }
 0x1f1   :  { %4541 = vmatprep.subr.bf16.mxu1 %v6664_v1 }
 0x1f3   :  { %3878 = vmatmul.mubr.f32.vlgmr.msra.gmra.mrb[10].mxu1 %v5886_v28 }
 0x1f4   :  { %4543 = vmatpush3.bf16.msra.mxu1 %v5911_v22  ;;  %3912 = vmatprep.mubr.msk.f32.mxu1 %vm5636_vm0, %v6654_v2 }
 0x1f5   :  { %4544 = vmatprep.subr.bf16.mxu1 %v6664_v1 }
 0x1f8   :  { %4546 = vmatpush3.bf16.msra.mxu1 %v5916_v30 }
 0x1f9   :  { %4547 = vmatprep.subr.bf16.mxu1 %v6664_v1 }
 0x1fc   :  { %4549 = vmatpush3.bf16.msra.mxu1 %v5922_v33 }
 0x1fd   :  { %4550 = vmatprep.subr.bf16.mxu1 %v6664_v1 }
 0x200   :  { %4552 = vmatpush3.bf16.msra.mxu1 %v5926_v40 }
 0x201   :  { %4553 = vmatprep.subr.bf16.mxu1 %v6664_v1 }
 0x204   :  { %4555 = vmatpush3.bf16.msra.mxu1 %v5930_v45 }
 0x205   :  { %4556 = vmatprep.subr.bf16.mxu1 %v6664_v1 }
 0x208   :  { %4558 = vmatpush3.bf16.msra.mxu1 %v5934_v52 }
 0x209   :  { %4559 = vmatprep.subr.bf16.mxu1 %v6664_v1 }
 0x20c   :  { %4561 = vmatpush3.bf16.msra.mxu1 %v5938_v61  ;;  %v508_v61 = vld [vmem:[%s6646_s5] sm:$0x7] }
 0x20d   :  { %4562 = vmatprep.subr.bf16.mxu1 %v6664_v1  ;;  %v6016_v41 = vrot.slane %v508_v61, %v213_v63 }
 0x20f   :  { %6705 = vst [vmem:[#allocation32_spill] sm:$0xff] %v6016_v41 }
 0x210   :  { %4564 = vmatpush3.bf16.msra.mxu1 %v5942_v7 }
 0x211   :  { %4597 = vmatprep.subr.bf16.mxu1 %v6664_v1  ;;  %v218_v1 = vrot.slane %v205_v58, %v6007_v59 }
 0x276   :  { %v307_v19 = vpop.f32.mrb[2].mxu1 }
 0x277   :  { %v308_v2 = vadd.f32 %v307_v19, %v210_v11  ;;  %v309_v60 = vpop.f32.mrb[3].mxu1  ;;  %v229_v11 = vsub.s32 5, %v208_v50  ;;  %v6013_v19 = vrot.slane %v508_v61, %v209_v55 }
 0x278   :  { %v310_v7 = vadd.f32 %v309_v60, %v214_v18  ;;  %v226_v60 = vrot.slane %v205_v58, %v225_v47 }
 0x279   :  { %454 = vst [vmem:[#allocation2] sm:$0xff] %v308_v2  ;;  %6704 = vst [vmem:[#allocation31_spill] sm:$0xff] %v6013_v19  ;;  %v230_v2 = vrot.slane %v205_v58, %v229_v11 }
 0x27a   :  { %455 = vst [vmem:[#allocation2 + $0x8] sm:$0xff] %v310_v7  ;;  %v646_v7 = vadd.f32 %v645_v31, %v6013_v19  ;;  %v557_v31 = vld [vmem:[%s6648_s7] sm:$0x7] }
 0x27e   :  { %v378_v53 = vpop.f32.mrb[4].mxu1 }
 0x27f   :  { %v379_v48 = vadd.f32 %v378_v53, %v218_v1  ;;  %v380_v52 = vpop.f32.mrb[5].mxu1 }
 0x280   :  { %v381_v42 = vadd.f32 %v380_v52, %v222_v9  ;;  %v648_v52 = vadd.f32 %v647_v37, %v6016_v41  ;;  %v6022_v9 = vrot.slane %v557_v31, %v209_v55  ;;  %v6028_v37 = vrot.slane %v508_v61, %v6007_v59 }
 0x281   :  { %456 = vst [vmem:[#allocation2 + $0x10] sm:$0xff] %v379_v48 }
 0x282   :  { %457 = vst [vmem:[#allocation2 + $0x18] sm:$0xff] %v381_v42 }
 0x286   :  { %v449_v18 = vpop.f32.mrb[6].mxu1 }
 0x287   :  { %v450_v54 = vadd.f32 %v449_v18, %v226_v60  ;;  %v451_v45 = vpop.f32.mrb[7].mxu1 }
 0x288   :  { %v560_v36 = vld [vmem:[#allocation2] ss:$8 sm:$0x7]  ;;  %v452_v40 = vadd.f32 %v451_v45, %v230_v2  ;;  %v803_v45 = vadd.f32 %v802_v38, %v6022_v9 }
 0x289   :  { %458 = vst [vmem:[#allocation2 + $0x20] sm:$0xff] %v450_v54  ;;  %v877_v1 = vadd.f32 %v646_v7, %v560_v36  ;;  %v885_v50 = vrot.slane %v560_v36, 1  ;;  %v895_v38 = vrot.slane %v560_v36, 2 }
 0x28a   :  { %459 = vst [vmem:[#allocation2 + $0x28] sm:$0xff] %v452_v40 }
 0x28b   :  { %v3460_v53 = vmul.f32 -1.442695, %v877_v1  ;;  %v887_v42 = vadd.f32 %v885_v50, %v648_v52 }
 0x28d   :  { %5341 = vpow2.f32 %v3460_v53  ;;  %v3461_v47 = vmul.f32 -1.442695, %v887_v42  ;;  %v6032_v53 = vrot.slane %v557_v31, %v213_v63 }
 0x28f   :  { %5343 = vpow2.f32 %v3461_v47  ;;  %v805_v61 = vadd.f32 %v6000_v44, %v6032_v53  ;;  %v6706_v44 = vmov 0.0|0.0  }
 0x291   :  { %v6025_v40 = vld [vmem:[#allocation2 + $0x1f] ss:$8 sm:$0x7] }
 0x292   :  { %v903_v60 = vadd.f32 %v803_v45, %v6025_v40  ;;  %v911_v42 = vrot.slane %v6025_v40, 1 }
 0x294   :  { %v3462_v55 = vmul.f32 -1.442695, %v903_v60  ;;  %v913_v47 = vadd.f32 %v911_v42, %v805_v61  ;;  %v921_v42 = vrot.slane %v6025_v40, 2 }
 0x297   :  { %v5342_v48 = vpop.eup %5341 }
 0x298   :  { %v881_v58 = vadd.f32 1.0, %v5342_v48 }
 0x299   :  { %v5344_v11 = vpop.eup %5343 }
 0x29a   :  { %5345 = vrcp.f32 %v881_v58  ;;  %v891_v2 = vadd.f32 1.0, %v5344_v11  ;;  %v3463_v58 = vmul.f32 -1.442695, %v913_v47 }
 0x29c   :  { %5347 = vrcp.f32 %v891_v2 }
 0x29d   :  { %5349 = vpow2.f32 %v3462_v55 }
 0x2a4   :  { %v5346_v1 = vpop.eup %5345 }
 0x2a6   :  { %v716_v7 = vpop.f32.mrb[8].mxu1  ;;  %v5348_v48 = vpop.eup %5347 }
 0x2a7   :  { %v717_v18 = vadd.f32 %v716_v7, %v6028_v37  ;;  %v3844_v54 = vpop.f32.mrb[9].mxu1  ;;  %v5350_v45 = vpop.eup %5349  ;;  %v899_v11 = vsub.f32 1.0, %v5348_v48  ;;  %v901_v60 = vmul.f32 %v5348_v48, %v5830_v3 }
 0x2a8   :  { %v907_v2 = vadd.f32 1.0, %v5350_v45  ;;  %v6055_v54 = vrot.slane %v557_v31, %v6007_v59 }
 0x2a9   :  { %v894_v52 = vmul.f32 %v5346_v1, %v717_v18  ;;  %v6707_v18 = vmov 0.0  }
 0x2ab   :  { %v897_v50 = vadd.f32 %v895_v38, %v894_v52 }
 0x2ad   :  { %5351 = vtanh.f32 %v897_v50 }
 0x2ae   :  { %5353 = vpow2.f32 %v3463_v58 }
 0x2af   :  { %5355 = vrcp.f32 %v907_v2  ;;  %v6713_v2 = vld [vmem:[#allocation20_spill] sm:$0xff] }
 0x2b7   :  { %v5352_v7 = vpop.eup %5351 }
 0x2b8   :  { %v900_v63 = vmul.f32 %v5352_v7, %v899_v11  ;;  %v5354_v3 = vpop.eup %5353  ;;  %v6709_v11 = vld [vmem:[#allocation17_spill] sm:$0xff]  ;;  %v6710_v7 = vld [vmem:[#allocation18_spill] sm:$0xff] }
 0x2b9   :  { %v917_v1 = vadd.f32 1.0, %v5354_v3  ;;  %v5356_v50 = vpop.eup %5355  ;;  %v6714_v3 = vld [vmem:[#allocation28_spill] sm:$0xff] }
 0x2ba   :  { %v6038_v36 = vadd.f32 %v901_v60, %v900_v63  ;;  %v6711_v63 = vld [vmem:[#allocation27_spill] sm:$0xff] }
 0x2bb   :  { %5357 = vrcp.f32 %v917_v1  ;;  %v6712_v60 = vld [vmem:[#allocation19_spill] sm:$0xff]  ;;  %v6715_v1 = vld [vmem:[#allocation21_spill] sm:$0xff] }
 0x2bc   :  { %929 = vst [vmem:[#allocation3] sm:$0x1] %v6038_v36  ;;  %1000 = vmatmul.mubr.f32.vlgmr.msra.gmra.mrb[4].mxu0 %v6038_v36  ;;  %3913 = vmatmul.mubr.f32.vlgmr.msra.gmra.mrb[12].mxu1 %v6038_v36 }
 0x2bd   :  { %4568 = vmatpush1.bf16.msra.mxu0 %v5832_v4  ;;  %4599 = vmatpush3.bf16.msra.mxu1 %v5946_v13 }
 0x2be   :  { %4570 = vmatprep.subr.bf16.mxu0 %v5835_v5  ;;  %4600 = vmatprep.subr.bf16.mxu1 %v6706_v44 }
 0x2bf   :  { %1140 = vmatprep.mubr.f32.mxu0 %v6707_v18  ;;  %3947 = vmatprep.mubr.msk.f32.mxu1 %vm5636_vm0, %v6707_v18 }
 0x2c1   :  { %4572 = vmatpush1.bf16.msra.mxu0 %v5839_v8  ;;  %4602 = vmatpush3.bf16.msra.mxu1 %v5951_v23 }
 0x2c2   :  { %4574 = vmatprep.subr.bf16.mxu0 %v5847_v35  ;;  %4603 = vmatprep.subr.bf16.mxu1 %v6706_v44 }
 0x2c5   :  { %4576 = vmatpush1.bf16.msra.mxu0 %v5849_v39  ;;  %4605 = vmatpush3.bf16.msra.mxu1 %v5957_v32  ;;  %v5358_v31 = vpop.eup %5357 }
 0x2c6   :  { %v873_v55 = vpop.f32.mrb[10].mxu1  ;;  %4578 = vmatprep.subr.bf16.mxu0 %v5853_v46  ;;  %4606 = vmatprep.subr.bf16.mxu1 %v6706_v44  ;;  %v925_v40 = vsub.f32 1.0, %v5358_v31  ;;  %v927_v58 = vmul.f32 %v5358_v31, %v5886_v28  ;;  %v6708_v28 = vld [vmem:[#allocation26_spill] sm:$0xff] }
 0x2c7   :  { %v874_v52 = vadd.f32 %v873_v55, %v6055_v54  ;;  %v3879_v38 = vpop.f32.mrb[11].mxu1  ;;  %v6716_v55 = vld [vmem:[#allocation22_spill] sm:$0xff] }
 0x2c8   :  { %v6718_v38 = vld [vmem:[#allocation23_spill] sm:$0xff] }
 0x2c9   :  { %v920_v61 = vmul.f32 %v5356_v50, %v874_v52  ;;  %4580 = vmatpush1.bf16.msra.mxu0 %v5855_v49  ;;  %4608 = vmatpush3.bf16.msra.mxu1 %v5961_v43  ;;  %v6717_v52 = vld [vmem:[#allocation29_spill] sm:$0xff]  ;;  %v6719_v50 = vld [vmem:[#allocation24_spill] sm:$0xff] }
 0x2ca   :  { %4582 = vmatprep.subr.bf16.mxu0 %v5859_v56  ;;  %4609 = vmatprep.subr.bf16.mxu1 %v6706_v44 }
 0x2cb   :  { %v923_v59 = vadd.f32 %v921_v42, %v920_v61  ;;  %v6720_v61 = vld [vmem:[#allocation30_spill] sm:$0xff]  ;;  %v6721_v42 = vld [vmem:[#allocation25_spill] sm:$0xff] }
 0x2cd   :  { %5359 = vtanh.f32 %v923_v59  ;;  %4584 = vmatpush1.bf16.msra.mxu0 %v5861_v57  ;;  %4611 = vmatpush3.bf16.msra.mxu1 %v5965_v51 }
 0x2ce   :  { %4586 = vmatprep.subr.bf16.mxu0 %v5865_v0  ;;  %4612 = vmatprep.subr.bf16.mxu1 %v6706_v44 }
 0x2d1   :  { %4588 = vmatpush1.bf16.msra.mxu0 %v5867_v6  ;;  %4614 = vmatpush3.bf16.msra.mxu1 %v5969_v62 }
 0x2d2   :  { %4590 = vmatprep.subr.bf16.mxu0 %v5871_v16  ;;  %4615 = vmatprep.subr.bf16.mxu1 %v6706_v44 }
 0x2d5   :  { %4592 = vmatpush1.bf16.msra.mxu0 %v5873_v17  ;;  %4617 = vmatpush3.bf16.msra.mxu1 %v5973_v12 }
 0x2d6   :  { %4594 = vmatprep.subr.bf16.mxu0 %v5877_v24  ;;  %4618 = vmatprep.subr.bf16.mxu1 %v6706_v44 }
 0x2d7   :  { %v5360_v47 = vpop.eup %5359 }
 0x2d8   :  { %v926_v48 = vmul.f32 %v5360_v47, %v925_v40  ;;  %v932_v40 = vld [vmem:[#allocation2 + $0x1] ss:$8 sm:$0x7] }
 0x2d9   :  { %4596 = vmatpush1.bf16.msra.mxu0 %v5879_v25  ;;  %4620 = vmatpush3.bf16.msra.mxu1 %v5977_v29 }
 0x2da   :  { %v6082_v45 = vadd.f32 %v927_v58, %v926_v48  ;;  %4622 = vmatprep.subr.bf16.mxu0 %v5777_v10  ;;  %4653 = vmatprep.subr.bf16.mxu1 %v6706_v44 }
 0x2dc   :  { %930 = vst [vmem:[#allocation3 + $0xf] sm:$0x1] %v6082_v45  ;;  %1141 = vmatmul.mubr.f32.vlgmr.msra.gmra.mrb[6].mxu0 %v6082_v45  ;;  %3948 = vmatmul.mubr.f32.vlgmr.msra.gmra.mrb[14].mxu1 %v6082_v45 }
 0x2dd   :  { %4624 = vmatpush1.bf16.msra.mxu0 %v5779_v14  ;;  %4655 = vmatpush3.bf16.msra.mxu1 %v5911_v22 }
 0x2de   :  { %4626 = vmatprep.subr.bf16.mxu0 %v5781_v15  ;;  %4656 = vmatprep.subr.bf16.mxu1 %v6706_v44 }
 0x2df   :  { %1339 = vmatprep.mubr.f32.mxu0 %v6707_v18  ;;  %3982 = vmatprep.mubr.msk.f32.mxu1 %vm5636_vm0, %v6707_v18 }
 0x2e1   :  { %4628 = vmatpush1.bf16.msra.mxu0 %v5785_v20  ;;  %4658 = vmatpush3.bf16.msra.mxu1 %v5916_v30 }
 0x2e2   :  { %4630 = vmatprep.subr.bf16.mxu0 %v5788_v21  ;;  %4659 = vmatprep.subr.bf16.mxu1 %v6706_v44 }
 0x2e5   :  { %4632 = vmatpush1.bf16.msra.mxu0 %v5791_v26  ;;  %4661 = vmatpush3.bf16.msra.mxu1 %v5922_v33 }
 0x2e6   :  { %4634 = vmatprep.subr.bf16.mxu0 %v5794_v27  ;;  %4662 = vmatprep.subr.bf16.mxu1 %v6706_v44 }
 0x2e9   :  { %4636 = vmatpush1.bf16.msra.mxu0 %v5797_v34  ;;  %4664 = vmatpush3.bf16.msra.mxu1 %v6708_v28 }
 0x2ea   :  { %4638 = vmatprep.subr.bf16.mxu0 %v6709_v11  ;;  %4665 = vmatprep.subr.bf16.mxu1 %v6706_v44 }
 0x2ed   :  { %4640 = vmatpush1.bf16.msra.mxu0 %v6710_v7  ;;  %4667 = vmatpush3.bf16.msra.mxu1 %v6711_v63 }
 0x2ee   :  { %4642 = vmatprep.subr.bf16.mxu0 %v6712_v60  ;;  %4668 = vmatprep.subr.bf16.mxu1 %v6706_v44 }
 0x2f1   :  { %4644 = vmatpush1.bf16.msra.mxu0 %v6713_v2  ;;  %4670 = vmatpush3.bf16.msra.mxu1 %v6714_v3 }
 0x2f2   :  { %4646 = vmatprep.subr.bf16.mxu0 %v6715_v1  ;;  %4671 = vmatprep.subr.bf16.mxu1 %v6706_v44 }
 0x2f5   :  { %4648 = vmatpush1.bf16.msra.mxu0 %v6716_v55  ;;  %4673 = vmatpush3.bf16.msra.mxu1 %v6717_v52  ;;  %v1225_v55 = vrot.slane %v932_v40, 1 }
 0x2f6   :  { %4650 = vmatprep.subr.bf16.mxu0 %v6718_v38  ;;  %4674 = vmatprep.subr.bf16.mxu1 %v6706_v44 }
 0x2f9   :  { %4652 = vmatpush1.bf16.msra.mxu0 %v6719_v50  ;;  %4676 = vmatpush3.bf16.msra.mxu1 %v6720_v61 }
 0x2fa   :  { %4678 = vmatprep.subr.bf16.mxu0 %v6721_v42  ;;  %4709 = vmatprep.subr.bf16.mxu1 %v6706_v44 }
 0x38f   :  { %v1001_v59 = vpop.f32.mrb[4].mxu0  ;;  %v1072_v31 = vpop.f32.mrb[12].mxu1 }
 0x390   :  { %v1002_v47 = vadd.f32 %v1001_v59, %v6013_v19  ;;  %v1003_v48 = vpop.f32.mrb[5].mxu0  ;;  %v3914_v58 = vpop.f32.mrb[13].mxu1  ;;  %v1073_v63 = vadd.f32 %v1072_v31, %v6028_v37  ;;  %v1235_v19 = vrot.slane %v932_v40, 2 }
 0x391   :  { %v1004_v52 = vadd.f32 %v1003_v48, %v6016_v41  ;;  %v934_v41 = vld [vmem:[#allocation2 + $0x1e] ss:$8 sm:$0x7] }
 0x392   :  { %v1217_v38 = vadd.f32 %v1002_v47, %v932_v40 }
 0x393   :  { %v1227_v3 = vadd.f32 %v1225_v55, %v1004_v52 }
 0x394   :  { %v3464_v1 = vmul.f32 -1.442695, %v1217_v38 }
 0x395   :  { %v3465_v50 = vmul.f32 -1.442695, %v1227_v3 }
 0x396   :  { %5361 = vpow2.f32 %v3464_v1 }
 0x397   :  { %5363 = vpow2.f32 %v3465_v50  ;;  %v1251_v50 = vrot.slane %v934_v41, 1 }
 0x3a0   :  { %v5362_v61 = vpop.eup %5361 }
 0x3a1   :  { %v1221_v42 = vadd.f32 1.0, %v5362_v61  ;;  %v5364_v2 = vpop.eup %5363 }
 0x3a2   :  { %v1231_v60 = vadd.f32 1.0, %v5364_v2 }
 0x3a3   :  { %5365 = vrcp.f32 %v1221_v42 }
 0x3a4   :  { %5367 = vrcp.f32 %v1231_v60 }
 0x3ad   :  { %v5366_v7 = vpop.eup %5365 }
 0x3ae   :  { %v1234_v59 = vmul.f32 %v5366_v7, %v1073_v63  ;;  %v5368_v42 = vpop.eup %5367 }
 0x3af   :  { %v1142_v58 = vpop.f32.mrb[6].mxu0  ;;  %v1213_v48 = vpop.f32.mrb[14].mxu1  ;;  %v1239_v63 = vsub.f32 1.0, %v5368_v42 }
 0x3b0   :  { %v1237_v47 = vadd.f32 %v1235_v19, %v1234_v59  ;;  %v1143_v55 = vadd.f32 %v1142_v58, %v6022_v9  ;;  %v1144_v1 = vpop.f32.mrb[7].mxu0  ;;  %v3949_v3 = vpop.f32.mrb[15].mxu1  ;;  %v1241_v19 = vmul.f32 %v5368_v42, %v6038_v36 }
 0x3b1   :  { %v1145_v52 = vadd.f32 %v1144_v1, %v6032_v53 }
 0x3b2   :  { %5369 = vtanh.f32 %v1237_v47  ;;  %v1243_v38 = vadd.f32 %v1143_v55, %v934_v41  ;;  %v1214_v55 = vadd.f32 %v1213_v48, %v6055_v54 }
 0x3b3   :  { %v1253_v61 = vadd.f32 %v1251_v50, %v1145_v52  ;;  %v1261_v52 = vrot.slane %v934_v41, 2 }
 0x3b4   :  { %v3466_v2 = vmul.f32 -1.442695, %v1243_v38 }
 0x3b5   :  { %v3467_v7 = vmul.f32 -1.442695, %v1253_v61 }
 0x3b6   :  { %5371 = vpow2.f32 %v3466_v2 }
 0x3b7   :  { %5373 = vpow2.f32 %v3467_v7  ;;  %v6723_v7 = vld [vmem:[#allocation27_spill] sm:$0xff] }
 0x3bc   :  { %v5370_v60 = vpop.eup %5369 }
 0x3bd   :  { %v1240_v31 = vmul.f32 %v5370_v60, %v1239_v63  ;;  %v6724_v63 = vld [vmem:[#allocation19_spill] sm:$0xff]  ;;  %v6725_v60 = vld [vmem:[#allocation20_spill] sm:$0xff] }
 0x3bf   :  { %v6130_v40 = vadd.f32 %v1241_v19, %v1240_v31  ;;  %v6726_v31 = vld [vmem:[#allocation28_spill] sm:$0xff]  ;;  %v6727_v19 = vld [vmem:[#allocation21_spill] sm:$0xff] }
 0x3c0   :  { %v5372_v59 = vpop.eup %5371 }
 0x3c1   :  { %v1247_v58 = vadd.f32 1.0, %v5372_v59  ;;  %1269 = vst [vmem:[#allocation3 + $0x1] sm:$0x1] %v6130_v40  ;;  %1340 = vmatmul.mubr.f32.vlgmr.msra.gmra.mrb[8].mxu0 %v6130_v40  ;;  %3983 = vmatmul.mubr.f32.vlgmr.msra.gmra.mrb[16].mxu1 %v6130_v40  ;;  %v5374_v36 = vpop.eup %5373  ;;  %v6728_v59 = vld [vmem:[#allocation22_spill] sm:$0xff] }
 0x3c2   :  { %4680 = vmatpush1.bf16.msra.mxu0 %v5832_v4  ;;  %4711 = vmatpush3.bf16.msra.mxu1 %v5946_v13  ;;  %v1257_v47 = vadd.f32 1.0, %v5374_v36  ;;  %v6730_v36 = vld [vmem:[#allocation23_spill] sm:$0xff] }
 0x3c3   :  { %5375 = vrcp.f32 %v1247_v58  ;;  %4682 = vmatprep.subr.bf16.mxu0 %v5835_v5  ;;  %4712 = vmatprep.subr.bf16.mxu1 %v6706_v44  ;;  %v6729_v58 = vld [vmem:[#allocation29_spill] sm:$0xff] }
 0x3c4   :  { %1480 = vmatprep.mubr.f32.mxu0 %v6707_v18  ;;  %4017 = vmatprep.mubr.msk.f32.mxu1 %vm5636_vm0, %v6707_v18  ;;  %5377 = vrcp.f32 %v1257_v47  ;;  %v6731_v47 = vld [vmem:[#allocation24_spill] sm:$0xff] }
 0x3c6   :  { %4684 = vmatpush1.bf16.msra.mxu0 %v5839_v8  ;;  %4714 = vmatpush3.bf16.msra.mxu1 %v5951_v23 }
 0x3c7   :  { %4686 = vmatprep.subr.bf16.mxu0 %v5847_v35  ;;  %4715 = vmatprep.subr.bf16.mxu1 %v6706_v44 }
 0x3ca   :  { %4688 = vmatpush1.bf16.msra.mxu0 %v5849_v39  ;;  %4717 = vmatpush3.bf16.msra.mxu1 %v5957_v32 }
 0x3cb   :  { %4690 = vmatprep.subr.bf16.mxu0 %v5853_v46  ;;  %4718 = vmatprep.subr.bf16.mxu1 %v6706_v44 }
 0x3cd   :  { %v5376_v1 = vpop.eup %5375 }
 0x3ce   :  { %v1260_v3 = vmul.f32 %v5376_v1, %v1214_v55  ;;  %4692 = vmatpush1.bf16.msra.mxu0 %v5855_v49  ;;  %4720 = vmatpush3.bf16.msra.mxu1 %v5961_v43  ;;  %v5378_v41 = vpop.eup %5377  ;;  %v6732_v55 = vld [vmem:[#allocation30_spill] sm:$0xff]  ;;  %v6733_v1 = vld [vmem:[#allocation25_spill] sm:$0xff] }
 0x3cf   :  { %4694 = vmatprep.subr.bf16.mxu0 %v5859_v56  ;;  %4721 = vmatprep.subr.bf16.mxu1 %v6706_v44  ;;  %v1265_v48 = vsub.f32 1.0, %v5378_v41  ;;  %v1267_v61 = vmul.f32 %v5378_v41, %v6082_v45  ;;  %v6722_v45 = vld [vmem:[#allocation18_spill] sm:$0xff]  ;;  %v6734_v41 = vld [vmem:[#allocation31_spill] sm:$0xff] }
 0x3d0   :  { %v1263_v38 = vadd.f32 %v1261_v52, %v1260_v3 }
 0x3d2   :  { %5379 = vtanh.f32 %v1263_v38  ;;  %4696 = vmatpush1.bf16.msra.mxu0 %v5861_v57  ;;  %4723 = vmatpush3.bf16.msra.mxu1 %v5965_v51  ;;  %v1272_v38 = vld [vmem:[#allocation2 + $0x2] ss:$8 sm:$0x7] }
 0x3d3   :  { %4698 = vmatprep.subr.bf16.mxu0 %v5865_v0  ;;  %4724 = vmatprep.subr.bf16.mxu1 %v6706_v44 }
 0x3d6   :  { %4700 = vmatpush1.bf16.msra.mxu0 %v5867_v6  ;;  %4726 = vmatpush3.bf16.msra.mxu1 %v5969_v62 }
 0x3d7   :  { %4702 = vmatprep.subr.bf16.mxu0 %v5871_v16  ;;  %4727 = vmatprep.subr.bf16.mxu1 %v6706_v44 }
 0x3da   :  { %4704 = vmatpush1.bf16.msra.mxu0 %v5873_v17  ;;  %4729 = vmatpush3.bf16.msra.mxu1 %v5973_v12 }
 0x3db   :  { %4706 = vmatprep.subr.bf16.mxu0 %v5877_v24  ;;  %4730 = vmatprep.subr.bf16.mxu1 %v6706_v44 }
 0x3dc   :  { %v5380_v50 = vpop.eup %5379 }
 0x3dd   :  { %v1266_v2 = vmul.f32 %v5380_v50, %v1265_v48 }
 0x3de   :  { %4708 = vmatpush1.bf16.msra.mxu0 %v5879_v25  ;;  %4732 = vmatpush3.bf16.msra.mxu1 %v5977_v29 }
 0x3df   :  { %v6170_v42 = vadd.f32 %v1267_v61, %v1266_v2  ;;  %4734 = vmatprep.subr.bf16.mxu0 %v5777_v10  ;;  %4765 = vmatprep.subr.bf16.mxu1 %v6706_v44  ;;  %v6735_v61 = vld [vmem:[#allocation32_spill] sm:$0xff] }
 0x3e1   :  { %1270 = vst [vmem:[#allocation3 + $0xe] sm:$0x1] %v6170_v42  ;;  %1481 = vmatmul.mubr.f32.vlgmr.msra.gmra.mrb[10].mxu0 %v6170_v42  ;;  %4018 = vmatmul.mubr.f32.vlgmr.msra.gmra.mrb[18].mxu1 %v6170_v42 }
 0x3e2   :  { %4736 = vmatpush1.bf16.msra.mxu0 %v5779_v14  ;;  %4767 = vmatpush3.bf16.msra.mxu1 %v5911_v22 }
 0x3e3   :  { %4738 = vmatprep.subr.bf16.mxu0 %v5781_v15  ;;  %4768 = vmatprep.subr.bf16.mxu1 %v6706_v44 }
 0x3e4   :  { %1679 = vmatprep.mubr.f32.mxu0 %v6707_v18  ;;  %4052 = vmatprep.mubr.msk.f32.mxu1 %vm5636_vm0, %v6707_v18 }
 0x3e6   :  { %4740 = vmatpush1.bf16.msra.mxu0 %v5785_v20  ;;  %4770 = vmatpush3.bf16.msra.mxu1 %v5916_v30 }
 0x3e7   :  { %4742 = vmatprep.subr.bf16.mxu0 %v5788_v21  ;;  %4771 = vmatprep.subr.bf16.mxu1 %v6706_v44 }
 0x3ea   :  { %4744 = vmatpush1.bf16.msra.mxu0 %v5791_v26  ;;  %4773 = vmatpush3.bf16.msra.mxu1 %v5922_v33 }
 0x3eb   :  { %4746 = vmatprep.subr.bf16.mxu0 %v5794_v27  ;;  %4774 = vmatprep.subr.bf16.mxu1 %v6706_v44 }
 0x3ee   :  { %4748 = vmatpush1.bf16.msra.mxu0 %v5797_v34  ;;  %4776 = vmatpush3.bf16.msra.mxu1 %v6708_v28 }
 0x3ef   :  { %4750 = vmatprep.subr.bf16.mxu0 %v6709_v11  ;;  %4777 = vmatprep.subr.bf16.mxu1 %v6706_v44 }
 0x3f2   :  { %4752 = vmatpush1.bf16.msra.mxu0 %v6722_v45  ;;  %4779 = vmatpush3.bf16.msra.mxu1 %v6723_v7 }
 0x3f3   :  { %4754 = vmatprep.subr.bf16.mxu0 %v6724_v63  ;;  %4780 = vmatprep.subr.bf16.mxu1 %v6706_v44 }
 0x3f6   :  { %4756 = vmatpush1.bf16.msra.mxu0 %v6725_v60  ;;  %4782 = vmatpush3.bf16.msra.mxu1 %v6726_v31 }
 0x3f7   :  { %4758 = vmatprep.subr.bf16.mxu0 %v6727_v19  ;;  %4783 = vmatprep.subr.bf16.mxu1 %v6706_v44 }
 0x3fa   :  { %4760 = vmatpush1.bf16.msra.mxu0 %v6728_v59  ;;  %4785 = vmatpush3.bf16.msra.mxu1 %v6729_v58  ;;  %v1565_v59 = vrot.slane %v1272_v38, 1 }
 0x3fb   :  { %4762 = vmatprep.subr.bf16.mxu0 %v6730_v36  ;;  %4786 = vmatprep.subr.bf16.mxu1 %v6706_v44 }
 0x3fe   :  { %4764 = vmatpush1.bf16.msra.mxu0 %v6731_v47  ;;  %4788 = vmatpush3.bf16.msra.mxu1 %v6732_v55 }
 0x3ff   :  { %4790 = vmatprep.subr.bf16.mxu0 %v6733_v1  ;;  %4821 = vmatprep.subr.bf16.mxu1 %v6706_v44 }
 0x494   :  { %v1341_v3 = vpop.f32.mrb[8].mxu0  ;;  %v1412_v52 = vpop.f32.mrb[16].mxu1 }
 0x495   :  { %v1342_v48 = vadd.f32 %v1341_v3, %v6734_v41  ;;  %v1343_v50 = vpop.f32.mrb[9].mxu0  ;;  %v3984_v2 = vpop.f32.mrb[17].mxu1  ;;  %v1413_v7 = vadd.f32 %v1412_v52, %v6028_v37  ;;  %v1575_v41 = vrot.slane %v1272_v38, 2 }
 0x496   :  { %v1344_v58 = vadd.f32 %v1343_v50, %v6735_v61  ;;  %v1274_v61 = vld [vmem:[#allocation2 + $0x1d] ss:$8 sm:$0x7] }
 0x497   :  { %v1557_v36 = vadd.f32 %v1342_v48, %v1272_v38 }
 0x498   :  { %v1567_v31 = vadd.f32 %v1565_v59, %v1344_v58 }
 0x499   :  { %v3468_v19 = vmul.f32 -1.442695, %v1557_v36 }
 0x49a   :  { %v3469_v47 = vmul.f32 -1.442695, %v1567_v31 }
 0x49b   :  { %5381 = vpow2.f32 %v3468_v19 }
 0x49c   :  { %5383 = vpow2.f32 %v3469_v47  ;;  %v1591_v47 = vrot.slane %v1274_v61, 1 }
 0x4a5   :  { %v5382_v55 = vpop.eup %5381 }
 0x4a6   :  { %v1561_v1 = vadd.f32 1.0, %v5382_v55  ;;  %v5384_v60 = vpop.eup %5383 }
 0x4a7   :  { %v1571_v63 = vadd.f32 1.0, %v5384_v60 }
 0x4a8   :  { %5385 = vrcp.f32 %v1561_v1 }
 0x4a9   :  { %5387 = vrcp.f32 %v1571_v63 }
 0x4b2   :  { %v5386_v45 = vpop.eup %5385 }
 0x4b3   :  { %v1574_v3 = vmul.f32 %v5386_v45, %v1413_v7  ;;  %v5388_v1 = vpop.eup %5387 }
 0x4b4   :  { %v1482_v2 = vpop.f32.mrb[10].mxu0  ;;  %v1553_v50 = vpop.f32.mrb[18].mxu1  ;;  %v1579_v7 = vsub.f32 1.0, %v5388_v1  ;;  %v1581_v38 = vmul.f32 %v5388_v1, %v6130_v40 }
 0x4b5   :  { %v1577_v48 = vadd.f32 %v1575_v41, %v1574_v3  ;;  %v1483_v59 = vadd.f32 %v1482_v2, %v6022_v9  ;;  %v1484_v19 = vpop.f32.mrb[11].mxu0  ;;  %v4019_v31 = vpop.f32.mrb[19].mxu1 }
 0x4b6   :  { %v1485_v58 = vadd.f32 %v1484_v19, %v6032_v53 }
 0x4b7   :  { %5389 = vtanh.f32 %v1577_v48  ;;  %v1583_v36 = vadd.f32 %v1483_v59, %v1274_v61  ;;  %v1554_v59 = vadd.f32 %v1553_v50, %v6055_v54 }
 0x4b8   :  { %v1593_v55 = vadd.f32 %v1591_v47, %v1485_v58  ;;  %v1601_v58 = vrot.slane %v1274_v61, 2 }
 0x4b9   :  { %v3470_v60 = vmul.f32 -1.442695, %v1583_v36 }
 0x4ba   :  { %v3471_v45 = vmul.f32 -1.442695, %v1593_v55 }
 0x4bb   :  { %5391 = vpow2.f32 %v3470_v60 }
 0x4bc   :  { %5393 = vpow2.f32 %v3471_v45  ;;  %v6737_v45 = vld [vmem:[#allocation27_spill] sm:$0xff] }
 0x4c1   :  { %v5390_v63 = vpop.eup %5389 }
 0x4c2   :  { %v1580_v52 = vmul.f32 %v5390_v63, %v1579_v7  ;;  %v6738_v7 = vld [vmem:[#allocation19_spill] sm:$0xff]  ;;  %v6739_v63 = vld [vmem:[#allocation20_spill] sm:$0xff] }
 0x4c4   :  { %v6218_v41 = vadd.f32 %v1581_v38, %v1580_v52  ;;  %v6740_v52 = vld [vmem:[#allocation28_spill] sm:$0xff]  ;;  %v6741_v38 = vld [vmem:[#allocation21_spill] sm:$0xff] }
 0x4c5   :  { %v5392_v3 = vpop.eup %5391 }
 0x4c6   :  { %v1587_v2 = vadd.f32 1.0, %v5392_v3  ;;  %1609 = vst [vmem:[#allocation3 + $0x2] sm:$0x1] %v6218_v41  ;;  %1680 = vmatmul.mubr.f32.vlgmr.msra.gmra.mrb[12].mxu0 %v6218_v41  ;;  %4053 = vmatmul.mubr.f32.vlgmr.msra.gmra.mrb[20].mxu1 %v6218_v41  ;;  %v5394_v40 = vpop.eup %5393  ;;  %v6742_v3 = vld [vmem:[#allocation22_spill] sm:$0xff] }
 0x4c7   :  { %4792 = vmatpush1.bf16.msra.mxu0 %v5832_v4  ;;  %4823 = vmatpush3.bf16.msra.mxu1 %v5946_v13  ;;  %v1597_v48 = vadd.f32 1.0, %v5394_v40  ;;  %v6744_v40 = vld [vmem:[#allocation23_spill] sm:$0xff] }
 0x4c8   :  { %5395 = vrcp.f32 %v1587_v2  ;;  %4794 = vmatprep.subr.bf16.mxu0 %v5835_v5  ;;  %4824 = vmatprep.subr.bf16.mxu1 %v6706_v44  ;;  %v6743_v2 = vld [vmem:[#allocation29_spill] sm:$0xff] }
 0x4c9   :  { %1820 = vmatprep.mubr.f32.mxu0 %v6707_v18  ;;  %4087 = vmatprep.mubr.msk.f32.mxu1 %vm5636_vm0, %v6707_v18  ;;  %5397 = vrcp.f32 %v1597_v48  ;;  %v6745_v48 = vld [vmem:[#allocation24_spill] sm:$0xff] }
 0x4cb   :  { %4796 = vmatpush1.bf16.msra.mxu0 %v5839_v8  ;;  %4826 = vmatpush3.bf16.msra.mxu1 %v5951_v23 }
 0x4cc   :  { %4798 = vmatprep.subr.bf16.mxu0 %v5847_v35  ;;  %4827 = vmatprep.subr.bf16.mxu1 %v6706_v44 }
 0x4cf   :  { %4800 = vmatpush1.bf16.msra.mxu0 %v5849_v39  ;;  %4829 = vmatpush3.bf16.msra.mxu1 %v5957_v32 }
 0x4d0   :  { %4802 = vmatprep.subr.bf16.mxu0 %v5853_v46  ;;  %4830 = vmatprep.subr.bf16.mxu1 %v6706_v44 }
 0x4d2   :  { %v5396_v19 = vpop.eup %5395 }
 0x4d3   :  { %v1600_v31 = vmul.f32 %v5396_v19, %v1554_v59  ;;  %4804 = vmatpush1.bf16.msra.mxu0 %v5855_v49  ;;  %4832 = vmatpush3.bf16.msra.mxu1 %v5961_v43  ;;  %v5398_v61 = vpop.eup %5397  ;;  %v6746_v59 = vld [vmem:[#allocation30_spill] sm:$0xff]  ;;  %v6747_v19 = vld [vmem:[#allocation25_spill] sm:$0xff] }
 0x4d4   :  { %4806 = vmatprep.subr.bf16.mxu0 %v5859_v56  ;;  %4833 = vmatprep.subr.bf16.mxu1 %v6706_v44  ;;  %v1605_v50 = vsub.f32 1.0, %v5398_v61  ;;  %v1607_v55 = vmul.f32 %v5398_v61, %v6170_v42  ;;  %v6736_v42 = vld [vmem:[#allocation18_spill] sm:$0xff]  ;;  %v6748_v61 = vld [vmem:[#allocation31_spill] sm:$0xff] }
 0x4d5   :  { %v1603_v36 = vadd.f32 %v1601_v58, %v1600_v31 }
 0x4d7   :  { %5399 = vtanh.f32 %v1603_v36  ;;  %4808 = vmatpush1.bf16.msra.mxu0 %v5861_v57  ;;  %4835 = vmatpush3.bf16.msra.mxu1 %v5965_v51  ;;  %v1612_v36 = vld [vmem:[#allocation2 + $0x3] ss:$8 sm:$0x7] }
 0x4d8   :  { %4810 = vmatprep.subr.bf16.mxu0 %v5865_v0  ;;  %4836 = vmatprep.subr.bf16.mxu1 %v6706_v44 }
 0x4db   :  { %4812 = vmatpush1.bf16.msra.mxu0 %v5867_v6  ;;  %4838 = vmatpush3.bf16.msra.mxu1 %v5969_v62 }
 0x4dc   :  { %4814 = vmatprep.subr.bf16.mxu0 %v5871_v16  ;;  %4839 = vmatprep.subr.bf16.mxu1 %v6706_v44 }
 0x4df   :  { %4816 = vmatpush1.bf16.msra.mxu0 %v5873_v17  ;;  %4841 = vmatpush3.bf16.msra.mxu1 %v5973_v12 }
 0x4e0   :  { %4818 = vmatprep.subr.bf16.mxu0 %v5877_v24  ;;  %4842 = vmatprep.subr.bf16.mxu1 %v6706_v44 }
 0x4e1   :  { %v5400_v47 = vpop.eup %5399 }
 0x4e2   :  { %v1606_v60 = vmul.f32 %v5400_v47, %v1605_v50 }
 0x4e3   :  { %4820 = vmatpush1.bf16.msra.mxu0 %v5879_v25  ;;  %4844 = vmatpush3.bf16.msra.mxu1 %v5977_v29 }
 0x4e4   :  { %v6258_v1 = vadd.f32 %v1607_v55, %v1606_v60  ;;  %4846 = vmatprep.subr.bf16.mxu0 %v5777_v10  ;;  %4877 = vmatprep.subr.bf16.mxu1 %v6706_v44  ;;  %v6749_v55 = vld [vmem:[#allocation32_spill] sm:$0xff] }
 0x4e6   :  { %1610 = vst [vmem:[#allocation3 + $0xd] sm:$0x1] %v6258_v1  ;;  %1821 = vmatmul.mubr.f32.vlgmr.msra.gmra.mrb[14].mxu0 %v6258_v1  ;;  %4088 = vmatmul.mubr.f32.vlgmr.msra.gmra.mrb[22].mxu1 %v6258_v1 }
 0x4e7   :  { %4848 = vmatpush1.bf16.msra.mxu0 %v5779_v14  ;;  %4879 = vmatpush3.bf16.msra.mxu1 %v5911_v22 }
 0x4e8   :  { %4850 = vmatprep.subr.bf16.mxu0 %v5781_v15  ;;  %4880 = vmatprep.subr.bf16.mxu1 %v6706_v44 }
 0x4e9   :  { %2019 = vmatprep.mubr.f32.mxu0 %v6707_v18  ;;  %4122 = vmatprep.mubr.msk.f32.mxu1 %vm5636_vm0, %v6707_v18 }
 0x4eb   :  { %4852 = vmatpush1.bf16.msra.mxu0 %v5785_v20  ;;  %4882 = vmatpush3.bf16.msra.mxu1 %v5916_v30 }
 0x4ec   :  { %4854 = vmatprep.subr.bf16.mxu0 %v5788_v21  ;;  %4883 = vmatprep.subr.bf16.mxu1 %v6706_v44 }
 0x4ef   :  { %4856 = vmatpush1.bf16.msra.mxu0 %v5791_v26  ;;  %4885 = vmatpush3.bf16.msra.mxu1 %v5922_v33 }
 0x4f0   :  { %4858 = vmatprep.subr.bf16.mxu0 %v5794_v27  ;;  %4886 = vmatprep.subr.bf16.mxu1 %v6706_v44 }
 0x4f3   :  { %4860 = vmatpush1.bf16.msra.mxu0 %v5797_v34  ;;  %4888 = vmatpush3.bf16.msra.mxu1 %v6708_v28 }
 0x4f4   :  { %4862 = vmatprep.subr.bf16.mxu0 %v6709_v11  ;;  %4889 = vmatprep.subr.bf16.mxu1 %v6706_v44 }
 0x4f7   :  { %4864 = vmatpush1.bf16.msra.mxu0 %v6736_v42  ;;  %4891 = vmatpush3.bf16.msra.mxu1 %v6737_v45 }
 0x4f8   :  { %4866 = vmatprep.subr.bf16.mxu0 %v6738_v7  ;;  %4892 = vmatprep.subr.bf16.mxu1 %v6706_v44 }
 0x4fb   :  { %4868 = vmatpush1.bf16.msra.mxu0 %v6739_v63  ;;  %4894 = vmatpush3.bf16.msra.mxu1 %v6740_v52 }
 0x4fc   :  { %4870 = vmatprep.subr.bf16.mxu0 %v6741_v38  ;;  %4895 = vmatprep.subr.bf16.mxu1 %v6706_v44 }
 0x4ff   :  { %4872 = vmatpush1.bf16.msra.mxu0 %v6742_v3  ;;  %4897 = vmatpush3.bf16.msra.mxu1 %v6743_v2  ;;  %v1905_v3 = vrot.slane %v1612_v36, 1 }
 0x500   :  { %4874 = vmatprep.subr.bf16.mxu0 %v6744_v40  ;;  %4898 = vmatprep.subr.bf16.mxu1 %v6706_v44 }
 0x503   :  { %4876 = vmatpush1.bf16.msra.mxu0 %v6745_v48  ;;  %4900 = vmatpush3.bf16.msra.mxu1 %v6746_v59 }
 0x504   :  { %4902 = vmatprep.subr.bf16.mxu0 %v6747_v19  ;;  %4933 = vmatprep.subr.bf16.mxu1 %v6706_v44 }
 0x599   :  { %v1681_v31 = vpop.f32.mrb[12].mxu0  ;;  %v1752_v58 = vpop.f32.mrb[20].mxu1 }
 0x59a   :  { %v1682_v50 = vadd.f32 %v1681_v31, %v6748_v61  ;;  %v1683_v47 = vpop.f32.mrb[13].mxu0  ;;  %v4054_v60 = vpop.f32.mrb[21].mxu1  ;;  %v1753_v45 = vadd.f32 %v1752_v58, %v6028_v37  ;;  %v1915_v61 = vrot.slane %v1612_v36, 2 }
 0x59b   :  { %v1684_v2 = vadd.f32 %v1683_v47, %v6749_v55  ;;  %v1614_v55 = vld [vmem:[#allocation2 + $0x1c] ss:$8 sm:$0x7] }
 0x59c   :  { %v1897_v40 = vadd.f32 %v1682_v50, %v1612_v36 }
 0x59d   :  { %v1907_v52 = vadd.f32 %v1905_v3, %v1684_v2 }
 0x59e   :  { %v3472_v38 = vmul.f32 -1.442695, %v1897_v40 }
 0x59f   :  { %v3473_v48 = vmul.f32 -1.442695, %v1907_v52 }
 0x5a0   :  { %5401 = vpow2.f32 %v3472_v38 }
 0x5a1   :  { %5403 = vpow2.f32 %v3473_v48  ;;  %v1931_v48 = vrot.slane %v1614_v55, 1 }
 0x5aa   :  { %v5402_v59 = vpop.eup %5401 }
 0x5ab   :  { %v1901_v19 = vadd.f32 1.0, %v5402_v59  ;;  %v5404_v63 = vpop.eup %5403 }
 0x5ac   :  { %v1911_v7 = vadd.f32 1.0, %v5404_v63 }
 0x5ad   :  { %5405 = vrcp.f32 %v1901_v19 }
 0x5ae   :  { %5407 = vrcp.f32 %v1911_v7 }
 0x5b7   :  { %v5406_v42 = vpop.eup %5405 }
 0x5b8   :  { %v1914_v31 = vmul.f32 %v5406_v42, %v1753_v45  ;;  %v5408_v19 = vpop.eup %5407 }
 0x5b9   :  { %v1822_v60 = vpop.f32.mrb[14].mxu0  ;;  %v1893_v47 = vpop.f32.mrb[22].mxu1  ;;  %v1919_v45 = vsub.f32 1.0, %v5408_v19  ;;  %v1921_v36 = vmul.f32 %v5408_v19, %v6218_v41 }
 0x5ba   :  { %v1917_v50 = vadd.f32 %v1915_v61, %v1914_v31  ;;  %v1823_v3 = vadd.f32 %v1822_v60, %v6022_v9  ;;  %v1824_v38 = vpop.f32.mrb[15].mxu0  ;;  %v4089_v52 = vpop.f32.mrb[23].mxu1 }
 0x5bb   :  { %v1825_v2 = vadd.f32 %v1824_v38, %v6032_v53 }
 0x5bc   :  { %5409 = vtanh.f32 %v1917_v50  ;;  %v1923_v40 = vadd.f32 %v1823_v3, %v1614_v55  ;;  %v1894_v3 = vadd.f32 %v1893_v47, %v6055_v54 }
 0x5bd   :  { %v1933_v59 = vadd.f32 %v1931_v48, %v1825_v2  ;;  %v1941_v2 = vrot.slane %v1614_v55, 2 }
 0x5be   :  { %v3474_v63 = vmul.f32 -1.442695, %v1923_v40 }
 0x5bf   :  { %v3475_v42 = vmul.f32 -1.442695, %v1933_v59 }
 0x5c0   :  { %5411 = vpow2.f32 %v3474_v63 }
 0x5c1   :  { %5413 = vpow2.f32 %v3475_v42  ;;  %v6751_v42 = vld [vmem:[#allocation27_spill] sm:$0xff] }
 0x5c6   :  { %v5410_v7 = vpop.eup %5409 }
 0x5c7   :  { %v1920_v58 = vmul.f32 %v5410_v7, %v1919_v45  ;;  %v6752_v45 = vld [vmem:[#allocation19_spill] sm:$0xff]  ;;  %v6753_v7 = vld [vmem:[#allocation20_spill] sm:$0xff] }
 0x5c9   :  { %v6306_v61 = vadd.f32 %v1921_v36, %v1920_v58  ;;  %v6754_v58 = vld [vmem:[#allocation28_spill] sm:$0xff]  ;;  %v6755_v36 = vld [vmem:[#allocation21_spill] sm:$0xff] }
 0x5ca   :  { %v5412_v31 = vpop.eup %5411 }
 0x5cb   :  { %v1927_v60 = vadd.f32 1.0, %v5412_v31  ;;  %1949 = vst [vmem:[#allocation3 + $0x3] sm:$0x1] %v6306_v61  ;;  %2020 = vmatmul.mubr.f32.vlgmr.msra.gmra.mrb[16].mxu0 %v6306_v61  ;;  %4123 = vmatmul.mubr.f32.vlgmr.msra.gmra.mrb[24].mxu1 %v6306_v61  ;;  %v5414_v41 = vpop.eup %5413  ;;  %v6756_v31 = vld [vmem:[#allocation22_spill] sm:$0xff] }
 0x5cc   :  { %4904 = vmatpush1.bf16.msra.mxu0 %v5832_v4  ;;  %4935 = vmatpush3.bf16.msra.mxu1 %v5946_v13  ;;  %v1937_v50 = vadd.f32 1.0, %v5414_v41  ;;  %v6758_v41 = vld [vmem:[#allocation23_spill] sm:$0xff] }
 0x5cd   :  { %5415 = vrcp.f32 %v1927_v60  ;;  %4906 = vmatprep.subr.bf16.mxu0 %v5835_v5  ;;  %4936 = vmatprep.subr.bf16.mxu1 %v6706_v44  ;;  %v6757_v60 = vld [vmem:[#allocation29_spill] sm:$0xff] }
 0x5ce   :  { %2160 = vmatprep.mubr.f32.mxu0 %v6707_v18  ;;  %4157 = vmatprep.mubr.msk.f32.mxu1 %vm5636_vm0, %v6707_v18  ;;  %5417 = vrcp.f32 %v1937_v50  ;;  %v6759_v50 = vld [vmem:[#allocation24_spill] sm:$0xff] }
 0x5d0   :  { %4908 = vmatpush1.bf16.msra.mxu0 %v5839_v8  ;;  %4938 = vmatpush3.bf16.msra.mxu1 %v5951_v23 }
 0x5d1   :  { %4910 = vmatprep.subr.bf16.mxu0 %v5847_v35  ;;  %4939 = vmatprep.subr.bf16.mxu1 %v6706_v44 }
 0x5d4   :  { %4912 = vmatpush1.bf16.msra.mxu0 %v5849_v39  ;;  %4941 = vmatpush3.bf16.msra.mxu1 %v5957_v32 }
 0x5d5   :  { %4914 = vmatprep.subr.bf16.mxu0 %v5853_v46  ;;  %4942 = vmatprep.subr.bf16.mxu1 %v6706_v44 }
 0x5d7   :  { %v5416_v38 = vpop.eup %5415 }
 0x5d8   :  { %v1940_v52 = vmul.f32 %v5416_v38, %v1894_v3  ;;  %4916 = vmatpush1.bf16.msra.mxu0 %v5855_v49  ;;  %4944 = vmatpush3.bf16.msra.mxu1 %v5961_v43  ;;  %v5418_v55 = vpop.eup %5417  ;;  %v6760_v3 = vld [vmem:[#allocation30_spill] sm:$0xff]  ;;  %v6761_v38 = vld [vmem:[#allocation25_spill] sm:$0xff] }
 0x5d9   :  { %4918 = vmatprep.subr.bf16.mxu0 %v5859_v56  ;;  %4945 = vmatprep.subr.bf16.mxu1 %v6706_v44  ;;  %v1945_v47 = vsub.f32 1.0, %v5418_v55  ;;  %v1947_v59 = vmul.f32 %v5418_v55, %v6258_v1  ;;  %v6750_v1 = vld [vmem:[#allocation18_spill] sm:$0xff]  ;;  %v6762_v55 = vld [vmem:[#allocation31_spill] sm:$0xff] }
 0x5da   :  { %v1943_v40 = vadd.f32 %v1941_v2, %v1940_v52 }
 0x5dc   :  { %5419 = vtanh.f32 %v1943_v40  ;;  %4920 = vmatpush1.bf16.msra.mxu0 %v5861_v57  ;;  %4947 = vmatpush3.bf16.msra.mxu1 %v5965_v51  ;;  %v1952_v40 = vld [vmem:[#allocation2 + $0x4] ss:$8 sm:$0x7] }
 0x5dd   :  { %4922 = vmatprep.subr.bf16.mxu0 %v5865_v0  ;;  %4948 = vmatprep.subr.bf16.mxu1 %v6706_v44 }
 0x5e0   :  { %4924 = vmatpush1.bf16.msra.mxu0 %v5867_v6  ;;  %4950 = vmatpush3.bf16.msra.mxu1 %v5969_v62 }
 0x5e1   :  { %4926 = vmatprep.subr.bf16.mxu0 %v5871_v16  ;;  %4951 = vmatprep.subr.bf16.mxu1 %v6706_v44 }
 0x5e4   :  { %4928 = vmatpush1.bf16.msra.mxu0 %v5873_v17  ;;  %4953 = vmatpush3.bf16.msra.mxu1 %v5973_v12 }
 0x5e5   :  { %4930 = vmatprep.subr.bf16.mxu0 %v5877_v24  ;;  %4954 = vmatprep.subr.bf16.mxu1 %v6706_v44 }
 0x5e6   :  { %v5420_v48 = vpop.eup %5419 }
 0x5e7   :  { %v1946_v63 = vmul.f32 %v5420_v48, %v1945_v47 }
 0x5e8   :  { %4932 = vmatpush1.bf16.msra.mxu0 %v5879_v25  ;;  %4956 = vmatpush3.bf16.msra.mxu1 %v5977_v29 }
 0x5e9   :  { %v6346_v19 = vadd.f32 %v1947_v59, %v1946_v63  ;;  %4958 = vmatprep.subr.bf16.mxu0 %v5777_v10  ;;  %4989 = vmatprep.subr.bf16.mxu1 %v6706_v44  ;;  %v6763_v59 = vld [vmem:[#allocation32_spill] sm:$0xff] }
 0x5eb   :  { %1950 = vst [vmem:[#allocation3 + $0xc] sm:$0x1] %v6346_v19  ;;  %2161 = vmatmul.mubr.f32.vlgmr.msra.gmra.mrb[18].mxu0 %v6346_v19  ;;  %4158 = vmatmul.mubr.f32.vlgmr.msra.gmra.mrb[26].mxu1 %v6346_v19 }
 0x5ec   :  { %4960 = vmatpush1.bf16.msra.mxu0 %v5779_v14  ;;  %4991 = vmatpush3.bf16.msra.mxu1 %v5911_v22 }
 0x5ed   :  { %4962 = vmatprep.subr.bf16.mxu0 %v5781_v15  ;;  %4992 = vmatprep.subr.bf16.mxu1 %v6706_v44 }
 0x5ee   :  { %2359 = vmatprep.mubr.f32.mxu0 %v6707_v18  ;;  %4192 = vmatprep.mubr.msk.f32.mxu1 %vm5636_vm0, %v6707_v18 }
 0x5f0   :  { %4964 = vmatpush1.bf16.msra.mxu0 %v5785_v20  ;;  %4994 = vmatpush3.bf16.msra.mxu1 %v5916_v30 }
 0x5f1   :  { %4966 = vmatprep.subr.bf16.mxu0 %v5788_v21  ;;  %4995 = vmatprep.subr.bf16.mxu1 %v6706_v44 }
 0x5f4   :  { %4968 = vmatpush1.bf16.msra.mxu0 %v5791_v26  ;;  %4997 = vmatpush3.bf16.msra.mxu1 %v5922_v33 }
 0x5f5   :  { %4970 = vmatprep.subr.bf16.mxu0 %v5794_v27  ;;  %4998 = vmatprep.subr.bf16.mxu1 %v6706_v44 }
 0x5f8   :  { %4972 = vmatpush1.bf16.msra.mxu0 %v5797_v34  ;;  %5000 = vmatpush3.bf16.msra.mxu1 %v6708_v28 }
 0x5f9   :  { %4974 = vmatprep.subr.bf16.mxu0 %v6709_v11  ;;  %5001 = vmatprep.subr.bf16.mxu1 %v6706_v44 }
 0x5fc   :  { %4976 = vmatpush1.bf16.msra.mxu0 %v6750_v1  ;;  %5003 = vmatpush3.bf16.msra.mxu1 %v6751_v42 }
 0x5fd   :  { %4978 = vmatprep.subr.bf16.mxu0 %v6752_v45  ;;  %5004 = vmatprep.subr.bf16.mxu1 %v6706_v44 }
 0x600   :  { %4980 = vmatpush1.bf16.msra.mxu0 %v6753_v7  ;;  %5006 = vmatpush3.bf16.msra.mxu1 %v6754_v58 }
 0x601   :  { %4982 = vmatprep.subr.bf16.mxu0 %v6755_v36  ;;  %5007 = vmatprep.subr.bf16.mxu1 %v6706_v44 }
 0x604   :  { %4984 = vmatpush1.bf16.msra.mxu0 %v6756_v31  ;;  %5009 = vmatpush3.bf16.msra.mxu1 %v6757_v60  ;;  %v2245_v31 = vrot.slane %v1952_v40, 1 }
 0x605   :  { %4986 = vmatprep.subr.bf16.mxu0 %v6758_v41  ;;  %5010 = vmatprep.subr.bf16.mxu1 %v6706_v44 }
 0x608   :  { %4988 = vmatpush1.bf16.msra.mxu0 %v6759_v50  ;;  %5012 = vmatpush3.bf16.msra.mxu1 %v6760_v3 }
 0x609   :  { %5014 = vmatprep.subr.bf16.mxu0 %v6761_v38  ;;  %5045 = vmatprep.subr.bf16.mxu1 %v6706_v44 }
 0x69e   :  { %v2021_v52 = vpop.f32.mrb[16].mxu0  ;;  %v2092_v2 = vpop.f32.mrb[24].mxu1 }
 0x69f   :  { %v2022_v47 = vadd.f32 %v2021_v52, %v6762_v55  ;;  %v2023_v48 = vpop.f32.mrb[17].mxu0  ;;  %v4124_v63 = vpop.f32.mrb[25].mxu1  ;;  %v2093_v42 = vadd.f32 %v2092_v2, %v6028_v37  ;;  %v2255_v55 = vrot.slane %v1952_v40, 2 }
 0x6a0   :  { %v2024_v60 = vadd.f32 %v2023_v48, %v6763_v59  ;;  %v1954_v59 = vld [vmem:[#allocation2 + $0x1b] ss:$8 sm:$0x7] }
 0x6a1   :  { %v2237_v41 = vadd.f32 %v2022_v47, %v1952_v40 }
 0x6a2   :  { %v2247_v58 = vadd.f32 %v2245_v31, %v2024_v60 }
 0x6a3   :  { %v3476_v36 = vmul.f32 -1.442695, %v2237_v41 }
 0x6a4   :  { %v3477_v50 = vmul.f32 -1.442695, %v2247_v58 }
 0x6a5   :  { %5421 = vpow2.f32 %v3476_v36 }
 0x6a6   :  { %5423 = vpow2.f32 %v3477_v50  ;;  %v2271_v50 = vrot.slane %v1954_v59, 1 }
 0x6af   :  { %v5422_v3 = vpop.eup %5421 }
 0x6b0   :  { %v2241_v38 = vadd.f32 1.0, %v5422_v3  ;;  %v5424_v7 = vpop.eup %5423 }
 0x6b1   :  { %v2251_v45 = vadd.f32 1.0, %v5424_v7 }
 0x6b2   :  { %5425 = vrcp.f32 %v2241_v38 }
 0x6b3   :  { %5427 = vrcp.f32 %v2251_v45 }
 0x6bc   :  { %v5426_v1 = vpop.eup %5425 }
 0x6bd   :  { %v2254_v52 = vmul.f32 %v5426_v1, %v2093_v42  ;;  %v5428_v38 = vpop.eup %5427 }
 0x6be   :  { %v2162_v63 = vpop.f32.mrb[18].mxu0  ;;  %v2233_v48 = vpop.f32.mrb[26].mxu1  ;;  %v2259_v42 = vsub.f32 1.0, %v5428_v38  ;;  %v2261_v40 = vmul.f32 %v5428_v38, %v6306_v61 }
 0x6bf   :  { %v2257_v47 = vadd.f32 %v2255_v55, %v2254_v52  ;;  %v2163_v31 = vadd.f32 %v2162_v63, %v6022_v9  ;;  %v2164_v36 = vpop.f32.mrb[19].mxu0  ;;  %v4159_v58 = vpop.f32.mrb[27].mxu1 }
 0x6c0   :  { %v2165_v60 = vadd.f32 %v2164_v36, %v6032_v53 }
 0x6c1   :  { %5429 = vtanh.f32 %v2257_v47  ;;  %v2263_v41 = vadd.f32 %v2163_v31, %v1954_v59  ;;  %v2234_v31 = vadd.f32 %v2233_v48, %v6055_v54 }
 0x6c2   :  { %v2273_v3 = vadd.f32 %v2271_v50, %v2165_v60  ;;  %v2281_v60 = vrot.slane %v1954_v59, 2 }
 0x6c3   :  { %v3478_v7 = vmul.f32 -1.442695, %v2263_v41 }
 0x6c4   :  { %v3479_v1 = vmul.f32 -1.442695, %v2273_v3 }
 0x6c5   :  { %5431 = vpow2.f32 %v3478_v7 }
 0x6c6   :  { %5433 = vpow2.f32 %v3479_v1  ;;  %v6765_v1 = vld [vmem:[#allocation27_spill] sm:$0xff] }
 0x6cb   :  { %v5430_v45 = vpop.eup %5429 }
 0x6cc   :  { %v2260_v2 = vmul.f32 %v5430_v45, %v2259_v42  ;;  %v6766_v42 = vld [vmem:[#allocation19_spill] sm:$0xff]  ;;  %v6767_v45 = vld [vmem:[#allocation20_spill] sm:$0xff] }
 0x6ce   :  { %v6394_v55 = vadd.f32 %v2261_v40, %v2260_v2  ;;  %v6768_v2 = vld [vmem:[#allocation28_spill] sm:$0xff]  ;;  %v6769_v40 = vld [vmem:[#allocation21_spill] sm:$0xff] }
 0x6cf   :  { %v5432_v52 = vpop.eup %5431 }
 0x6d0   :  { %v2267_v63 = vadd.f32 1.0, %v5432_v52  ;;  %2289 = vst [vmem:[#allocation3 + $0x4] sm:$0x1] %v6394_v55  ;;  %2360 = vmatmul.mubr.f32.vlgmr.msra.gmra.mrb[20].mxu0 %v6394_v55  ;;  %4193 = vmatmul.mubr.f32.vlgmr.msra.gmra.mrb[28].mxu1 %v6394_v55  ;;  %v5434_v61 = vpop.eup %5433  ;;  %v6770_v52 = vld [vmem:[#allocation22_spill] sm:$0xff] }
 0x6d1   :  { %5016 = vmatpush1.bf16.msra.mxu0 %v5832_v4  ;;  %5047 = vmatpush3.bf16.msra.mxu1 %v5946_v13  ;;  %v2277_v47 = vadd.f32 1.0, %v5434_v61  ;;  %v6772_v61 = vld [vmem:[#allocation23_spill] sm:$0xff] }
 0x6d2   :  { %5435 = vrcp.f32 %v2267_v63  ;;  %5018 = vmatprep.subr.bf16.mxu0 %v5835_v5  ;;  %5048 = vmatprep.subr.bf16.mxu1 %v6706_v44  ;;  %v6771_v63 = vld [vmem:[#allocation29_spill] sm:$0xff] }
 0x6d3   :  { %2500 = vmatprep.mubr.f32.mxu0 %v6707_v18  ;;  %4227 = vmatprep.mubr.msk.f32.mxu1 %vm5636_vm0, %v6707_v18  ;;  %5437 = vrcp.f32 %v2277_v47  ;;  %v6773_v47 = vld [vmem:[#allocation24_spill] sm:$0xff] }
 0x6d5   :  { %5020 = vmatpush1.bf16.msra.mxu0 %v5839_v8  ;;  %5050 = vmatpush3.bf16.msra.mxu1 %v5951_v23 }
 0x6d6   :  { %5022 = vmatprep.subr.bf16.mxu0 %v5847_v35  ;;  %5051 = vmatprep.subr.bf16.mxu1 %v6706_v44 }
 0x6d9   :  { %5024 = vmatpush1.bf16.msra.mxu0 %v5849_v39  ;;  %5053 = vmatpush3.bf16.msra.mxu1 %v5957_v32 }
 0x6da   :  { %5026 = vmatprep.subr.bf16.mxu0 %v5853_v46  ;;  %5054 = vmatprep.subr.bf16.mxu1 %v6706_v44 }
 0x6dc   :  { %v5436_v36 = vpop.eup %5435 }
 0x6dd   :  { %v2280_v58 = vmul.f32 %v5436_v36, %v2234_v31  ;;  %5028 = vmatpush1.bf16.msra.mxu0 %v5855_v49  ;;  %5056 = vmatpush3.bf16.msra.mxu1 %v5961_v43  ;;  %v5438_v59 = vpop.eup %5437  ;;  %v6774_v31 = vld [vmem:[#allocation30_spill] sm:$0xff]  ;;  %v6775_v36 = vld [vmem:[#allocation25_spill] sm:$0xff] }
 0x6de   :  { %5030 = vmatprep.subr.bf16.mxu0 %v5859_v56  ;;  %5057 = vmatprep.subr.bf16.mxu1 %v6706_v44  ;;  %v2285_v48 = vsub.f32 1.0, %v5438_v59  ;;  %v2287_v3 = vmul.f32 %v5438_v59, %v6346_v19  ;;  %v6764_v19 = vld [vmem:[#allocation18_spill] sm:$0xff]  ;;  %v6776_v59 = vld [vmem:[#allocation31_spill] sm:$0xff] }
 0x6df   :  { %v2283_v41 = vadd.f32 %v2281_v60, %v2280_v58 }
 0x6e1   :  { %5439 = vtanh.f32 %v2283_v41  ;;  %5032 = vmatpush1.bf16.msra.mxu0 %v5861_v57  ;;  %5059 = vmatpush3.bf16.msra.mxu1 %v5965_v51  ;;  %v2292_v41 = vld [vmem:[#allocation2 + $0x5] ss:$8 sm:$0x7] }
 0x6e2   :  { %5034 = vmatprep.subr.bf16.mxu0 %v5865_v0  ;;  %5060 = vmatprep.subr.bf16.mxu1 %v6706_v44 }
 0x6e5   :  { %5036 = vmatpush1.bf16.msra.mxu0 %v5867_v6  ;;  %5062 = vmatpush3.bf16.msra.mxu1 %v5969_v62 }
 0x6e6   :  { %5038 = vmatprep.subr.bf16.mxu0 %v5871_v16  ;;  %5063 = vmatprep.subr.bf16.mxu1 %v6706_v44 }
 0x6e9   :  { %5040 = vmatpush1.bf16.msra.mxu0 %v5873_v17  ;;  %5065 = vmatpush3.bf16.msra.mxu1 %v5973_v12 }
 0x6ea   :  { %5042 = vmatprep.subr.bf16.mxu0 %v5877_v24  ;;  %5066 = vmatprep.subr.bf16.mxu1 %v6706_v44 }
 0x6eb   :  { %v5440_v50 = vpop.eup %5439 }
 0x6ec   :  { %v2286_v7 = vmul.f32 %v5440_v50, %v2285_v48 }
 0x6ed   :  { %5044 = vmatpush1.bf16.msra.mxu0 %v5879_v25  ;;  %5068 = vmatpush3.bf16.msra.mxu1 %v5977_v29 }
 0x6ee   :  { %v6434_v38 = vadd.f32 %v2287_v3, %v2286_v7  ;;  %5070 = vmatprep.subr.bf16.mxu0 %v5777_v10  ;;  %5101 = vmatprep.subr.bf16.mxu1 %v6706_v44  ;;  %v6777_v3 = vld [vmem:[#allocation32_spill] sm:$0xff] }
 0x6f0   :  { %2290 = vst [vmem:[#allocation3 + $0xb] sm:$0x1] %v6434_v38  ;;  %2501 = vmatmul.mubr.f32.vlgmr.msra.gmra.mrb[22].mxu0 %v6434_v38  ;;  %4228 = vmatmul.mubr.f32.vlgmr.msra.gmra.mrb[30].mxu1 %v6434_v38 }
 0x6f1   :  { %5072 = vmatpush1.bf16.msra.mxu0 %v5779_v14  ;;  %5103 = vmatpush3.bf16.msra.mxu1 %v5911_v22 }
 0x6f2   :  { %5074 = vmatprep.subr.bf16.mxu0 %v5781_v15  ;;  %5104 = vmatprep.subr.bf16.mxu1 %v6706_v44 }
 0x6f3   :  { %2699 = vmatprep.mubr.f32.mxu0 %v6707_v18  ;;  %4262 = vmatprep.mubr.msk.f32.mxu1 %vm5636_vm0, %v6707_v18 }
 0x6f5   :  { %5076 = vmatpush1.bf16.msra.mxu0 %v5785_v20  ;;  %5106 = vmatpush3.bf16.msra.mxu1 %v5916_v30 }
 0x6f6   :  { %5078 = vmatprep.subr.bf16.mxu0 %v5788_v21  ;;  %5107 = vmatprep.subr.bf16.mxu1 %v6706_v44 }
 0x6f9   :  { %5080 = vmatpush1.bf16.msra.mxu0 %v5791_v26  ;;  %5109 = vmatpush3.bf16.msra.mxu1 %v5922_v33 }
 0x6fa   :  { %5082 = vmatprep.subr.bf16.mxu0 %v5794_v27  ;;  %5110 = vmatprep.subr.bf16.mxu1 %v6706_v44 }
 0x6fd   :  { %5084 = vmatpush1.bf16.msra.mxu0 %v5797_v34  ;;  %5112 = vmatpush3.bf16.msra.mxu1 %v6708_v28 }
 0x6fe   :  { %5086 = vmatprep.subr.bf16.mxu0 %v6709_v11  ;;  %5113 = vmatprep.subr.bf16.mxu1 %v6706_v44 }
 0x701   :  { %5088 = vmatpush1.bf16.msra.mxu0 %v6764_v19  ;;  %5115 = vmatpush3.bf16.msra.mxu1 %v6765_v1 }
 0x702   :  { %5090 = vmatprep.subr.bf16.mxu0 %v6766_v42  ;;  %5116 = vmatprep.subr.bf16.mxu1 %v6706_v44 }
 0x705   :  { %5092 = vmatpush1.bf16.msra.mxu0 %v6767_v45  ;;  %5118 = vmatpush3.bf16.msra.mxu1 %v6768_v2 }
 0x706   :  { %5094 = vmatprep.subr.bf16.mxu0 %v6769_v40  ;;  %5119 = vmatprep.subr.bf16.mxu1 %v6706_v44 }
 0x709   :  { %5096 = vmatpush1.bf16.msra.mxu0 %v6770_v52  ;;  %5121 = vmatpush3.bf16.msra.mxu1 %v6771_v63  ;;  %v2585_v52 = vrot.slane %v2292_v41, 1 }
 0x70a   :  { %5098 = vmatprep.subr.bf16.mxu0 %v6772_v61  ;;  %5122 = vmatprep.subr.bf16.mxu1 %v6706_v44 }
 0x70d   :  { %5100 = vmatpush1.bf16.msra.mxu0 %v6773_v47  ;;  %5124 = vmatpush3.bf16.msra.mxu1 %v6774_v31 }
 0x70e   :  { %5126 = vmatprep.subr.bf16.mxu0 %v6775_v36  ;;  %5157 = vmatprep.subr.bf16.mxu1 %v6706_v44 }
 0x7a3   :  { %v2361_v58 = vpop.f32.mrb[20].mxu0  ;;  %v2432_v60 = vpop.f32.mrb[28].mxu1 }
 0x7a4   :  { %v2362_v48 = vadd.f32 %v2361_v58, %v6776_v59  ;;  %v2363_v50 = vpop.f32.mrb[21].mxu0  ;;  %v4194_v7 = vpop.f32.mrb[29].mxu1  ;;  %v2433_v1 = vadd.f32 %v2432_v60, %v6028_v37  ;;  %v2595_v59 = vrot.slane %v2292_v41, 2 }
 0x7a5   :  { %v2364_v63 = vadd.f32 %v2363_v50, %v6777_v3  ;;  %v2294_v3 = vld [vmem:[#allocation2 + $0x1a] ss:$8 sm:$0x7] }
 0x7a6   :  { %v2577_v61 = vadd.f32 %v2362_v48, %v2292_v41 }
 0x7a7   :  { %v2587_v2 = vadd.f32 %v2585_v52, %v2364_v63 }
 0x7a8   :  { %v3480_v40 = vmul.f32 -1.442695, %v2577_v61 }
 0x7a9   :  { %v3481_v47 = vmul.f32 -1.442695, %v2587_v2 }
 0x7aa   :  { %5441 = vpow2.f32 %v3480_v40 }
 0x7ab   :  { %5443 = vpow2.f32 %v3481_v47  ;;  %v2611_v47 = vrot.slane %v2294_v3, 1 }
 0x7b4   :  { %v5442_v31 = vpop.eup %5441 }
 0x7b5   :  { %v2581_v36 = vadd.f32 1.0, %v5442_v31  ;;  %v5444_v45 = vpop.eup %5443 }
 0x7b6   :  { %v2591_v42 = vadd.f32 1.0, %v5444_v45 }
 0x7b7   :  { %5445 = vrcp.f32 %v2581_v36 }
 0x7b8   :  { %5447 = vrcp.f32 %v2591_v42 }
 0x7c1   :  { %v5446_v19 = vpop.eup %5445 }
 0x7c2   :  { %v2594_v58 = vmul.f32 %v5446_v19, %v2433_v1  ;;  %v5448_v36 = vpop.eup %5447 }
 0x7c3   :  { %v2502_v7 = vpop.f32.mrb[22].mxu0  ;;  %v2573_v50 = vpop.f32.mrb[30].mxu1  ;;  %v2599_v1 = vsub.f32 1.0, %v5448_v36  ;;  %v2601_v41 = vmul.f32 %v5448_v36, %v6394_v55 }
 0x7c4   :  { %v2597_v48 = vadd.f32 %v2595_v59, %v2594_v58  ;;  %v2503_v52 = vadd.f32 %v2502_v7, %v6022_v9  ;;  %v2504_v40 = vpop.f32.mrb[23].mxu0  ;;  %v4229_v2 = vpop.f32.mrb[31].mxu1 }
 0x7c5   :  { %v2505_v63 = vadd.f32 %v2504_v40, %v6032_v53 }
 0x7c6   :  { %5449 = vtanh.f32 %v2597_v48  ;;  %v2603_v61 = vadd.f32 %v2503_v52, %v2294_v3  ;;  %v2574_v52 = vadd.f32 %v2573_v50, %v6055_v54 }
 0x7c7   :  { %v2613_v31 = vadd.f32 %v2611_v47, %v2505_v63  ;;  %v2621_v63 = vrot.slane %v2294_v3, 2 }
 0x7c8   :  { %v3482_v45 = vmul.f32 -1.442695, %v2603_v61 }
 0x7c9   :  { %v3483_v19 = vmul.f32 -1.442695, %v2613_v31 }
 0x7ca   :  { %5451 = vpow2.f32 %v3482_v45 }
 0x7cb   :  { %5453 = vpow2.f32 %v3483_v19  ;;  %v2632_v19 = vld [vmem:[#allocation2 + $0x6] ss:$8 sm:$0x7] }
 0x7d0   :  { %v5450_v42 = vpop.eup %5449 }
 0x7d1   :  { %v2600_v60 = vmul.f32 %v5450_v42, %v2599_v1  ;;  %v6790_v1 = vld [vmem:[#allocation31_spill] sm:$0xff] }
 0x7d3   :  { %v6482_v59 = vadd.f32 %v2601_v41, %v2600_v60 }
 0x7d4   :  { %v5452_v58 = vpop.eup %5451 }
 0x7d5   :  { %v2607_v7 = vadd.f32 1.0, %v5452_v58  ;;  %2629 = vst [vmem:[#allocation3 + $0x5] sm:$0x1] %v6482_v59  ;;  %2700 = vmatmul.mubr.f32.vlgmr.msra.gmra.mrb[24].mxu0 %v6482_v59  ;;  %4263 = vmatmul.mubr.f32.vlgmr.msra.gmra.mrb[32].mxu1 %v6482_v59  ;;  %v5454_v55 = vpop.eup %5453  ;;  %v6791_v58 = vld [vmem:[#allocation32_spill] sm:$0xff] }
 0x7d6   :  { %5128 = vmatpush1.bf16.msra.mxu0 %v5832_v4  ;;  %5159 = vmatpush3.bf16.msra.mxu1 %v5946_v13  ;;  %v2617_v48 = vadd.f32 1.0, %v5454_v55 }
 0x7d7   :  { %5455 = vrcp.f32 %v2607_v7  ;;  %5130 = vmatprep.subr.bf16.mxu0 %v5835_v5  ;;  %5160 = vmatprep.subr.bf16.mxu1 %v6706_v44 }
 0x7d8   :  { %2840 = vmatprep.mubr.f32.mxu0 %v6707_v18  ;;  %4297 = vmatprep.mubr.msk.f32.mxu1 %vm5636_vm0, %v6707_v18  ;;  %5457 = vrcp.f32 %v2617_v48  ;;  %v2925_v48 = vrot.slane %v2632_v19, 1 }
 0x7da   :  { %5132 = vmatpush1.bf16.msra.mxu0 %v5839_v8  ;;  %5162 = vmatpush3.bf16.msra.mxu1 %v5951_v23 }
 0x7db   :  { %5134 = vmatprep.subr.bf16.mxu0 %v5847_v35  ;;  %5163 = vmatprep.subr.bf16.mxu1 %v6706_v44 }
 0x7de   :  { %5136 = vmatpush1.bf16.msra.mxu0 %v5849_v39  ;;  %5165 = vmatpush3.bf16.msra.mxu1 %v5957_v32 }
 0x7df   :  { %5138 = vmatprep.subr.bf16.mxu0 %v5853_v46  ;;  %5166 = vmatprep.subr.bf16.mxu1 %v6706_v44 }
 0x7e1   :  { %v5456_v40 = vpop.eup %5455 }
 0x7e2   :  { %v2620_v2 = vmul.f32 %v5456_v40, %v2574_v52  ;;  %5140 = vmatpush1.bf16.msra.mxu0 %v5855_v49  ;;  %5168 = vmatpush3.bf16.msra.mxu1 %v5961_v43  ;;  %v5458_v3 = vpop.eup %5457 }
 0x7e3   :  { %5142 = vmatprep.subr.bf16.mxu0 %v5859_v56  ;;  %5169 = vmatprep.subr.bf16.mxu1 %v6706_v44  ;;  %v2625_v50 = vsub.f32 1.0, %v5458_v3  ;;  %v2627_v31 = vmul.f32 %v5458_v3, %v6434_v38 }
 0x7e4   :  { %v2623_v61 = vadd.f32 %v2621_v63, %v2620_v2 }
 0x7e6   :  { %5459 = vtanh.f32 %v2623_v61  ;;  %5144 = vmatpush1.bf16.msra.mxu0 %v5861_v57  ;;  %5171 = vmatpush3.bf16.msra.mxu1 %v5965_v51 }
 0x7e7   :  { %5146 = vmatprep.subr.bf16.mxu0 %v5865_v0  ;;  %5172 = vmatprep.subr.bf16.mxu1 %v6706_v44 }
 0x7ea   :  { %5148 = vmatpush1.bf16.msra.mxu0 %v5867_v6  ;;  %5174 = vmatpush3.bf16.msra.mxu1 %v5969_v62 }
 0x7eb   :  { %5150 = vmatprep.subr.bf16.mxu0 %v5871_v16  ;;  %5175 = vmatprep.subr.bf16.mxu1 %v6706_v44 }
 0x7ee   :  { %5152 = vmatpush1.bf16.msra.mxu0 %v5873_v17  ;;  %5177 = vmatpush3.bf16.msra.mxu1 %v5973_v12 }
 0x7ef   :  { %5154 = vmatprep.subr.bf16.mxu0 %v5877_v24  ;;  %5178 = vmatprep.subr.bf16.mxu1 %v6706_v44 }
 0x7f0   :  { %v5460_v47 = vpop.eup %5459 }
 0x7f1   :  { %v2626_v45 = vmul.f32 %v5460_v47, %v2625_v50 }
 0x7f2   :  { %5156 = vmatpush1.bf16.msra.mxu0 %v5879_v25  ;;  %5180 = vmatpush3.bf16.msra.mxu1 %v5977_v29 }
 0x7f3   :  { %v6522_v36 = vadd.f32 %v2627_v31, %v2626_v45  ;;  %5182 = vmatprep.subr.bf16.mxu0 %v5777_v10  ;;  %5213 = vmatprep.subr.bf16.mxu1 %v6706_v44  ;;  %v6778_v10 = vld [vmem:[#allocation18_spill] sm:$0xff] }
 0x7f5   :  { %2630 = vst [vmem:[#allocation3 + $0xa] sm:$0x1] %v6522_v36  ;;  %2841 = vmatmul.mubr.f32.vlgmr.msra.gmra.mrb[26].mxu0 %v6522_v36  ;;  %4298 = vmatmul.mubr.f32.vlgmr.msra.gmra.mrb[34].mxu1 %v6522_v36 }
 0x7f6   :  { %5184 = vmatpush1.bf16.msra.mxu0 %v5779_v14  ;;  %5215 = vmatpush3.bf16.msra.mxu1 %v5911_v22  ;;  %v6779_v14 = vld [vmem:[#allocation27_spill] sm:$0xff] }
 0x7f7   :  { %5186 = vmatprep.subr.bf16.mxu0 %v5781_v15  ;;  %5216 = vmatprep.subr.bf16.mxu1 %v6706_v44  ;;  %v6780_v15 = vld [vmem:[#allocation19_spill] sm:$0xff] }
 0x7f8   :  { %3039 = vmatprep.mubr.f32.mxu0 %v6707_v18  ;;  %4332 = vmatprep.mubr.msk.f32.mxu1 %vm5636_vm0, %v6707_v18  ;;  %v6786_v22 = vld [vmem:[#allocation23_spill] sm:$0xff] }
 0x7fa   :  { %5188 = vmatpush1.bf16.msra.mxu0 %v5785_v20  ;;  %5218 = vmatpush3.bf16.msra.mxu1 %v5916_v30  ;;  %v6781_v20 = vld [vmem:[#allocation20_spill] sm:$0xff] }
 0x7fb   :  { %5190 = vmatprep.subr.bf16.mxu0 %v5788_v21  ;;  %5219 = vmatprep.subr.bf16.mxu1 %v6706_v44  ;;  %v6782_v21 = vld [vmem:[#allocation28_spill] sm:$0xff] }
 0x7fc   :  { %v6787_v30 = vld [vmem:[#allocation24_spill] sm:$0xff] }
 0x7fe   :  { %5192 = vmatpush1.bf16.msra.mxu0 %v5791_v26  ;;  %5221 = vmatpush3.bf16.msra.mxu1 %v5922_v33  ;;  %v6783_v26 = vld [vmem:[#allocation21_spill] sm:$0xff]  ;;  %v6788_v33 = vld [vmem:[#allocation30_spill] sm:$0xff] }
 0x7ff   :  { %5194 = vmatprep.subr.bf16.mxu0 %v5794_v27  ;;  %5222 = vmatprep.subr.bf16.mxu1 %v6706_v44  ;;  %v6784_v27 = vld [vmem:[#allocation22_spill] sm:$0xff] }
 0x802   :  { %5196 = vmatpush1.bf16.msra.mxu0 %v5797_v34  ;;  %5224 = vmatpush3.bf16.msra.mxu1 %v6708_v28  ;;  %v6785_v34 = vld [vmem:[#allocation29_spill] sm:$0xff] }
 0x803   :  { %5198 = vmatprep.subr.bf16.mxu0 %v6709_v11  ;;  %5225 = vmatprep.subr.bf16.mxu1 %v6706_v44  ;;  %v6789_v28 = vld [vmem:[#allocation25_spill] sm:$0xff] }
 0x806   :  { %5200 = vmatpush1.bf16.msra.mxu0 %v6778_v10  ;;  %5227 = vmatpush3.bf16.msra.mxu1 %v6779_v14  ;;  %v2935_v10 = vrot.slane %v2632_v19, 2 }
 0x807   :  { %5202 = vmatprep.subr.bf16.mxu0 %v6780_v15  ;;  %5228 = vmatprep.subr.bf16.mxu1 %v6706_v44 }
 0x80a   :  { %5204 = vmatpush1.bf16.msra.mxu0 %v6781_v20  ;;  %5230 = vmatpush3.bf16.msra.mxu1 %v6782_v21  ;;  %v2634_v21 = vld [vmem:[#allocation2 + $0x19] ss:$8 sm:$0x7] }
 0x80b   :  { %5206 = vmatprep.subr.bf16.mxu0 %v6783_v26  ;;  %5231 = vmatprep.subr.bf16.mxu1 %v6706_v44 }
 0x80e   :  { %5208 = vmatpush1.bf16.msra.mxu0 %v6784_v27  ;;  %5233 = vmatpush3.bf16.msra.mxu1 %v6785_v34 }
 0x80f   :  { %5210 = vmatprep.subr.bf16.mxu0 %v6786_v22  ;;  %5234 = vmatprep.subr.bf16.mxu1 %v6706_v44 }
 0x812   :  { %5212 = vmatpush1.bf16.msra.mxu0 %v6787_v30  ;;  %5236 = vmatpush3.bf16.msra.mxu1 %v6788_v33  ;;  %v2951_v33 = vrot.slane %v2634_v21, 1 }
 0x813   :  { %5238 = vmatprep.subr.bf16.mxu0 %v6789_v28  ;;  %5269 = vmatprep.subr.bf16.mxu1 %v6706_v44 }
 0x8a8   :  { %v2701_v11 = vpop.f32.mrb[24].mxu0  ;;  %v2772_v38 = vpop.f32.mrb[32].mxu1 }
 0x8a9   :  { %v2702_v42 = vadd.f32 %v2701_v11, %v6790_v1  ;;  %v2703_v60 = vpop.f32.mrb[25].mxu0  ;;  %v4264_v41 = vpop.f32.mrb[33].mxu1  ;;  %v2773_v47 = vadd.f32 %v2772_v38, %v6028_v37 }
 0x8aa   :  { %v2704_v7 = vadd.f32 %v2703_v60, %v6791_v58 }
 0x8ab   :  { %v2917_v55 = vadd.f32 %v2702_v42, %v2632_v19 }
 0x8ac   :  { %v2927_v40 = vadd.f32 %v2925_v48, %v2704_v7 }
 0x8ad   :  { %v3484_v52 = vmul.f32 -1.442695, %v2917_v55 }
 0x8ae   :  { %v3485_v2 = vmul.f32 -1.442695, %v2927_v40 }
 0x8af   :  { %5461 = vpow2.f32 %v3484_v52 }
 0x8b0   :  { %5463 = vpow2.f32 %v3485_v2  ;;  %v3319_v2 = vld [vmem:[#allocation10 + $0x20] sm:$0xff] }
 0x8b9   :  { %v5462_v63 = vpop.eup %5461 }
 0x8ba   :  { %v2921_v61 = vadd.f32 1.0, %v5462_v63  ;;  %v5464_v3 = vpop.eup %5463  ;;  %v3320_v63 = vld [vmem:[#allocation10 + $0x28] sm:$0xff] }
 0x8bb   :  { %v2931_v50 = vadd.f32 1.0, %v5464_v3  ;;  %v3337_v3 = vld [vmem:[#allocation10 + $0xb0] sm:$0xff] }
 0x8bc   :  { %5465 = vrcp.f32 %v2921_v61  ;;  %v5303_v61 = vpack.c.bf16 %v3320_v63, %v3319_v2 }
 0x8bd   :  { %5467 = vrcp.f32 %v2931_v50  ;;  %v3338_v50 = vld [vmem:[#allocation10 + $0xb8] sm:$0xff] }
 0x8c6   :  { %v5466_v45 = vpop.eup %5465 }
 0x8c7   :  { %v2934_v31 = vmul.f32 %v5466_v45, %v2773_v47  ;;  %v5468_v38 = vpop.eup %5467  ;;  %v5305_v47 = vpack.c.bf16 %v3338_v50, %v3337_v3  ;;  %v3321_v45 = vld [vmem:[#allocation10 + $0x30] sm:$0xff] }
 0x8c8   :  { %v2842_v14 = vpop.f32.mrb[26].mxu0  ;;  %v2913_v15 = vpop.f32.mrb[34].mxu1  ;;  %v2939_v19 = vsub.f32 1.0, %v5468_v38  ;;  %v2941_v7 = vmul.f32 %v5468_v38, %v6482_v59  ;;  %v3344_v38 = vld [vmem:[#allocation10 + $0xe8] sm:$0xff] }
 0x8c9   :  { %v2937_v20 = vadd.f32 %v2935_v10, %v2934_v31  ;;  %v2843_v26 = vadd.f32 %v2842_v14, %v6022_v9  ;;  %v2844_v27 = vpop.f32.mrb[27].mxu0  ;;  %v4299_v34 = vpop.f32.mrb[35].mxu1  ;;  %v3322_v31 = vld [vmem:[#allocation10 + $0x38] sm:$0xff]  ;;  %v3339_v14 = vld [vmem:[#allocation10 + $0xc0] sm:$0xff] }
 0x8ca   :  { %v2845_v22 = vadd.f32 %v2844_v27, %v6032_v53  ;;  %v5307_v10 = vpack.c.bf16 %v3322_v31, %v3321_v45  ;;  %v3341_v34 = vld [vmem:[#allocation10 + $0xd0] sm:$0xff] }
 0x8cb   :  { %5469 = vtanh.f32 %v2937_v20  ;;  %v2943_v30 = vadd.f32 %v2843_v26, %v2634_v21  ;;  %v3324_v26 = vld [vmem:[#allocation10 + $0x48] sm:$0xff] }
 0x8cc   :  { %v2953_v11 = vadd.f32 %v2951_v33, %v2845_v22  ;;  %v3342_v22 = vld [vmem:[#allocation10 + $0xd8] sm:$0xff] }
 0x8cd   :  { %v3486_v28 = vmul.f32 -1.442695, %v2943_v30  ;;  %v3325_v30 = vld [vmem:[#allocation10 + $0x50] sm:$0xff]  ;;  %v5313_v33 = vpack.c.bf16 %v3342_v22, %v3341_v34 }
 0x8ce   :  { %v3487_v42 = vmul.f32 -1.442695, %v2953_v11  ;;  %v3343_v11 = vld [vmem:[#allocation10 + $0xe0] sm:$0xff] }
 0x8cf   :  { %5471 = vpow2.f32 %v3486_v28  ;;  %v3326_v28 = vld [vmem:[#allocation10 + $0x58] sm:$0xff] }
 0x8d0   :  { %5473 = vpow2.f32 %v3487_v42  ;;  %v5315_v42 = vpack.c.bf16 %v3326_v28, %v3325_v30 }
 0x8d5   :  { %v5470_v60 = vpop.eup %5469 }
 0x8d6   :  { %v2940_v41 = vmul.f32 %v5470_v60, %v2939_v19  ;;  %v5317_v19 = vpack.c.bf16 %v3344_v38, %v3343_v11  ;;  %v3327_v60 = vld [vmem:[#allocation10 + $0x60] sm:$0xff] }
 0x8d8   :  { %v6570_v55 = vadd.f32 %v2941_v7, %v2940_v41  ;;  %v3328_v41 = vld [vmem:[#allocation10 + $0x68] sm:$0xff]  ;;  %v3345_v7 = vld [vmem:[#allocation10 + $0xf0] sm:$0xff] }
 0x8d9   :  { %v5472_v48 = vpop.eup %5471 }
 0x8da   :  { %v2947_v52 = vadd.f32 1.0, %v5472_v48  ;;  %2969 = vst [vmem:[#allocation3 + $0x6] sm:$0x1] %v6570_v55  ;;  %3040 = vmatmul.mubr.f32.vlgmr.msra.gmra.mrb[28].mxu0 %v6570_v55  ;;  %4333 = vmatmul.mubr.f32.vlgmr.msra.gmra.mrb[36].mxu1 %v6570_v55  ;;  %v5474_v59 = vpop.eup %5473  ;;  %v3346_v48 = vld [vmem:[#allocation10 + $0xf8] sm:$0xff] }
 0x8db   :  { %5240 = vmatpush1.bf16.msra.mxu0 %v5832_v4  ;;  %5271 = vmatpush3.bf16.msra.mxu1 %v5946_v13  ;;  %v2957_v4 = vadd.f32 1.0, %v5474_v59  ;;  %v5321_v59 = vpack.c.bf16 %v3346_v48, %v3345_v7 }
 0x8dc   :  { %5475 = vrcp.f32 %v2947_v52  ;;  %5242 = vmatprep.subr.bf16.mxu0 %v5835_v5  ;;  %5272 = vmatprep.subr.bf16.mxu1 %v6706_v44  ;;  %v2914_v5 = vadd.f32 %v2913_v15, %v6055_v54  ;;  %v3340_v15 = vld [vmem:[#allocation10 + $0xc8] sm:$0xff]  ;;  %v5319_v52 = vpack.c.bf16 %v3328_v41, %v3327_v60 }
 0x8dd   :  { %3180 = vmatprep.mubr.f32.mxu0 %v6707_v18  ;;  %4367 = vmatprep.mubr.msk.f32.mxu1 %vm5636_vm0, %v6707_v18  ;;  %v2961_v18 = vrot.slane %v2634_v21, 2  ;;  %5477 = vrcp.f32 %v2957_v4  ;;  %v5309_v20 = vpack.c.bf16 %v3340_v15, %v3339_v14  ;;  %v3323_v21 = vld [vmem:[#allocation10 + $0x40] sm:$0xff]  ;;  %v3329_v4 = vld [vmem:[#allocation10 + $0x70] sm:$0xff] }
 0x8de   :  { %v5311_v27 = vpack.c.bf16 %v3324_v26, %v3323_v21 }
 0x8df   :  { %5244 = vmatpush1.bf16.msra.mxu0 %v5839_v8  ;;  %5274 = vmatpush3.bf16.msra.mxu1 %v5951_v23  ;;  %v3316_v23 = vld [vmem:[#allocation10 + $0x8] sm:$0xff] }
 0x8e0   :  { %5246 = vmatprep.subr.bf16.mxu0 %v5847_v35  ;;  %5275 = vmatprep.subr.bf16.mxu1 %v6706_v44 }
 0x8e3   :  { %5248 = vmatpush1.bf16.msra.mxu0 %v5849_v39  ;;  %5277 = vmatpush3.bf16.msra.mxu1 %v5957_v32 }
 0x8e4   :  { %5250 = vmatprep.subr.bf16.mxu0 %v5853_v46  ;;  %5278 = vmatprep.subr.bf16.mxu1 %v6706_v44 }
 0x8e6   :  { %v5476_v13 = vpop.eup %5475 }
 0x8e7   :  { %v2960_v8 = vmul.f32 %v5476_v13, %v2914_v5  ;;  %5252 = vmatpush1.bf16.msra.mxu0 %v5855_v49  ;;  %5280 = vmatpush3.bf16.msra.mxu1 %v5961_v43  ;;  %v5478_v39 = vpop.eup %5477  ;;  %v3333_v43 = vld [vmem:[#allocation10 + $0x90] sm:$0xff]  ;;  %v3330_v5 = vld [vmem:[#allocation10 + $0x78] sm:$0xff] }
 0x8e8   :  { %5254 = vmatprep.subr.bf16.mxu0 %v5859_v56  ;;  %5281 = vmatprep.subr.bf16.mxu1 %v6706_v44  ;;  %v2965_v46 = vsub.f32 1.0, %v5478_v39  ;;  %v5323_v13 = vpack.c.bf16 %v3330_v5, %v3329_v4 }
 0x8e9   :  { %v2963_v35 = vadd.f32 %v2961_v18, %v2960_v8 }
 0x8eb   :  { %5479 = vtanh.f32 %v2963_v35  ;;  %5256 = vmatpush1.bf16.msra.mxu0 %v5861_v57  ;;  %5283 = vmatpush3.bf16.msra.mxu1 %v5965_v51  ;;  %v2967_v57 = vmul.f32 %v5478_v39, %v6522_v36  ;;  %v3336_v36 = vld [vmem:[#allocation10 + $0xa8] sm:$0xff] }
 0x8ec   :  { %5258 = vmatprep.subr.bf16.mxu0 %v5865_v0  ;;  %5284 = vmatprep.subr.bf16.mxu1 %v6706_v44  ;;  %v2972_v35 = vld [vmem:[#allocation2 + $0x7] ss:$8 sm:$0x7] }
 0x8ef   :  { %5260 = vmatpush1.bf16.msra.mxu0 %v5867_v6  ;;  %5286 = vmatpush3.bf16.msra.mxu1 %v5969_v62  ;;  %v3331_v6 = vld [vmem:[#allocation10 + $0x80] sm:$0xff]  ;;  %v3317_v62 = vld [vmem:[#allocation10 + $0x10] sm:$0xff] }
 0x8f0   :  { %5262 = vmatprep.subr.bf16.mxu0 %v5871_v16  ;;  %5287 = vmatprep.subr.bf16.mxu1 %v6706_v44  ;;  %v3332_v16 = vld [vmem:[#allocation10 + $0x88] sm:$0xff] }
 0x8f3   :  { %5264 = vmatpush1.bf16.msra.mxu0 %v5873_v17  ;;  %5289 = vmatpush3.bf16.msra.mxu1 %v5973_v12  ;;  %v5293_v17 = vpack.c.bf16 %v3332_v16, %v3331_v6  ;;  %v3318_v12 = vld [vmem:[#allocation10 + $0x18] sm:$0xff]  ;;  %v3265_v6 = vrot.slane %v2972_v35, 1 }
 0x8f4   :  { %5266 = vmatprep.subr.bf16.mxu0 %v5877_v24  ;;  %5290 = vmatprep.subr.bf16.mxu1 %v6706_v44  ;;  %v3315_v24 = vld [vmem:[#allocation10] sm:$0xff] }
 0x8f5   :  { %v5480_v49 = vpop.eup %5479  ;;  %v5295_v32 = vpack.c.bf16 %v3316_v23, %v3315_v24  ;;  %v3335_v44 = vld [vmem:[#allocation10 + $0xa0] sm:$0xff] }
 0x8f6   :  { %v2966_v56 = vmul.f32 %v5480_v49, %v2965_v46  ;;  %v5301_v40 = vpack.c.bf16 %v3336_v36, %v3335_v44  ;;  %v2974_v36 = vld [vmem:[#allocation2 + $0x18] ss:$8 sm:$0x7] }
 0x8f7   :  { %5268 = vmatpush1.bf16.msra.mxu0 %v5879_v25  ;;  %5292 = vmatpush3.bf16.msra.mxu1 %v5977_v29  ;;  %v3334_v25 = vld [vmem:[#allocation10 + $0x98] sm:$0xff]  ;;  %v5299_v29 = vpack.c.bf16 %v3318_v12, %v3317_v62  ;;  %v3275_v12 = vrot.slane %v2972_v35, 2  ;;  %v3291_v50 = vrot.slane %v2974_v36, 1 }
 0x8f8   :  { %v6610_v0 = vadd.f32 %v2967_v57, %v2966_v56  ;;  %5294 = vmatprep.subr.bf16.mxu0 %v5293_v17  ;;  %v5297_v51 = vpack.c.bf16 %v3334_v25, %v3333_v43 }
 0x8fa   :  { %2970 = vst [vmem:[#allocation3 + $0x9] sm:$0x1] %v6610_v0  ;;  %3181 = vmatmul.mubr.f32.vlgmr.msra.gmra.mrb[30].mxu0 %v6610_v0  ;;  %4368 = vmatmul.mubr.f32.vlgmr.msra.gmra.mrb[38].mxu1 %v6610_v0 }
 0x8fb   :  { %5296 = vmatpush3.bf16.msra.mxu0 %v5295_v32 }
 0x8fc   :  { %5298 = vmatprep.subr.bf16.mxu0 %v5297_v51 }
 0x8ff   :  { %5300 = vmatpush3.bf16.msra.mxu0 %v5299_v29 }
 0x900   :  { %5302 = vmatprep.subr.bf16.mxu0 %v5301_v40 }
 0x903   :  { %5304 = vmatpush3.bf16.msra.mxu0 %v5303_v61 }
 0x904   :  { %5306 = vmatprep.subr.bf16.mxu0 %v5305_v47 }
 0x907   :  { %5308 = vmatpush3.bf16.msra.mxu0 %v5307_v10 }
 0x908   :  { %5310 = vmatprep.subr.bf16.mxu0 %v5309_v20 }
 0x90b   :  { %5312 = vmatpush3.bf16.msra.mxu0 %v5311_v27 }
 0x90c   :  { %5314 = vmatprep.subr.bf16.mxu0 %v5313_v33  ;;  %v3301_v33 = vrot.slane %v2974_v36, 2 }
 0x90f   :  { %5316 = vmatpush3.bf16.msra.mxu0 %v5315_v42 }
 0x910   :  { %5318 = vmatprep.subr.bf16.mxu0 %v5317_v19 }
 0x913   :  { %5320 = vmatpush3.bf16.msra.mxu0 %v5319_v52  ;;  %v3492_v52 = vld [vmem:[%s6650_s9] ss:$0 sm:$0xff] }
 0x914   :  { %5322 = vmatprep.subr.bf16.mxu0 %v5321_v59 }
 0x917   :  { %5324 = vmatpush3.bf16.msra.mxu0 %v5323_v13 }
 0x9ad   :  { %v3041_v8 = vpop.f32.mrb[28].mxu0  ;;  %v3112_v18 = vpop.f32.mrb[36].mxu1 }
 0x9ae   :  { %v3042_v39 = vadd.f32 %v3041_v8, %v6790_v1  ;;  %v3043_v46 = vpop.f32.mrb[29].mxu0  ;;  %v4334_v49 = vpop.f32.mrb[37].mxu1  ;;  %v3113_v51 = vadd.f32 %v3112_v18, %v6028_v37 }
 0x9af   :  { %v3044_v56 = vadd.f32 %v3043_v46, %v6791_v58 }
 0x9b0   :  { %v3257_v57 = vadd.f32 %v3042_v39, %v2972_v35 }
 0x9b1   :  { %v3267_v17 = vadd.f32 %v3265_v6, %v3044_v56 }
 0x9b2   :  { %v3488_v16 = vmul.f32 -1.442695, %v3257_v57 }
 0x9b3   :  { %v3489_v24 = vmul.f32 -1.442695, %v3267_v17 }
 0x9b4   :  { %5481 = vpow2.f32 %v3488_v16 }
 0x9b5   :  { %5483 = vpow2.f32 %v3489_v24 }
 0x9be   :  { %v5482_v23 = vpop.eup %5481 }
 0x9bf   :  { %v3261_v32 = vadd.f32 1.0, %v5482_v23  ;;  %v5484_v43 = vpop.eup %5483 }
 0x9c0   :  { %v3271_v25 = vadd.f32 1.0, %v5484_v43 }
 0x9c1   :  { %5485 = vrcp.f32 %v3261_v32 }
 0x9c2   :  { %5487 = vrcp.f32 %v3271_v25 }
 0x9cb   :  { %v5486_v62 = vpop.eup %5485 }
 0x9cc   :  { %v3274_v1 = vmul.f32 %v5486_v62, %v3113_v51  ;;  %v5488_v37 = vpop.eup %5487 }
 0x9cd   :  { %v3182_v29 = vpop.f32.mrb[30].mxu0  ;;  %v3253_v58 = vpop.f32.mrb[38].mxu1  ;;  %v3279_v10 = vsub.f32 1.0, %v5488_v37  ;;  %v3281_v20 = vmul.f32 %v5488_v37, %v6570_v55 }
 0x9ce   :  { %v3277_v44 = vadd.f32 %v3275_v12, %v3274_v1  ;;  %v3183_v40 = vadd.f32 %v3182_v29, %v6022_v9  ;;  %v3184_v2 = vpop.f32.mrb[31].mxu0  ;;  %v4369_v63 = vpop.f32.mrb[39].mxu1  ;;  %v3254_v34 = vadd.f32 %v3253_v58, %v6055_v54 }
 0x9cf   :  { %v3185_v61 = vadd.f32 %v3184_v2, %v6032_v53 }
 0x9d0   :  { %5489 = vtanh.f32 %v3277_v44  ;;  %v3283_v3 = vadd.f32 %v3183_v40, %v2974_v36 }
 0x9d1   :  { %v3293_v45 = vadd.f32 %v3291_v50, %v3185_v61 }
 0x9d2   :  { %v3490_v47 = vmul.f32 -1.442695, %v3283_v3 }
 0x9d3   :  { %v3491_v31 = vmul.f32 -1.442695, %v3293_v45 }
 0x9d4   :  { %5491 = vpow2.f32 %v3490_v47 }
 0x9d5   :  { %5493 = vpow2.f32 %v3491_v31 }
 0x9da   :  { %v5490_v14 = vpop.eup %5489 }
 0x9db   :  { %v3280_v15 = vmul.f32 %v5490_v14, %v3279_v10 }
 0x9dd   :  { %v3282_v21 = vadd.f32 %v3281_v20, %v3280_v15 }
 0x9de   :  { %v5492_v9 = vpop.eup %5491 }
 0x9df   :  { %3309 = vst [vmem:[#allocation3 + $0x7] sm:$0x1] %v3282_v21  ;;  %3311 = vst [vmem:[#allocation12] sm:$0x1] %v3282_v21  ;;  %v3287_v26 = vadd.f32 1.0, %v5492_v9  ;;  %v5494_v53 = vpop.eup %5493 }
 0x9e0   :  { %v3297_v27 = vadd.f32 1.0, %v5494_v53 }
 0x9e1   :  { %5495 = vrcp.f32 %v3287_v26 }
 0x9e2   :  { %5497 = vrcp.f32 %v3297_v27 }
 0x9e6   :  { %v3313_v7 = vld [vmem:[#allocation3] sm:$0xff] }
 0x9eb   :  { %v5496_v22 = vpop.eup %5495 }
 0x9ec   :  { %v3300_v30 = vmul.f32 %v5496_v22, %v3254_v34  ;;  %v5498_v11 = vpop.eup %5497 }
 0x9ed   :  { %v3305_v38 = vsub.f32 1.0, %v5498_v11  ;;  %v3307_v19 = vmul.f32 %v5498_v11, %v6610_v0 }
 0x9ee   :  { %v3303_v28 = vadd.f32 %v3301_v33, %v3300_v30 }
 0x9f0   :  { %5499 = vtanh.f32 %v3303_v28 }
 0x9fa   :  { %v5500_v55 = vpop.eup %5499 }
 0x9fb   :  { %v3306_v42 = vmul.f32 %v5500_v55, %v3305_v38 }
 0x9fd   :  { %v3308_v60 = vadd.f32 %v3307_v19, %v3306_v42 }
 0x9ff   :  { %3310 = vst [vmem:[#allocation3 + $0x8] sm:$0x1] %v3308_v60  ;;  %3312 = vst [vmem:[#allocation12 + $0x1] sm:$0x1] %v3308_v60 }
 0xa06   :  { %v3314_v41 = vld [vmem:[#allocation3 + $0x8] sm:$0xff] }
 0xa07   :  { %3418 = vmatprep.mubr.f32.mxu0 %v3314_v41 }
 0xa08   :  { %3419 = vmatmul.mubr.f32.vlgmr.msra.gmra.mrb[32].mxu0 %v3313_v7 }
 0xadb   :  { %v3800_v54 = vpop.f32.mrb[32].mxu0 }
 0xadc   :  { %v3801_v48 = vpop.f32.mrb[33].mxu0 }
 0xadd   :  { %v3802_v59 = vadd.f32 %v3801_v48, %v3800_v54 }
 0xadf   :  { %v3421_v4 = vadd.f32 %v3802_v59, %v3492_v52 }
 0xae1   :  { %3424 = vmax.xlane.f32.xlu0 %v3421_v4 }
 0xb6e   :  { %v3425_v5 = vpop.xlane.xlu0 %3424 }
 0xb6f   :  { %v3426_v13 = vsub.f32 %v3421_v4, %v3425_v5 }
 0xb71   :  { %v3427_v8 = vmul.f32 1.442695, %v3426_v13 }
 0xb73   :  { %5501 = vpow2.f32 %v3427_v8 }
 0xb7d   :  { %v5502_v0 = vpop.eup %5501 }
 0xb7e   :  { %3429 = vadd.xlane.f32.xlu1 %v5502_v0 }
 0xb7f   :  { %5604 = shalt.err (!%p5601_p8)
}
 0xb80   :  { %s5605_s19 = scalar_lea.hbm %s6653_s12, 32 }
 0xb81   :  { %p5606_p9 = scmp.ne.s32.totalorder %s6653_s12, %s5605_s19  ;;  %p5609_p10 = scmp.lt.u32.totalorder %s5605_s19, %s6653_s12 }
 0xb83   :  { %p5611_p11 = pnand %p5609_p10, %p5606_p9 }
 0xb85   :  { %5614 = shalt.err (!%p5611_p11)
}
 0xb86   :  { %3445 = dma.vmem_to_hbm [thread:$0]  %s3443_s29, 32, %s6653_s12, [#allocation6]  }
 0xc0b   :  { %v3430_v18 = vpop.xlane.xlu1 %3429 }
 0xc0c   :  { %5503 = vrcp.f32 %v3430_v18 }
 0xc16   :  { %v5504_v35 = vpop.eup %5503 }
 0xc17   :  { %v3432_v39 = vmul.f32 %v5504_v35, %v5502_v0 }
 0xc19   :  { %3433 = vst [vmem:[%s6652_s11] sm:$0xff] %v3432_v39 }
 0xc1a   :  { %5621 = dma.done.wait [#allocation6], 32  }
 0xc1b   :  { %5622 = vsyncadd [#allocation6], 4294967264 }
 0xc1c   :  { %3451 = vsyncpa [#allocation5], 1 }
 0xc1d   :  { %3452 = vsyncpa [#allocation8], 1 }
 0xc1e   :  { %3453 = vsyncpa [#allocation11], 1 }
 0xc1f   :  { %3454 = vsyncpa [#allocation6], 1 }

</bundles_post_ra>
